<compile_context>
chip_gen: v5e
topology: v5e:2x2
jax: 0.10.0
libtpu: 0.0.40
codegen_flags: <defaults>
</compile_context>

<pallas_src>
import jax
import jax.numpy as jnp
from jax.experimental import pallas as pl
from jax.experimental.pallas import tpu as pltpu


def _round_up(x: int, m: int) -> int:
    return ((x + m - 1) // m) * m


def _vq_argmin_kernel(z_ref, emb_t_ref, e_sq_ref, idx_ref):
    """One grid step: nearest-codebook indices for a (tile_n, e_dim) activation tile.

    z_ref     : (tile_n, e_dim) f32       flattened activations tile
    emb_t_ref : (e_dim, n_e)    f32       pre-transposed codebook (constant block)
    e_sq_ref  : (1, n_e)        f32       precomputed ||e_j||^2   (constant block)
    idx_ref   : (1, 1, tile_n)  int32     lane-dense argmin indices
    """
    z = z_ref[...]                                                         # (tN, e_dim)
    # cross term on the MXU with f32 accumulation
    cross = jnp.dot(z, emb_t_ref[...], preferred_element_type=jnp.float32)  # (tN, n_e)
    z_sq = jnp.sum(z * z, axis=1, keepdims=True)                           # (tN, 1)
    # same expansion as the torch module: d = ||z||^2 + ||e||^2 - 2 z e^T
    d = z_sq + e_sq_ref[...] - 2.0 * cross                                 # (tN, n_e)
    idx = jnp.argmin(d, axis=1).astype(jnp.int32)                          # (tN,)
    idx_ref[...] = idx[None, None, :]                                      # lane-dense store


def vector_quantizer_forward(z_nchw, embedding, beta, *, tile_n=1024):
    """Pallas implementation of VectorQuantizer.forward.

    z_nchw    : (B, C, H, W) float32, C == e_dim
    embedding : (n_e, e_dim) float32 codebook
    Returns (z_q_nchw, loss, (perplexity, min_encodings, min_encoding_indices)).
    """
    B, C, H, W = z_nchw.shape
    n_e, e_dim = embedding.shape
    assert C == e_dim, "channel dim must equal embedding dim"

    emb = embedding.astype(jnp.float32)
    # glue: NCHW -> NHWC -> flatten (layout plumbing outside the kernel)
    z_nhwc = jnp.transpose(z_nchw, (0, 2, 3, 1)).astype(jnp.float32)
    z_flat = z_nhwc.reshape(-1, e_dim)
    N = z_flat.shape[0]

    # ---- tiling policy: biggest tile up to `tile_n`, padded last tile ----------
    tile_n = max(128, int(tile_n))
    if N <= tile_n:
        tile_n = _round_up(N, 128)                    # single tile covers everything
    else:
        tile_n = _round_up(tile_n, 128)
    N_pad = _round_up(N, tile_n)
    num_tiles = N_pad // tile_n

    if N_pad > N:
        z_pad = jnp.concatenate(
            [z_flat, jnp.zeros((N_pad - N, e_dim), jnp.float32)], axis=0)
    else:
        z_pad = z_flat

    # ---- codebook-side work hoisted out of the per-step kernel body ------------
    emb_t = emb.T                                     # (e_dim, n_e)
    e_sq = jnp.sum(emb * emb, axis=1)[None, :]        # (1, n_e)

    # ---- VMEM budget: double-buffered blocks, safe on v7x's 64 MiB VMEM --------
    block_bytes = 2 * 4 * (tile_n * e_dim + e_dim * n_e + n_e + tile_n)
    vmem_limit = int(min(48 * 1024 * 1024, max(16 * 1024 * 1024, 4 * block_bytes)))

    cost = pl.CostEstimate(
        flops=2 * N_pad * n_e * e_dim + 4 * N_pad * n_e,
        transcendentals=0,
        bytes_accessed=(N_pad * e_dim + n_e * e_dim + n_e + N_pad) * 4,
    )

    idx_tiles = pl.pallas_call(
        _vq_argmin_kernel,
        out_shape=jax.ShapeDtypeStruct((num_tiles, 1, tile_n), jnp.int32),
        grid_spec=pltpu.PrefetchScalarGridSpec(
            num_scalar_prefetch=0,
            grid=(num_tiles,),
            in_specs=[
                pl.BlockSpec((tile_n, e_dim), lambda i: (i, 0)),
                pl.BlockSpec((e_dim, n_e), lambda i: (0, 0)),   # constant codebook block
                pl.BlockSpec((1, n_e), lambda i: (0, 0)),       # constant ||e||^2 block
            ],
            out_specs=pl.BlockSpec((1, 1, tile_n), lambda i: (i, 0, 0)),
        ),
        compiler_params=pltpu.CompilerParams(
            dimension_semantics=("parallel",),        # independent tiles -> both v7x TCs
            vmem_limit_bytes=vmem_limit,
        ),
        cost_estimate=cost,
    )(z_pad, emb_t, e_sq)

    # ---- cheap plain-JAX glue (negligible vs. the distance/argmin work) --------
    idx = idx_tiles.reshape(-1)[:N]                           # (N,)
    # TODO(synk): torch returns int64 indices; int32 is used here (TPU-native).
    min_encoding_indices = idx[:, None].astype(jnp.int32)     # (N, 1)

    min_encodings = jax.nn.one_hot(idx, n_e, dtype=jnp.float32)   # (N, n_e), == scatter_
    z_q_flat = jnp.take(emb, idx, axis=0)                     # exactly one_hot @ embedding

    sg = jax.lax.stop_gradient
    # loss = mean((sg[z_q]-z)^2) + beta*mean((z_q-sg[z])^2)  (same structure as torch)
    loss = (jnp.mean((sg(z_q_flat) - z_flat) ** 2)
            + jnp.float32(beta) * jnp.mean((z_q_flat - sg(z_flat)) ** 2))

    # straight-through estimator: z + (z_q - z).detach()
    z_q_st = z_flat + sg(z_q_flat - z_flat)
    z_q_nchw = jnp.transpose(z_q_st.reshape(B, H, W, e_dim), (0, 3, 1, 2))

    e_mean = jnp.mean(min_encodings, axis=0)
    perplexity = jnp.exp(-jnp.sum(e_mean * jnp.log(e_mean + 1e-10)))

    return z_q_nchw, loss, (perplexity, min_encodings, min_encoding_indices)


if __name__ == "__main__":
    # module hyperparameters (small, consistent with the forward pass)
    n_e = 128      # number of codebook entries
    e_dim = 4      # embedding dim == channel dim of z
    beta = 0.25

    key = jax.random.PRNGKey(0)
    k_emb, k_z = jax.random.split(key)

    # deterministic init: embedding.weight.data.uniform_(-1/n_e, 1/n_e)
    embedding = jax.random.uniform(
        k_emb, (n_e, e_dim), jnp.float32, -1.0 / n_e, 1.0 / n_e)

    # encoder output z, NCHW
    B, C, H, W = 2, e_dim, 16, 16
    z = jax.random.normal(k_z, (B, C, H, W), dtype=jnp.float32)

    z_q, loss, (perplexity, min_encodings, min_encoding_indices) = (
        vector_quantizer_forward(z, embedding, beta))
    jax.block_until_ready((z_q, loss, perplexity, min_encodings,
                           min_encoding_indices))

    # shape / dtype sanity checks
    N = B * H * W
    assert z_q.shape == (B, C, H, W)
    assert min_encodings.shape == (N, n_e)
    assert min_encoding_indices.shape == (N, 1)
    assert min_encoding_indices.dtype == jnp.int32
    assert loss.shape == () and perplexity.shape == ()

    # light numerical sanity vs. a pure-JAX reference (tolerant to rare
    # matmul-precision tie flips)
    zf = jnp.transpose(z, (0, 2, 3, 1)).reshape(-1, e_dim)
    d_ref = (jnp.sum(zf ** 2, axis=1, keepdims=True)
             + jnp.sum(embedding ** 2, axis=1)[None, :]
             - 2.0 * jnp.dot(zf, embedding.T,
                             precision=jax.lax.Precision.HIGHEST))
    idx_ref = jnp.argmin(d_ref, axis=1).astype(jnp.int32)
    mism = int(jnp.sum(idx_ref != min_encoding_indices[:, 0]))
    assert mism <= max(1, N // 100), f"too many argmin mismatches: {mism}"
    if mism == 0:
        zq_ref = jnp.transpose(
            jnp.take(embedding, idx_ref, axis=0).reshape(B, H, W, e_dim),
            (0, 3, 1, 2))
        assert bool(jnp.allclose(z_q, zq_ref, atol=1e-6))

    print("KERNEL_OK")
</pallas_src>

<mosaic_0001>
module attributes {stable_mosaic.version = 11 : i64} {
  func.func @_vq_argmin_kernel(%arg0: i32, %arg1: memref<512x4xf32, #tpu.memory_space<vmem>>, %arg2: memref<4x128xf32, #tpu.memory_space<vmem>>, %arg3: memref<1x128xf32, #tpu.memory_space<vmem>>, %arg4: memref<1x1x512xi32, #tpu.memory_space<vmem>>) attributes {dimension_semantics = [#tpu.dimension_semantics<parallel>], iteration_bounds = array<i64: 1>, scalar_prefetch = 0 : i64, scratch_operands = 0 : i64, tpu.core_type = #tpu.core_type<tc>, window_params = [{transform_indices = @transform_0, window_bounds = array<i64: 512, 4>}, {pipeline_mode = #tpu.pipeline_mode<synchronous>, transform_indices = @transform_1, window_bounds = array<i64: 4, 128>}, {pipeline_mode = #tpu.pipeline_mode<synchronous>, transform_indices = @transform_2, window_bounds = array<i64: 1, 128>}, {transform_indices = @transform_3, window_bounds = array<i64: 1, 1, 512>}]} {
    %c0 = arith.constant 0 : index
    %c0_0 = arith.constant 0 : index
    %0 = vector.load %arg1[%c0, %c0_0] : memref<512x4xf32, #tpu.memory_space<vmem>>, vector<512x4xf32>
    %c0_1 = arith.constant 0 : index
    %c0_2 = arith.constant 0 : index
    %1 = vector.load %arg2[%c0_1, %c0_2] : memref<4x128xf32, #tpu.memory_space<vmem>>, vector<4x128xf32>
    %cst = arith.constant dense<0.000000e+00> : vector<512x128xf32>
    %2 = tpu.matmul %0, %1, %cst {dimension_numbers = #tpu.dot_dimension_numbers<[1], [0], [0], [1], [0, 0, 1, 1], [], []>} : vector<512x4xf32>, vector<4x128xf32>, vector<512x128xf32> -> vector<512x128xf32>
    %3 = arith.mulf %0, %0 : vector<512x4xf32>
    %cst_3 = arith.constant dense<0.000000e+00> : vector<512xf32>
    %4 = vector.multi_reduction <add>, %3, %cst_3 [1] : vector<512x4xf32> to vector<512xf32>
    %5 = vector.shape_cast %4 : vector<512xf32> to vector<512x1xf32>
    %c0_4 = arith.constant 0 : index
    %c0_5 = arith.constant 0 : index
    %6 = vector.load %arg3[%c0_4, %c0_5] : memref<1x128xf32, #tpu.memory_space<vmem>>, vector<1x128xf32>
    %7 = vector.broadcast %5 : vector<512x1xf32> to vector<512x128xf32>
    %8 = vector.broadcast %6 : vector<1x128xf32> to vector<512x128xf32>
    %9 = arith.addf %7, %8 : vector<512x128xf32>
    %cst_6 = arith.constant 2.000000e+00 : f32
    %10 = vector.broadcast %cst_6 : f32 to vector<512x128xf32>
    %11 = arith.mulf %10, %2 : vector<512x128xf32>
    %12 = arith.subf %9, %11 : vector<512x128xf32>
    %13 = tpu.reduce_index %12 {axis = 1 : i32, kind = #tpu.reduction_kind<arg_min>} : vector<512x128xf32> -> vector<512xi32>
    %14 = vector.shape_cast %13 : vector<512xi32> to vector<1x1x512xi32>
    %c0_7 = arith.constant 0 : index
    %c0_8 = arith.constant 0 : index
    %c0_9 = arith.constant 0 : index
    %15 = vector.load %arg4[%c0_7, %c0_8, %c0_9] : memref<1x1x512xi32, #tpu.memory_space<vmem>>, vector<1x1x512xi32>
    tpu.vector_store %arg4[%c0_7, %c0_8, %c0_9], %14 {strides = array<i32>} : memref<1x1x512xi32, #tpu.memory_space<vmem>>, vector<1x1x512xi32>,
    return
  }
  func.func @transform_0(%arg0: i32) -> (i32, i32) {
    %c0_i32 = arith.constant 0 : i32
    %c0_i32_0 = arith.constant 0 : i32
    return %arg0, %c0_i32 : i32, i32
  }
  func.func @transform_1(%arg0: i32) -> (i32, i32) {
    %c0_i32 = arith.constant 0 : i32
    %c0_i32_0 = arith.constant 0 : i32
    %c0_i32_1 = arith.constant 0 : i32
    return %c0_i32, %c0_i32_0 : i32, i32
  }
  func.func @transform_2(%arg0: i32) -> (i32, i32) {
    %c0_i32 = arith.constant 0 : i32
    %c0_i32_0 = arith.constant 0 : i32
    %c0_i32_1 = arith.constant 0 : i32
    return %c0_i32, %c0_i32_0 : i32, i32
  }
  func.func @transform_3(%arg0: i32) -> (i32, i32, i32) {
    %c0_i32 = arith.constant 0 : i32
    %c0_i32_0 = arith.constant 0 : i32
    %c0_i32_1 = arith.constant 0 : i32
    return %arg0, %c0_i32, %c0_i32_0 : i32, i32, i32
  }
}

</mosaic_0001>

<bundles_post_ra>
// kernel: tpu_custom_call.1
= control target key start
LH: loop header
LB: loop body
LE: loop exit
PB: predicated region body
PF: predicated region fallthrough
CT: control target
= control target key end

     0   :  { %vm273_vm0 = vcmask 1043456   ;;  %vm80_vm1 = vcmask 31744   ;;  %s4128_s0 = inlined_call_operand.vmem [shape: f32[512,4], index: 0, kind: input, shape index: {}]   ;;  %s4129_s1 = inlined_call_operand.vmem [shape: f32[4,128], index: 1, kind: input, shape index: {}]   ;;  %s4130_s2 = inlined_call_operand.vmem [shape: f32[1,128], index: 2, kind: input, shape index: {}]   ;;  %s4131_s3 = inlined_call_operand.hbm [shape: s32[1,1,512], index: 3, kind: output, shape index: {}]  }
   0x1   :  { %v79_v0 = vld [vmem:[%s4129_s1] sm:$0xf]  ;;  %v17_v5 = vld [vmem:[%s4128_s0 + $0x10] sm:$0xff]  ;;  %v16_v9 = vld [vmem:[%s4128_s0 + $0x8] sm:$0xff] }
   0x2   :  { %v15_v1 = vld [vmem:[%s4128_s0] sm:$0xff]  ;;  %2539 = vmatpush.msk.msra.mxu0 %vm273_vm0, %v79_v0  ;;  %2604 = vmatpush.msk.msra.mxu1 %vm273_vm0, %v79_v0  ;;  %v488_v8 = vmul.f32 %v17_v5, %v17_v5  ;;  %v2703_v11 = vld [vmem:[%s4128_s0 + $0x28] sm:$0xff]  ;;  %v18_v12 = vld [vmem:[%s4128_s0 + $0x18] sm:$0xff]  ;;  %v487_v15 = vmul.f32 %v16_v9, %v16_v9 }
   0x3   :  { %v2671_v2 = vld [vmem:[%s4128_s0 + $0x80] sm:$0xff]  ;;  %v486_v6 = vmul.f32 %v15_v1, %v15_v1  ;;  %2605 = vmatpush.msk.msra.mxu2 %vm273_vm0, %v79_v0  ;;  %2540 = vmatmul.msk.f32.vlgmr.msra.gmra.mxu0 %vm80_vm1, %v15_v1  ;;  %v491_v16 = vmul.f32 %v2703_v11, %v2703_v11  ;;  %v489_v17 = vmul.f32 %v18_v12, %v18_v12  ;;  %v2716_v18 = vld [vmem:[%s4128_s0 + $0x88] sm:$0xff] }
   0x4   :  { %v2678_v3 = vld [vmem:[%s4128_s0 + $0x100] sm:$0xff]  ;;  %2556 = vmatmul.msk.f32.vlgmr.msra.gmra.mxu1 %vm80_vm1, %v2671_v2  ;;  %v556_v14 = vsel %vm80_vm1, %v488_v8, 0.0  ;;  %2606 = vmatpush.msk.msra.mxu3 %vm273_vm0, %v79_v0  ;;  %v2721_v19 = vld [vmem:[%s4128_s0 + $0x108] sm:$0xff]  ;;  %v553_v20 = vsel %vm80_vm1, %v487_v15, 0.0 }
   0x5   :  { %v2683_v4 = vld [vmem:[%s4128_s0 + $0x20] sm:$0xff]  ;;  %2572 = vmatmul.msk.f32.vlgmr.msra.gmra.mxu2 %vm80_vm1, %v2678_v3  ;;  %v550_v10 = vsel %vm80_vm1, %v486_v6, 0.0  ;;  %557 = vadd.xlane.f32.xlu1 %v556_v14 }
   0x6   :  { %v490_v7 = vmul.f32 %v2683_v4, %v2683_v4  ;;  %551 = vadd.xlane.f32.xlu0 %v550_v10 }
   0x8   :  { %v562_v13 = vsel %vm80_vm1, %v490_v7, 0.0 }
   0x9   :  { %563 = vadd.xlane.f32.xlu2 %v562_v13 }
   0xa   :  { %8 = vsyncpa [#allocation3], 0  ;;  %v565_v21 = vsel %vm80_vm1, %v491_v16, 0.0  ;;  %v559_v22 = vsel %vm80_vm1, %v489_v17, 0.0  ;;  %v2730_v23 = vld [vmem:[%s4128_s0 + $0x30] sm:$0xff]  ;;  %v2739_v24 = vld [vmem:[%s4128_s0 + $0x40] sm:$0xff]  ;;  %v503_v61 = vmul.f32 %v2716_v18, %v2716_v18  ;;  %v502_v62 = vmul.f32 %v2671_v2, %v2671_v2 }
   0xb   :  { %2541 = vmatmul.msk.f32.gmra.mxu0 %vm80_vm1, %v16_v9  ;;  %v2744_v25 = vld [vmem:[%s4128_s0 + $0x38] sm:$0xff]  ;;  %v492_v26 = vmul.f32 %v2730_v23, %v2730_v23  ;;  %v494_v27 = vmul.f32 %v2739_v24, %v2739_v24  ;;  %v2755_v29 = vld [vmem:[%s4128_s0 + $0x90] sm:$0xff]  ;;  %v2769_v34 = vld [vmem:[%s4128_s0 + $0x48] sm:$0xff]  ;;  %vm2358_vm2 = vcmask 130112   ;;  %vm2362_vm3 = vcmask 195712   ;;  %s2530_s8 = sshll.u32 %s4131_s3, 4  ;;  %s2531_s8 = int_to_ptr.hbm [resolvable:$true] %s2530_s8 }
   0xc   :  { %2557 = vmatmul.msk.f32.gmra.mxu1 %vm80_vm1, %v2716_v18  ;;  %v493_v28 = vmul.f32 %v2744_v25, %v2744_v25  ;;  %v2760_v30 = vld [vmem:[%s4128_s0 + $0x110] sm:$0xff]  ;;  %v2778_v35 = vld [vmem:[%s4128_s0 + $0x58] sm:$0xff]  ;;  %v2788_v37 = vld [vmem:[%s4128_s0 + $0x180] sm:$0xff]  ;;  %v495_v38 = vmul.f32 %v2769_v34, %v2769_v34  ;;  %v504_v6 = vmul.f32 %v2755_v29, %v2755_v29  ;;  %vm2366_vm4 = vcmask 261312  }
   0xd   :  { %2573 = vmatmul.msk.f32.gmra.mxu2 %vm80_vm1, %v2721_v19  ;;  %560 = vadd.xlane.f32.xlu1 %v559_v22  ;;  %v568_v31 = vsel %vm80_vm1, %v492_v26, 0.0  ;;  %v574_v32 = vsel %vm80_vm1, %v494_v27, 0.0  ;;  %v2783_v36 = vld [vmem:[%s4128_s0 + $0x50] sm:$0xff]  ;;  %v497_v39 = vmul.f32 %v2778_v35, %v2778_v35  ;;  %v34_v41 = vld [vmem:[%s4128_s0 + $0x98] sm:$0xff]  ;;  %v2813_v46 = vld [vmem:[%s4128_s0 + $0x60] sm:$0xff]  ;;  %vm2370_vm5 = vcmask 326912  }
   0xe   :  { %554 = vadd.xlane.f32.xlu0 %v553_v20  ;;  %v571_v33 = vsel %vm80_vm1, %v493_v28, 0.0  ;;  %2588 = vmatmul.msk.f32.vlgmr.msra.gmra.mxu3 %vm80_vm1, %v2788_v37  ;;  %v496_v40 = vmul.f32 %v2783_v36, %v2783_v36  ;;  %v2804_v42 = vld [vmem:[%s4128_s0 + $0x118] sm:$0xff]  ;;  %v577_v43 = vsel %vm80_vm1, %v495_v38, 0.0  ;;  %v2821_v47 = vld [vmem:[%s4128_s0 + $0x70] sm:$0xff]  ;;  %v2826_v48 = vld [vmem:[%s4128_s0 + $0x68] sm:$0xff]  ;;  %v498_v50 = vmul.f32 %v2813_v46, %v2813_v46 }
   0xf   :  { %v583_v44 = vsel %vm80_vm1, %v497_v39, 0.0  ;;  %v2831_v49 = vld [vmem:[%s4128_s0 + $0x188] sm:$0xff]  ;;  %v500_v51 = vmul.f32 %v2821_v47, %v2821_v47  ;;  %v499_v52 = vmul.f32 %v2826_v48, %v2826_v48  ;;  %v35_v53 = vld [vmem:[%s4128_s0 + $0xa0] sm:$0xff]  ;;  %v2857_v58 = vld [vmem:[%s4128_s0 + $0x78] sm:$0xff]  ;;  %v505_v8 = vmul.f32 %v34_v41, %v34_v41 }
  0x10   :  { %v580_v45 = vsel %vm80_vm1, %v496_v40, 0.0  ;;  %v2847_v54 = vld [vmem:[%s4128_s0 + $0x120] sm:$0xff]  ;;  %v586_v55 = vsel %vm80_vm1, %v498_v50, 0.0  ;;  %v2865_v59 = vld [vmem:[%s4128_s0 + $0x190] sm:$0xff]  ;;  %v501_v60 = vmul.f32 %v2857_v58, %v2857_v58  ;;  %v36_v63 = vld [vmem:[%s4128_s0 + $0xa8] sm:$0xff]  ;;  %v506_v7 = vmul.f32 %v35_v53, %v35_v53 }
  0x11   :  { %566 = vadd.xlane.f32.xlu2 %v565_v21  ;;  %v592_v56 = vsel %vm80_vm1, %v500_v51, 0.0  ;;  %v589_v57 = vsel %vm80_vm1, %v499_v52, 0.0  ;;  %v2881_v0 = vld [vmem:[%s4128_s0 + $0x128] sm:$0xff]  ;;  %v2894_v2 = vld [vmem:[%s4128_s0 + $0x198] sm:$0xff]  ;;  %v37_v9 = vld [vmem:[%s4128_s0 + $0xb0] sm:$0xff]  ;;  %v607_v13 = vsel %vm80_vm1, %v505_v8, 0.0  ;;  %v507_v16 = vmul.f32 %v36_v63, %v36_v63 }
  0x12   :  { %v595_v1 = vsel %vm80_vm1, %v501_v60, 0.0  ;;  %v2906_v10 = vld [vmem:[%s4128_s0 + $0x130] sm:$0xff]  ;;  %v38_v14 = vld [vmem:[%s4128_s0 + $0xb8] sm:$0xff]  ;;  %v2922_v15 = vld [vmem:[%s4128_s0 + $0x1a0] sm:$0xff]  ;;  %v508_v18 = vmul.f32 %v37_v9, %v37_v9  ;;  %v520_v8 = vmul.f32 %v2760_v30, %v2760_v30  ;;  %vm2374_vm6 = vcmask 392512  }
  0x13   :  { %2542 = vmatmul.msk.f32.gmra.mxu0 %vm80_vm1, %v17_v5  ;;  %v598_v5 = vsel %vm80_vm1, %v502_v62, 0.0  ;;  %v509_v17 = vmul.f32 %v38_v14, %v38_v14  ;;  %v2929_v20 = vld [vmem:[%s4128_s0 + $0x138] sm:$0xff]  ;;  %v613_v21 = vsel %vm80_vm1, %v507_v16, 0.0  ;;  %v39_v26 = vld [vmem:[%s4128_s0 + $0xc0] sm:$0xff]  ;;  %v41_v27 = vld [vmem:[%s4128_s0 + $0xd0] sm:$0xff]  ;;  %v518_v62 = vmul.f32 %v2678_v3, %v2678_v3 }
  0x14   :  { %2558 = vmatmul.msk.f32.gmra.mxu1 %vm80_vm1, %v2755_v29  ;;  %v2951_v28 = vld [vmem:[%s4128_s0 + $0x1a8] sm:$0xff]  ;;  %v510_v29 = vmul.f32 %v39_v26, %v39_v26  ;;  %v3006_v60 = vld [vmem:[%s4128_s0 + $0xf8] sm:$0xff]  ;;  %v3034_v3 = vld [vmem:[%s4128_s0 + $0x1c0] sm:$0xff]  ;;  %vm2378_vm7 = vcmask 458112   ;;  %vm2382_vm8 = vcmask 523712   ;;  %vm2386_vm9 = vcmask 589312  }
  0x15   :  { %2574 = vmatmul.msk.f32.gmra.mxu2 %vm80_vm1, %v2760_v30  ;;  %572 = vadd.xlane.f32.xlu1 %v571_v33  ;;  %v619_v22 = vsel %vm80_vm1, %v509_v17, 0.0  ;;  %v2958_v33 = vld [vmem:[%s4128_s0 + $0x140] sm:$0xff]  ;;  %v56_v52 = vld [vmem:[%s4128_s0 + $0x148] sm:$0xff]  ;;  %v522_v30 = vmul.f32 %v2847_v54, %v2847_v54  ;;  %vm2390_vm10 = vcmask 654912   ;;  %vm2394_vm11 = vcmask 720512  }
  0x16   :  { %569 = vadd.xlane.f32.xlu0 %v568_v31  ;;  %2589 = vmatmul.msk.f32.gmra.mxu3 %vm80_vm1, %v2831_v49  ;;  %v512_v31 = vmul.f32 %v41_v27, %v41_v27  ;;  %v622_v38 = vsel %vm80_vm1, %v510_v29, 0.0  ;;  %v61_v29 = vld [vmem:[%s4128_s0 + $0x170] sm:$0xff]  ;;  %vm2398_vm12 = vcmask 786112   ;;  %vm2402_vm13 = vcmask 851712  }
  0x17   :  { %v658_v16 = vsel %vm80_vm1, %v522_v30, 0.0  ;;  %v542_v30 = vmul.f32 %v3034_v3, %v3034_v3  ;;  %vm2406_vm14 = vcmask 917312   ;;  %vm2410_vm15 = vcmask 982912  }
  0x18   :  { %v628_v39 = vsel %vm80_vm1, %v512_v31, 0.0  ;;  %vm2414_vm0 = vcmask 1048512  }
  0x19   :  { %575 = vadd.xlane.f32.xlu2 %v574_v32 }
  0x1b   :  { %2543 = vmatmul.msk.f32.gmra.mxu0 %vm80_vm1, %v18_v12  ;;  %v610_v12 = vsel %vm80_vm1, %v506_v7, 0.0  ;;  %v521_v7 = vmul.f32 %v2804_v42, %v2804_v42 }
  0x1c   :  { %2559 = vmatmul.msk.f32.gmra.mxu1 %vm80_vm1, %v34_v41  ;;  %v42_v41 = vld [vmem:[%s4128_s0 + $0xd8] sm:$0xff] }
  0x1d   :  { %2575 = vmatmul.msk.f32.gmra.mxu2 %vm80_vm1, %v2804_v42  ;;  %581 = vadd.xlane.f32.xlu1 %v580_v45  ;;  %v513_v45 = vmul.f32 %v42_v41, %v42_v41  ;;  %v523_v42 = vmul.f32 %v2881_v0, %v2881_v0 }
  0x1e   :  { %578 = vadd.xlane.f32.xlu0 %v577_v43  ;;  %2590 = vmatmul.msk.f32.gmra.mxu3 %vm80_vm1, %v2865_v59  ;;  %v2974_v43 = vld [vmem:[%s4128_s0 + $0xe8] sm:$0xff] }
  0x1f   :  { %v515_v50 = vmul.f32 %v2974_v43, %v2974_v43 }
  0x21   :  { %584 = vadd.xlane.f32.xlu2 %v583_v44  ;;  %v2982_v44 = vld [vmem:[%s4128_s0 + $0x1b0] sm:$0xff] }
  0x23   :  { %2544 = vmatmul.msk.f32.gmra.mxu0 %vm80_vm1, %v2683_v4  ;;  %v601_v4 = vsel %vm80_vm1, %v503_v61, 0.0 }
  0x24   :  { %2560 = vmatmul.msk.f32.gmra.mxu1 %vm80_vm1, %v35_v53  ;;  %v631_v53 = vsel %vm80_vm1, %v513_v45, 0.0 }
  0x25   :  { %2576 = vmatmul.msk.f32.gmra.mxu2 %vm80_vm1, %v2847_v54  ;;  %590 = vadd.xlane.f32.xlu1 %v589_v57  ;;  %v2999_v57 = vld [vmem:[%s4128_s0 + $0xf0] sm:$0xff] }
  0x26   :  { %587 = vadd.xlane.f32.xlu0 %v586_v55  ;;  %2591 = vmatmul.msk.f32.gmra.mxu3 %vm80_vm1, %v2894_v2  ;;  %v637_v55 = vsel %vm80_vm1, %v515_v50, 0.0  ;;  %v516_v61 = vmul.f32 %v2999_v57, %v2999_v57  ;;  %v3078_v54 = vld [vmem:[%s4128_s0 + $0x1d0] sm:$0xff] }
  0x29   :  { %593 = vadd.xlane.f32.xlu2 %v592_v56 }
  0x2b   :  { %2545 = vmatmul.msk.f32.gmra.mxu0 %vm80_vm1, %v2703_v11  ;;  %v604_v11 = vsel %vm80_vm1, %v504_v6, 0.0 }
  0x2c   :  { %2561 = vmatmul.msk.f32.gmra.mxu1 %vm80_vm1, %v36_v63  ;;  %v517_v63 = vmul.f32 %v3006_v60, %v3006_v60 }
  0x2d   :  { %2577 = vmatmul.msk.f32.gmra.mxu2 %vm80_vm1, %v2881_v0  ;;  %599 = vadd.xlane.f32.xlu1 %v598_v5  ;;  %v646_v5 = vsel %vm80_vm1, %v518_v62, 0.0  ;;  %v527_v0 = vmul.f32 %v56_v52, %v56_v52 }
  0x2e   :  { %596 = vadd.xlane.f32.xlu0 %v595_v1  ;;  %2592 = vmatmul.msk.f32.gmra.mxu3 %vm80_vm1, %v2922_v15  ;;  %v57_v1 = vld [vmem:[%s4128_s0 + $0x150] sm:$0xff]  ;;  %v643_v6 = vsel %vm80_vm1, %v517_v63, 0.0 }
  0x31   :  { %602 = vadd.xlane.f32.xlu2 %v601_v4  ;;  %v640_v4 = vsel %vm80_vm1, %v516_v61, 0.0 }
  0x33   :  { %2546 = vmatmul.msk.f32.gmra.mxu0 %vm80_vm1, %v2730_v23  ;;  %v616_v23 = vsel %vm80_vm1, %v508_v18, 0.0  ;;  %v661_v18 = vsel %vm80_vm1, %v523_v42, 0.0 }
  0x34   :  { %2562 = vmatmul.msk.f32.gmra.mxu1 %vm80_vm1, %v37_v9  ;;  %v58_v9 = vld [vmem:[%s4128_s0 + $0x158] sm:$0xff] }
  0x35   :  { %2578 = vmatmul.msk.f32.gmra.mxu2 %vm80_vm1, %v2906_v10  ;;  %608 = vadd.xlane.f32.xlu1 %v607_v13  ;;  %v652_v13 = vsel %vm80_vm1, %v520_v8, 0.0 }
  0x36   :  { %605 = vadd.xlane.f32.xlu0 %v604_v11  ;;  %2593 = vmatmul.msk.f32.gmra.mxu3 %vm80_vm1, %v2951_v28 }
  0x39   :  { %611 = vadd.xlane.f32.xlu2 %v610_v12  ;;  %v655_v12 = vsel %vm80_vm1, %v521_v7, 0.0 }
  0x3b   :  { %2547 = vmatmul.msk.f32.gmra.mxu0 %vm80_vm1, %v2744_v25  ;;  %v40_v25 = vld [vmem:[%s4128_s0 + $0xc8] sm:$0xff] }
  0x3c   :  { %2563 = vmatmul.msk.f32.gmra.mxu1 %vm80_vm1, %v38_v14  ;;  %v511_v32 = vmul.f32 %v40_v25, %v40_v25  ;;  %v59_v14 = vld [vmem:[%s4128_s0 + $0x160] sm:$0xff] }
  0x3d   :  { %2579 = vmatmul.msk.f32.gmra.mxu2 %vm80_vm1, %v2929_v20  ;;  %617 = vadd.xlane.f32.xlu1 %v616_v23  ;;  %v673_v23 = vsel %vm80_vm1, %v527_v0, 0.0  ;;  %v718_v0 = vsel %vm80_vm1, %v542_v30, 0.0 }
  0x3e   :  { %614 = vadd.xlane.f32.xlu0 %v613_v21  ;;  %v625_v40 = vsel %vm80_vm1, %v511_v32, 0.0  ;;  %2594 = vmatmul.msk.f32.gmra.mxu3 %vm80_vm1, %v2982_v44  ;;  %v60_v21 = vld [vmem:[%s4128_s0 + $0x168] sm:$0xff] }
  0x41   :  { %620 = vadd.xlane.f32.xlu2 %v619_v22 }
  0x43   :  { %2548 = vmatmul.msk.f32.gmra.mxu0 %vm80_vm1, %v2739_v24  ;;  %v43_v24 = vld [vmem:[%s4128_s0 + $0xe0] sm:$0xff] }
  0x44   :  { %2564 = vmatmul.msk.f32.gmra.mxu1 %vm80_vm1, %v39_v26  ;;  %v514_v51 = vmul.f32 %v43_v24, %v43_v24 }
  0x45   :  { %2580 = vmatmul.msk.f32.gmra.mxu2 %vm80_vm1, %v2958_v33  ;;  %626 = vadd.xlane.f32.xlu1 %v625_v40 }
  0x46   :  { %623 = vadd.xlane.f32.xlu0 %v622_v38  ;;  %v634_v56 = vsel %vm80_vm1, %v514_v51, 0.0  ;;  %v3117_v38 = vld [vmem:[%s4128_s0 + $0x1e0] sm:$0xff] }
  0x49   :  { %629 = vadd.xlane.f32.xlu2 %v628_v39  ;;  %v62_v39 = vld [vmem:[%s4128_s0 + $0x178] sm:$0xff] }
  0x4a   :  { %v533_v40 = vmul.f32 %v62_v39, %v62_v39 }
  0x4b   :  { %2549 = vmatmul.msk.f32.gmra.mxu0 %vm80_vm1, %v2769_v34  ;;  %v3011_v34 = vld [vmem:[%s4128_s0 + $0x1b8] sm:$0xff] }
  0x4c   :  { %2565 = vmatmul.msk.f32.gmra.mxu1 %vm80_vm1, %v40_v25  ;;  %2595 = vmatmul.msk.f32.gmra.mxu3 %vm80_vm1, %v3011_v34  ;;  %v529_v25 = vmul.f32 %v58_v9, %v58_v9  ;;  %v691_v51 = vsel %vm80_vm1, %v533_v40, 0.0 }
  0x4d   :  { %2581 = vmatmul.msk.f32.gmra.mxu2 %vm80_vm1, %v56_v52  ;;  %635 = vadd.xlane.f32.xlu1 %v634_v56  ;;  %v535_v56 = vmul.f32 %v2831_v49, %v2831_v49  ;;  %v537_v49 = vmul.f32 %v2894_v2, %v2894_v2 }
  0x4e   :  { %632 = vadd.xlane.f32.xlu0 %v631_v53  ;;  %v3141_v53 = vld [vmem:[%s4128_s0 + $0x1e8] sm:$0xff] }
  0x51   :  { %638 = vadd.xlane.f32.xlu2 %v637_v55  ;;  %v536_v55 = vmul.f32 %v2865_v59, %v2865_v59  ;;  %v3166_v59 = vld [vmem:[%s4128_s0 + $0x1f0] sm:$0xff] }
  0x53   :  { %2550 = vmatmul.msk.f32.gmra.mxu0 %vm80_vm1, %v2783_v36  ;;  %v519_v36 = vmul.f32 %v2721_v19, %v2721_v19  ;;  %v3057_v19 = vld [vmem:[%s4128_s0 + $0x1c8] sm:$0xff] }
  0x54   :  { %2566 = vmatmul.msk.f32.gmra.mxu1 %vm80_vm1, %v41_v27  ;;  %2596 = vmatmul.msk.f32.gmra.mxu3 %vm80_vm1, %v3034_v3  ;;  %v530_v27 = vmul.f32 %v59_v14, %v59_v14  ;;  %v543_v3 = vmul.f32 %v3057_v19, %v3057_v19 }
  0x55   :  { %2582 = vmatmul.msk.f32.gmra.mxu2 %vm80_vm1, %v57_v1  ;;  %644 = vadd.xlane.f32.xlu1 %v643_v6  ;;  %v649_v11 = vsel %vm80_vm1, %v519_v36, 0.0  ;;  %v538_v6 = vmul.f32 %v2922_v15, %v2922_v15  ;;  %v540_v15 = vmul.f32 %v2982_v44, %v2982_v44 }
  0x56   :  { %641 = vadd.xlane.f32.xlu0 %v640_v4  ;;  %v682_v32 = vsel %vm80_vm1, %v530_v27, 0.0  ;;  %v700_v4 = vsel %vm80_vm1, %v536_v55, 0.0  ;;  %v721_v27 = vsel %vm80_vm1, %v543_v3, 0.0 }
  0x57   :  { %v706_v2 = vsel %vm80_vm1, %v538_v6, 0.0 }
  0x59   :  { %647 = vadd.xlane.f32.xlu2 %v646_v5  ;;  %v539_v5 = vmul.f32 %v2951_v28, %v2951_v28  ;;  %v3190_v28 = vld [vmem:[%s4128_s0 + $0x1f8] sm:$0xff] }
  0x5b   :  { %2551 = vmatmul.msk.f32.gmra.mxu0 %vm80_vm1, %v2778_v35  ;;  %v524_v35 = vmul.f32 %v2906_v10, %v2906_v10  ;;  %v526_v10 = vmul.f32 %v2958_v33, %v2958_v33  ;;  %v679_v33 = vsel %vm80_vm1, %v529_v25, 0.0 }
  0x5c   :  { %2567 = vmatmul.msk.f32.gmra.mxu1 %vm80_vm1, %v42_v41  ;;  %2597 = vmatmul.msk.f32.gmra.mxu3 %vm80_vm1, %v3057_v19  ;;  %v532_v41 = vmul.f32 %v61_v29, %v61_v29 }
  0x5d   :  { %2583 = vmatmul.msk.f32.gmra.mxu2 %vm80_vm1, %v58_v9  ;;  %653 = vadd.xlane.f32.xlu1 %v652_v13  ;;  %v664_v17 = vsel %vm80_vm1, %v524_v35, 0.0  ;;  %v670_v26 = vsel %vm80_vm1, %v526_v10, 0.0  ;;  %v709_v13 = vsel %vm80_vm1, %v539_v5, 0.0  ;;  %v541_v35 = vmul.f32 %v3011_v34, %v3011_v34  ;;  %v3214_v34 = vld [vmem:[%s4130_s2] ss:$0 sm:$0xff] }
  0x5e   :  { %650 = vadd.xlane.f32.xlu0 %v649_v11  ;;  %v688_v52 = vsel %vm80_vm1, %v532_v41, 0.0  ;;  %v544_v10 = vmul.f32 %v3078_v54, %v3078_v54 }
  0x5f   :  { %v715_v44 = vsel %vm80_vm1, %v541_v35, 0.0 }
  0x61   :  { %656 = vadd.xlane.f32.xlu2 %v655_v12  ;;  %v703_v12 = vsel %vm80_vm1, %v537_v49, 0.0 }
  0x63   :  { %2552 = vmatmul.msk.f32.gmra.mxu0 %vm80_vm1, %v2813_v46  ;;  %v525_v46 = vmul.f32 %v2929_v20, %v2929_v20  ;;  %v3099_v20 = vld [vmem:[%s4128_s0 + $0x1d8] sm:$0xff] }
  0x64   :  { %2568 = vmatmul.msk.f32.gmra.mxu1 %vm80_vm1, %v43_v24  ;;  %2598 = vmatmul.msk.f32.gmra.mxu3 %vm80_vm1, %v3078_v54  ;;  %v545_v54 = vmul.f32 %v3099_v20, %v3099_v20 }
  0x65   :  { %2584 = vmatmul.msk.f32.gmra.mxu2 %vm80_vm1, %v59_v14  ;;  %662 = vadd.xlane.f32.xlu1 %v661_v18  ;;  %v667_v22 = vsel %vm80_vm1, %v525_v46, 0.0  ;;  %v712_v46 = vsel %vm80_vm1, %v540_v15, 0.0 }
  0x66   :  { %659 = vadd.xlane.f32.xlu0 %v658_v16 }
  0x69   :  { %665 = vadd.xlane.f32.xlu2 %v664_v17 }
  0x6b   :  { %2553 = vmatmul.msk.f32.gmra.mxu0 %vm80_vm1, %v2826_v48  ;;  %v528_v48 = vmul.f32 %v57_v1, %v57_v1 }
  0x6c   :  { %2569 = vmatmul.msk.f32.gmra.mxu1 %vm80_vm1, %v2974_v43  ;;  %2599 = vmatmul.msk.f32.gmra.mxu3 %vm80_vm1, %v3099_v20 }
  0x6d   :  { %2585 = vmatmul.msk.f32.gmra.mxu2 %vm80_vm1, %v60_v21  ;;  %671 = vadd.xlane.f32.xlu1 %v670_v26  ;;  %v676_v31 = vsel %vm80_vm1, %v528_v48, 0.0 }
  0x6e   :  { %668 = vadd.xlane.f32.xlu0 %v667_v22 }
  0x71   :  { %674 = vadd.xlane.f32.xlu2 %v673_v23 }
  0x73   :  { %2554 = vmatmul.msk.f32.gmra.mxu0 %vm80_vm1, %v2821_v47  ;;  %v531_v47 = vmul.f32 %v60_v21, %v60_v21 }
  0x74   :  { %2570 = vmatmul.msk.f32.gmra.mxu1 %vm80_vm1, %v2999_v57  ;;  %2600 = vmatmul.msk.f32.gmra.mxu3 %vm80_vm1, %v3117_v38 }
  0x75   :  { %2586 = vmatmul.msk.f32.gmra.mxu2 %vm80_vm1, %v61_v29  ;;  %680 = vadd.xlane.f32.xlu1 %v679_v33  ;;  %v685_v50 = vsel %vm80_vm1, %v531_v47, 0.0  ;;  %v724_v29 = vsel %vm80_vm1, %v544_v10, 0.0 }
  0x76   :  { %677 = vadd.xlane.f32.xlu0 %v676_v31 }
  0x78   :  { %v3131_v45 = vpop.xlane.xlu1 %557 }
  0x79   :  { %683 = vadd.xlane.f32.xlu2 %v682_v32  ;;  %v3127_v43 = vpop.xlane.xlu0 %551  ;;  %v546_v32 = vmul.f32 %v3117_v38, %v3117_v38  ;;  %v547_v38 = vmul.f32 %v3141_v53, %v3141_v53 }
  0x7a   :  { %v746_v21 = vadd.f32 %v3214_v34, %v3127_v43  ;;  %v727_v43 = vsel %vm80_vm1, %v545_v54, 0.0 }
  0x7b   :  { %2555 = vmatmul.msk.f32.gmra.mxu0 %vm80_vm1, %v2857_v58  ;;  %v534_v58 = vmul.f32 %v2788_v37, %v2788_v37  ;;  %v697_v37 = vsel %vm80_vm1, %v535_v56, 0.0 }
  0x7c   :  { %v3129_v24 = vpop.xlane.xlu2 %563  ;;  %2571 = vmatmul.msk.f32.gmra.mxu1 %vm80_vm1, %v3006_v60  ;;  %2601 = vmatmul.msk.f32.gmra.mxu3 %vm80_vm1, %v3141_v53  ;;  %v549_v53 = vmul.f32 %v3190_v28, %v3190_v28 }
  0x7d   :  { %2587 = vmatmul.msk.f32.gmra.mxu2 %vm80_vm1, %v62_v39  ;;  %689 = vadd.xlane.f32.xlu1 %v688_v52  ;;  %v694_v1 = vsel %vm80_vm1, %v534_v58, 0.0  ;;  %v548_v58 = vmul.f32 %v3166_v59, %v3166_v59 }
  0x7e   :  { %686 = vadd.xlane.f32.xlu0 %v685_v50  ;;  %v730_v50 = vsel %vm80_vm1, %v546_v32, 0.0  ;;  %v739_v35 = vsel %vm80_vm1, %v549_v53, 0.0 }
  0x80   :  { %v294_v61 = vpop.f32.mrf.mxu0  ;;  %v3158_v63 = vpop.xlane.xlu1 %560 }
  0x81   :  { %692 = vadd.xlane.f32.xlu2 %v691_v51  ;;  %v555_v57 = vpop.xlane.xlu0 %554  ;;  %v3154_v60 = vpop.f32.mrf.mxu1  ;;  %v810_v22 = vmul.f32 2.0, %v294_v61  ;;  %v748_v61 = vadd.f32 %v3214_v34, %v3131_v45  ;;  %v749_v15 = vadd.f32 %v3214_v34, %v3158_v63 }
  0x82   :  { %v747_v33 = vadd.f32 %v3214_v34, %v555_v57 }
  0x83   :  { %v874_v19 = vsub.f32 %v746_v21, %v810_v22 }
  0x84   :  { %v3156_v62 = vpop.xlane.xlu2 %566  ;;  %2602 = vmatmul.msk.f32.gmra.mxu3 %vm80_vm1, %v3166_v59 }
  0x85   :  { %698 = vadd.xlane.f32.xlu1 %v697_v37  ;;  %v736_v37 = vsel %vm80_vm1, %v548_v58, 0.0 }
  0x86   :  { %695 = vadd.xlane.f32.xlu0 %v694_v1 }
  0x88   :  { %v297_v7 = vpop.f32.mrf.mxu0  ;;  %v3182_v11 = vpop.xlane.xlu1 %572 }
  0x89   :  { %701 = vadd.xlane.f32.xlu2 %v700_v4  ;;  %v3176_v36 = vpop.xlane.xlu0 %569  ;;  %v3178_v8 = vpop.f32.mrf.mxu1  ;;  %v811_v39 = vmul.f32 2.0, %v297_v7  ;;  %v733_v4 = vsel %vm80_vm1, %v547_v38, 0.0  ;;  %v753_v63 = vadd.f32 %v3214_v34, %v3182_v11 }
  0x8a   :  { %v3259_v5 = vpop.f32.mrf.mxu2 }
  0x8b   :  { %v875_v51 = vsub.f32 %v747_v33, %v811_v39 }
  0x8c   :  { %v3180_v9 = vpop.xlane.xlu2 %575  ;;  %2603 = vmatmul.msk.f32.gmra.mxu3 %vm80_vm1, %v3190_v28  ;;  %vm2512_vm1 = vcmask 1040384  }
  0x8d   :  { %707 = vadd.xlane.f32.xlu1 %v706_v2  ;;  %v750_v2 = vadd.f32 %v3214_v34, %v3129_v24  ;;  %v751_v24 = vadd.f32 %v3214_v34, %v3156_v62  ;;  %v754_v11 = vadd.f32 %v3214_v34, %v3180_v9 }
  0x8e   :  { %704 = vadd.xlane.f32.xlu0 %v703_v12 }
  0x90   :  { %v300_v42 = vpop.f32.mrf.mxu0  ;;  %v3206_v18 = vpop.xlane.xlu1 %581 }
  0x91   :  { %710 = vadd.xlane.f32.xlu2 %v709_v13  ;;  %v3202_v16 = vpop.xlane.xlu0 %578  ;;  %v3204_v17 = vpop.f32.mrf.mxu1  ;;  %v812_v55 = vmul.f32 2.0, %v300_v42 }
  0x92   :  { %v755_v58 = vadd.f32 %v3214_v34, %v3202_v16 }
  0x93   :  { %v876_v49 = vsub.f32 %v748_v61, %v812_v55 }
  0x94   :  { %v3200_v14 = vpop.xlane.xlu2 %584 }
  0x95   :  { %716 = vadd.xlane.f32.xlu1 %v715_v44 }
  0x96   :  { %713 = vadd.xlane.f32.xlu0 %v712_v46 }
  0x98   :  { %v303_v23 = vpop.f32.mrf.mxu0  ;;  %v3224_v48 = vpop.xlane.xlu1 %590 }
  0x99   :  { %719 = vadd.xlane.f32.xlu2 %v718_v0  ;;  %v3227_v25 = vpop.xlane.xlu0 %587  ;;  %v3230_v31 = vpop.f32.mrf.mxu1  ;;  %v813_v6 = vmul.f32 2.0, %v303_v23  ;;  %v752_v23 = vadd.f32 %v3214_v34, %v3176_v36 }
  0x9a   :  { %v3276_v0 = vpop.f32.mrf.mxu2 }
  0x9b   :  { %v877_v28 = vsub.f32 %v749_v15, %v813_v6  ;;  %v756_v6 = vadd.f32 %v3214_v34, %v3206_v18 }
  0x9c   :  { %v3222_v26 = vpop.xlane.xlu2 %593 }
  0x9d   :  { %725 = vadd.xlane.f32.xlu1 %v724_v29 }
  0x9e   :  { %722 = vadd.xlane.f32.xlu0 %v721_v27 }
  0xa0   :  { %v306_v47 = vpop.f32.mrf.mxu0  ;;  %v3239_v41 = vpop.xlane.xlu1 %599 }
  0xa1   :  { %938 = vmin.index.xlane.f32.xlu2 %v874_v19  ;;  %v3243_v52 = vpop.xlane.xlu0 %596  ;;  %v3245_v20 = vpop.f32.mrf.mxu1  ;;  %v814_v7 = vmul.f32 2.0, %v306_v47 }
  0xa2   :  { %v3296_v47 = vpop.f32.mrf.mxu2 }
  0xa3   :  { %v878_v42 = vsub.f32 %v750_v2, %v814_v7 }
  0xa4   :  { %v3237_v40 = vpop.xlane.xlu2 %602 }
  0xa5   :  { %940 = vmin.index.xlane.f32.xlu1 %v875_v51 }
  0xa6   :  { %728 = vadd.xlane.f32.xlu0 %v727_v43 }
  0xa8   :  { %v309_v56 = vpop.f32.mrf.mxu0  ;;  %v3255_v1 = vpop.xlane.xlu1 %608 }
  0xa9   :  { %731 = vadd.xlane.f32.xlu2 %v730_v50  ;;  %v3263_v59 = vpop.xlane.xlu0 %605  ;;  %v3265_v45 = vpop.f32.mrf.mxu1  ;;  %v815_v46 = vmul.f32 2.0, %v309_v56 }
  0xab   :  { %v879_v19 = vsub.f32 %v751_v24, %v815_v46  ;;  %v757_v46 = vadd.f32 %v3214_v34, %v3200_v14 }
  0xac   :  { %v3251_v57 = vpop.xlane.xlu2 %611 }
  0xad   :  { %942 = vmin.index.xlane.f32.xlu1 %v876_v49 }
  0xae   :  { %734 = vadd.xlane.f32.xlu0 %v733_v4  ;;  %v3310_v4 = vpop.f32.mrf.mxu2 }
  0xb0   :  { %v312_v12 = vpop.f32.mrf.mxu0  ;;  %v3273_v30 = vpop.xlane.xlu1 %617 }
  0xb1   :  { %737 = vadd.xlane.f32.xlu2 %v736_v37  ;;  %v816_v44 = vmul.f32 2.0, %v312_v12  ;;  %v3282_v10 = vpop.xlane.xlu0 %614  ;;  %v3288_v27 = vpop.f32.mrf.mxu1 }
  0xb3   :  { %v880_v32 = vsub.f32 %v752_v23, %v816_v44  ;;  %v758_v23 = vadd.f32 %v3214_v34, %v3227_v25 }
  0xb4   :  { %v3267_v13 = vpop.xlane.xlu2 %620 }
  0xb5   :  { %944 = vmin.index.xlane.f32.xlu1 %v877_v28 }
  0xb6   :  { %740 = vadd.xlane.f32.xlu0 %v739_v35  ;;  %v3322_v15 = vpop.f32.mrf.mxu2 }
  0xb8   :  { %v315_v3 = vpop.f32.mrf.mxu0  ;;  %v3290_v29 = vpop.xlane.xlu1 %626 }
  0xb9   :  { %946 = vmin.index.xlane.f32.xlu2 %v878_v42  ;;  %v817_v22 = vmul.f32 2.0, %v315_v3  ;;  %v3300_v43 = vpop.xlane.xlu0 %623  ;;  %v3302_v51 = vpop.f32.mrf.mxu1 }
  0xbb   :  { %v881_v54 = vsub.f32 %v753_v63, %v817_v22 }
  0xbc   :  { %v3284_v21 = vpop.xlane.xlu2 %629 }
  0xbd   :  { %950 = vmin.index.xlane.f32.xlu1 %v880_v32 }
  0xbe   :  { %948 = vmin.index.xlane.f32.xlu0 %v879_v19  ;;  %v3334_v63 = vpop.f32.mrf.mxu2 }
  0xc0   :  { %v318_v62 = vpop.f32.mrf.mxu0  ;;  %v3298_v36 = vpop.xlane.xlu1 %635 }
  0xc1   :  { %952 = vmin.index.xlane.f32.xlu2 %v881_v54  ;;  %v818_v39 = vmul.f32 2.0, %v318_v62  ;;  %v3312_v37 = vpop.xlane.xlu0 %632  ;;  %v3314_v49 = vpop.f32.mrf.mxu1 }
  0xc3   :  { %v882_v50 = vsub.f32 %v754_v11, %v818_v39 }
  0xc4   :  { %v3294_v33 = vpop.xlane.xlu2 %638 }
  0xc6   :  { %954 = vmin.index.xlane.f32.xlu0 %v882_v50  ;;  %v759_v50 = vadd.f32 %v3214_v34, %v3224_v48  ;;  %v762_v48 = vadd.f32 %v3214_v34, %v3239_v41  ;;  %v827_v41 = vmul.f32 2.0, %v3178_v8 }
  0xc8   :  { %v321_v38 = vpop.f32.mrf.mxu0  ;;  %v3308_v56 = vpop.xlane.xlu1 %644 }
  0xc9   :  { %v819_v9 = vmul.f32 2.0, %v321_v38  ;;  %v3324_v35 = vpop.xlane.xlu0 %641  ;;  %v3326_v28 = vpop.f32.mrf.mxu1 }
  0xcb   :  { %v883_v61 = vsub.f32 %v755_v58, %v819_v9  ;;  %v3350_v9 = vpop.f32.mrf.mxu2 }
  0xcc   :  { %v3306_v55 = vpop.xlane.xlu2 %647 }
  0xcd   :  { %956 = vmin.index.xlane.f32.xlu1 %v883_v61 }
  0xd0   :  { %v324_v53 = vpop.f32.mrf.mxu0  ;;  %v3320_v12 = vpop.xlane.xlu1 %653 }
  0xd1   :  { %v820_v16 = vmul.f32 2.0, %v324_v53  ;;  %v3338_v19 = vpop.xlane.xlu0 %650  ;;  %v3342_v62 = vpop.f32.mrf.mxu1 }
  0xd3   :  { %v884_v2 = vsub.f32 %v756_v6, %v820_v16  ;;  %v3358_v16 = vpop.f32.mrf.mxu3 }
  0xd4   :  { %v3318_v7 = vpop.xlane.xlu2 %656  ;;  %4132 = vst [vmem:[#allocation5_spill] sm:$0xff] %v3358_v16 }
  0xd5   :  { %958 = vmin.index.xlane.f32.xlu2 %v884_v2  ;;  %v826_v2 = vmul.f32 2.0, %v3154_v60 }
  0xd8   :  { %v327_v42 = vpop.f32.mrf.mxu0  ;;  %v3332_v3 = vpop.xlane.xlu1 %662 }
  0xd9   :  { %v821_v18 = vmul.f32 2.0, %v327_v42  ;;  %v3354_v61 = vpop.xlane.xlu0 %659  ;;  %v3356_v6 = vpop.f32.mrf.mxu1 }
  0xdb   :  { %v885_v24 = vsub.f32 %v757_v46, %v821_v18  ;;  %v760_v46 = vadd.f32 %v3214_v34, %v3222_v26  ;;  %v763_v26 = vadd.f32 %v3214_v34, %v3237_v40 }
  0xdc   :  { %v3330_v44 = vpop.xlane.xlu2 %665 }
  0xdd   :  { %960 = vmin.index.xlane.f32.xlu0 %v885_v24 }
  0xe0   :  { %v330_v22 = vpop.f32.mrf.mxu0  ;;  %v3344_v14 = vpop.xlane.xlu1 %671 }
  0xe1   :  { %v822_v32 = vmul.f32 2.0, %v330_v22  ;;  %v378_v60 = vpop.f32.mrf.mxu1 }
  0xe3   :  { %v886_v11 = vsub.f32 %v758_v23, %v822_v32  ;;  %v890_v23 = vsub.f32 %v762_v48, %v826_v2  ;;  %v761_v48 = vadd.f32 %v3214_v34, %v3243_v52  ;;  %v832_v52 = vmul.f32 2.0, %v3288_v27 }
  0xe4   :  { %v3340_v54 = vpop.xlane.xlu2 %674 }
  0xe5   :  { %962 = vmin.index.xlane.f32.xlu1 %v886_v11  ;;  %v3369_v11 = vpop.f32.mrf.mxu2 }
  0xe8   :  { %v333_v39 = vpop.f32.mrf.mxu0  ;;  %v3352_v25 = vpop.xlane.xlu1 %680 }
  0xe9   :  { %v823_v58 = vmul.f32 2.0, %v333_v39  ;;  %v3371_v39 = vpop.xlane.xlu0 %668 }
  0xeb   :  { %v887_v53 = vsub.f32 %v759_v50, %v823_v58  ;;  %v829_v50 = vmul.f32 2.0, %v3230_v31  ;;  %v765_v58 = vadd.f32 %v3214_v34, %v3255_v1  ;;  %v830_v1 = vmul.f32 2.0, %v3245_v20 }
  0xec   :  { %v3348_v38 = vpop.xlane.xlu2 %683 }
  0xed   :  { %964 = vmin.index.xlane.f32.xlu2 %v887_v53  ;;  %v3379_v53 = vpop.f32.mrf.mxu3  ;;  %v893_v8 = vsub.f32 %v765_v58, %v829_v50  ;;  %v3387_v40 = vpop.f32.mrf.mxu2  ;;  %v764_v50 = vadd.f32 %v3214_v34, %v3263_v59  ;;  %v767_v59 = vadd.f32 %v3214_v34, %v3282_v10 }
  0xf0   :  { %v336_v42 = vpop.f32.mrf.mxu0  ;;  %v3367_v22 = vpop.xlane.xlu1 %689 }
  0xf1   :  { %v824_v24 = vmul.f32 2.0, %v336_v42  ;;  %v3395_v16 = vpop.xlane.xlu0 %677 }
  0xf3   :  { %v888_v32 = vsub.f32 %v760_v46, %v824_v24 }
  0xf4   :  { %v3365_v18 = vpop.xlane.xlu2 %692 }
  0xf5   :  { %970 = vmin.index.xlane.f32.xlu2 %v890_v23  ;;  %966 = vmin.index.xlane.f32.xlu0 %v888_v32  ;;  %v891_v23 = vsub.f32 %v763_v26, %v827_v41  ;;  %v766_v32 = vadd.f32 %v3214_v34, %v3251_v57  ;;  %v828_v41 = vmul.f32 2.0, %v3204_v17  ;;  %v381_v26 = vpop.f32.mrf.mxu1  ;;  %v835_v17 = vmul.f32 2.0, %v3326_v28 }
  0xf7   :  { %v892_v27 = vsub.f32 %v764_v50, %v828_v41  ;;  %v838_v50 = vmul.f32 2.0, %v378_v60 }
  0xf8   :  { %v339_v2 = vpop.f32.mrf.mxu0  ;;  %v3385_v24 = vpop.xlane.xlu1 %698 }
  0xf9   :  { %v825_v46 = vmul.f32 2.0, %v339_v2  ;;  %v768_v2 = vadd.f32 %v3214_v34, %v3273_v30  ;;  %v833_v30 = vmul.f32 2.0, %v3302_v51 }
  0xfb   :  { %v889_v31 = vsub.f32 %v761_v48, %v825_v46  ;;  %v3402_v48 = vpop.f32.mrf.mxu3  ;;  %v896_v57 = vsub.f32 %v768_v2, %v832_v52  ;;  %v894_v46 = vsub.f32 %v766_v32, %v830_v1  ;;  %v771_v1 = vadd.f32 %v3214_v34, %v3290_v29  ;;  %v3417_v32 = vpop.xlane.xlu0 %686 }
  0xfc   :  { %v3383_v42 = vpop.xlane.xlu2 %701  ;;  %v770_v29 = vadd.f32 %v3214_v34, %v3300_v43 }
  0xfd   :  { %976 = vmin.index.xlane.f32.xlu2 %v893_v8  ;;  %972 = vmin.index.xlane.f32.xlu0 %v891_v23  ;;  %v831_v8 = vmul.f32 2.0, %v3265_v45  ;;  %v3411_v23 = vpop.f32.mrf.mxu2  ;;  %v3421_v51 = vpop.f32.mrf.mxu1  ;;  %v899_v45 = vsub.f32 %v771_v1, %v835_v17 }
  0xfe   :  { %968 = vmin.index.xlane.f32.xlu1 %v889_v31  ;;  %v769_v31 = vadd.f32 %v3214_v34, %v3267_v13  ;;  %v836_v13 = vmul.f32 2.0, %v3342_v62 }
  0xff   :  { %v895_v10 = vsub.f32 %v767_v59, %v831_v8 }
 0x100   :  { %v3404_v20 = vpop.xlane.xlu1 %707  ;;  %v897_v2 = vsub.f32 %v769_v31, %v833_v30 }
 0x103   :  { %v3425_v41 = vpop.f32.mrf.mxu3 }
 0x104   :  { %v3400_v58 = vpop.xlane.xlu2 %710  ;;  %4135 = vst [vmem:[#allocation8_spill] sm:$0xff] %v3425_v41 }
 0x105   :  { %982 = vmin.index.xlane.f32.xlu2 %v896_v57  ;;  %978 = vmin.index.xlane.f32.xlu0 %v894_v46  ;;  %v834_v57 = vmul.f32 2.0, %v3314_v49  ;;  %v772_v46 = vadd.f32 %v3214_v34, %v3284_v21  ;;  %v3435_v17 = vpop.f32.mrf.mxu2  ;;  %v387_v43 = vpop.f32.mrf.mxu1 }
 0x106   :  { %974 = vmin.index.xlane.f32.xlu1 %v892_v27  ;;  %v774_v27 = vadd.f32 %v3214_v34, %v3298_v36  ;;  %v841_v41 = vmul.f32 2.0, %v387_v43 }
 0x107   :  { %v898_v21 = vsub.f32 %v770_v29, %v834_v57  ;;  %v777_v29 = vadd.f32 %v3214_v34, %v3308_v56  ;;  %v773_v57 = vadd.f32 %v3214_v34, %v3312_v37  ;;  %v844_v56 = vmul.f32 2.0, %v3296_v47 }
 0x108   :  { %v3423_v28 = vpop.xlane.xlu1 %716  ;;  %v902_v1 = vsub.f32 %v774_v27, %v838_v50  ;;  %v775_v50 = vadd.f32 %v3214_v34, %v3294_v33  ;;  %v778_v37 = vadd.f32 %v3214_v34, %v3306_v55 }
 0x109   :  { %4134 = vst [vmem:[#allocation7_spill] sm:$0xff] %v3423_v28 }
 0x10b   :  { %v3441_v36 = vpop.f32.mrf.mxu3 }
 0x10c   :  { %v3419_v52 = vpop.xlane.xlu2 %719 }
 0x10d   :  { %4133 = vst [vmem:[#allocation6_spill] sm:$0xff] %v3419_v52  ;;  %988 = vmin.index.xlane.f32.xlu2 %v899_v45  ;;  %984 = vmin.index.xlane.f32.xlu0 %v897_v2  ;;  %v900_v45 = vsub.f32 %v772_v46, %v836_v13  ;;  %v3439_v2 = vpop.xlane.xlu0 %695  ;;  %v837_v13 = vmul.f32 2.0, %v3356_v6  ;;  %v905_v46 = vsub.f32 %v777_v29, %v841_v41  ;;  %v3450_v27 = vpop.f32.mrf.mxu2  ;;  %v842_v6 = vmul.f32 2.0, %v3259_v5 }
 0x10e   :  { %980 = vmin.index.xlane.f32.xlu1 %v895_v10  ;;  %v776_v5 = vadd.f32 %v3214_v34, %v3324_v35  ;;  %v845_v35 = vmul.f32 2.0, %v3310_v4  ;;  %v843_v29 = vmul.f32 2.0, %v3276_v0  ;;  %v850_v0 = vmul.f32 2.0, %v3387_v40 }
 0x10f   :  { %v906_v55 = vsub.f32 %v778_v37, %v842_v6  ;;  %v786_v6 = vadd.f32 %v3214_v34, %v3344_v14  ;;  %v846_v37 = vmul.f32 2.0, %v3322_v15 }
 0x110   :  { %v3437_v8 = vpop.xlane.xlu1 %725 }
 0x111   :  { %4136 = vst [vmem:[#allocation9_spill] sm:$0xff] %v3437_v8  ;;  %v839_v8 = vmul.f32 2.0, %v381_v26 }
 0x113   :  { %v903_v26 = vsub.f32 %v775_v50, %v839_v8  ;;  %v3460_v41 = vpop.f32.mrf.mxu3  ;;  %v840_v8 = vmul.f32 2.0, %v3421_v51  ;;  %v783_v50 = vadd.f32 %v3214_v34, %v3332_v3  ;;  %v848_v3 = vmul.f32 2.0, %v3350_v9 }
 0x114   :  { %v939_v30 = vpop.xlane.xlu2 %938 }
 0x115   :  { %v1066_v59 = vperm.slane %v939_v30, 0  ;;  %v1067_v31 = vperm.slane %v939_v30, 1  ;;  %v1068_v62 = vperm.slane %v939_v30, 2  ;;  %v1069_v60 = vperm.slane %v939_v30, 3  ;;  %994 = vmin.index.xlane.f32.xlu2 %v902_v1  ;;  %990 = vmin.index.xlane.f32.xlu0 %v900_v45  ;;  %v3453_v33 = vpop.xlane.xlu0 %704  ;;  %v3467_v51 = vpop.f32.mrf.mxu2 }
 0x116   :  { %v1070_v49 = vperm.slane %v939_v30, 4  ;;  %v1071_v10 = vperm.slane %v939_v30, 5  ;;  %v1072_v52 = vperm.slane %v939_v30, 6  ;;  %986 = vmin.index.xlane.f32.xlu1 %v898_v21  ;;  %v1073_v28 = vperm.slane %v939_v30, 7 }
 0x117   :  { %1578 = vst [vmem:[#allocation1] ss:$9 sm:$0xff] %v1066_v59  ;;  %v901_v59 = vsub.f32 %v773_v57, %v837_v13  ;;  %v781_v13 = vadd.f32 %v3214_v34, %v3318_v7  ;;  %v779_v57 = vadd.f32 %v3214_v34, %v3338_v19  ;;  %v784_v19 = vadd.f32 %v3214_v34, %v3330_v44 }
 0x118   :  { %1580 = vst [vmem:[#allocation1 + $0x1] ss:$9 sm:$0xff] %v1067_v31  ;;  %v941_v30 = vpop.xlane.xlu1 %940 }
 0x119   :  { %1582 = vst [vmem:[#allocation1 + $0x2] ss:$9 sm:$0xff] %v1068_v62  ;;  %v1075_v31 = vperm.slane %v941_v30, 1  ;;  %v1076_v62 = vperm.slane %v941_v30, 2  ;;  %v1077_v1 = vperm.slane %v941_v30, 3  ;;  %v1078_v47 = vperm.slane %v941_v30, 4 }
 0x11a   :  { %1584 = vst [vmem:[#allocation1 + $0x3] ss:$9 sm:$0xff] %v1069_v60  ;;  %v1079_v43 = vperm.slane %v941_v30, 5  ;;  %v1081_v21 = vperm.slane %v941_v30, 7  ;;  %v907_v7 = vsub.f32 %v779_v57, %v843_v29  ;;  %v912_v14 = vsub.f32 %v784_v19, %v848_v3 }
 0x11b   :  { %1586 = vst [vmem:[#allocation1 + $0x4] ss:$9 sm:$0xff] %v1070_v49  ;;  %v1080_v49 = vperm.slane %v941_v30, 6 }
 0x11c   :  { %1588 = vst [vmem:[#allocation1 + $0x5] ss:$9 sm:$0xff] %v1071_v10  ;;  %v847_v10 = vmul.f32 2.0, %v3334_v63 }
 0x11d   :  { %1590 = vst [vmem:[#allocation1 + $0x6] ss:$9 sm:$0xff] %v1072_v52  ;;  %1000 = vmin.index.xlane.f32.xlu2 %v905_v46  ;;  %996 = vmin.index.xlane.f32.xlu0 %v903_v26  ;;  %v780_v52 = vadd.f32 %v3214_v34, %v3320_v12  ;;  %v904_v12 = vsub.f32 %v776_v5, %v840_v8  ;;  %v3478_v46 = vpop.xlane.xlu0 %713  ;;  %v3480_v26 = vpop.f32.mrf.mxu3 }
 0x11e   :  { %1592 = vst [vmem:[#allocation1 + $0x7] ss:$9 sm:$0xff] %v1073_v28  ;;  %992 = vmin.index.xlane.f32.xlu1 %v901_v59  ;;  %v1074_v28 = vperm.slane %v941_v30, 0  ;;  %v911_v63 = vsub.f32 %v783_v50, %v847_v10  ;;  %v909_v30 = vsub.f32 %v781_v13, %v845_v35  ;;  %v914_v5 = vsub.f32 %v786_v6, %v850_v0 }
 0x11f   :  { %v908_v45 = vsub.f32 %v780_v52, %v844_v56  ;;  %v782_v52 = vadd.f32 %v3214_v34, %v3354_v61  ;;  %v785_v35 = vadd.f32 %v3214_v34, %v3371_v39  ;;  %v790_v39 = vadd.f32 %v3214_v34, %v3348_v38 }
 0x120   :  { %v943_v4 = vpop.xlane.xlu1 %942  ;;  %v792_v0 = vadd.f32 %v3214_v34, %v3367_v22  ;;  %v859_v22 = vmul.f32 2.0, %v3379_v53 }
 0x121   :  { %v1082_v59 = vperm.slane %v943_v4, 0  ;;  %v1083_v56 = vperm.slane %v943_v4, 1  ;;  %v1084_v8 = vperm.slane %v943_v4, 2  ;;  %v1086_v40 = vperm.slane %v943_v4, 4 }
 0x122   :  { %v1087_v44 = vperm.slane %v943_v4, 5  ;;  %v1088_v15 = vperm.slane %v943_v4, 6  ;;  %v1089_v61 = vperm.slane %v943_v4, 7 }
 0x125   :  { %v3465_v60 = vld [vmem:[#allocation1] sm:$0xff]  ;;  %1006 = vmin.index.xlane.f32.xlu2 %v908_v45  ;;  %1002 = vmin.index.xlane.f32.xlu0 %v906_v55  ;;  %v851_v45 = vmul.f32 2.0, %v3411_v23  ;;  %v853_v55 = vmul.f32 2.0, %v3450_v27 }
 0x126   :  { %1594 = vst [vmem:[#allocation1] ss:$9 sm:$0xff] %v1074_v28  ;;  %998 = vmin.index.xlane.f32.xlu1 %v904_v12  ;;  %v3491_v28 = vpop.f32.mrf.mxu2  ;;  %v789_v12 = vadd.f32 %v3214_v34, %v3352_v25 }
 0x127   :  { %1595 = vst [vmem:[#allocation1 + $0x1] ss:$9 sm:$0xff] %v1075_v31  ;;  %v1085_v31 = vperm.slane %v943_v4, 3 }
 0x128   :  { %1596 = vst [vmem:[#allocation1 + $0x2] ss:$9 sm:$0xff] %v1076_v62  ;;  %v3495_v62 = vpop.xlane.xlu0 %722  ;;  %v945_v23 = vpop.xlane.xlu1 %944  ;;  %v917_v13 = vsub.f32 %v789_v12, %v853_v55 }
 0x129   :  { %1597 = vst [vmem:[#allocation1 + $0x3] ss:$9 sm:$0xff] %v1077_v1  ;;  %v3497_v1 = vpop.f32.mrf.mxu3  ;;  %v1090_v29 = vperm.slane %v945_v23, 0  ;;  %v1091_v57 = vperm.slane %v945_v23, 1  ;;  %v1094_v6 = vperm.slane %v945_v23, 4  ;;  %v1096_v38 = vperm.slane %v945_v23, 6 }
 0x12a   :  { %1598 = vst [vmem:[#allocation1 + $0x4] ss:$9 sm:$0xff] %v1078_v47  ;;  %v910_v47 = vsub.f32 %v782_v52, %v846_v37  ;;  %v1097_v52 = vperm.slane %v945_v23, 7 }
 0x12b   :  { %1599 = vst [vmem:[#allocation1 + $0x5] ss:$9 sm:$0xff] %v1079_v43  ;;  %v787_v43 = vadd.f32 %v3214_v34, %v3340_v54 }
 0x12c   :  { %1600 = vst [vmem:[#allocation1 + $0x6] ss:$9 sm:$0xff] %v1080_v49  ;;  %v3505_v49 = vpop.xlane.xlu2 %731 }
 0x12d   :  { %1601 = vst [vmem:[#allocation1 + $0x7] ss:$9 sm:$0xff] %v1081_v21  ;;  %1012 = vmin.index.xlane.f32.xlu2 %v911_v63  ;;  %1008 = vmin.index.xlane.f32.xlu0 %v909_v30  ;;  %v849_v21 = vmul.f32 2.0, %v3369_v11  ;;  %v915_v27 = vsub.f32 %v787_v43, %v851_v45  ;;  %v854_v11 = vmul.f32 2.0, %v3467_v51  ;;  %v1092_v63 = vperm.slane %v945_v23, 2 }
 0x12e   :  { %1004 = vmin.index.xlane.f32.xlu1 %v907_v7  ;;  %v432_v10 = vpop.f32.mrf.mxu2  ;;  %v852_v30 = vmul.f32 2.0, %v3435_v17  ;;  %v788_v7 = vadd.f32 %v3214_v34, %v3395_v16  ;;  %v1095_v51 = vperm.slane %v945_v23, 5  ;;  %v798_v43 = vadd.f32 %v3214_v34, %v3404_v20 }
 0x12f   :  { %v913_v54 = vsub.f32 %v785_v35, %v849_v21  ;;  %v856_v4 = vmul.f32 2.0, %v432_v10  ;;  %v918_v37 = vsub.f32 %v790_v39, %v854_v11  ;;  %v4137_v21 = vld [vmem:[#allocation5_spill] sm:$0xff]  ;;  %v794_v10 = vadd.f32 %v3214_v34, %v3439_v2 }
 0x130   :  { %v3510_v50 = vpop.xlane.xlu0 %728  ;;  %v916_v16 = vsub.f32 %v788_v7, %v852_v30  ;;  %v858_v35 = vmul.f32 2.0, %v4137_v21  ;;  %v863_v2 = vmul.f32 2.0, %v3460_v41  ;;  %v865_v39 = vmul.f32 2.0, %v3497_v1  ;;  %v4139_v7 = vld [vmem:[#allocation8_spill] sm:$0xff] }
 0x131   :  { %v3512_v25 = vpop.f32.mrf.mxu3 }
 0x132   :  { %v866_v1 = vmul.f32 2.0, %v3512_v25 }
 0x134   :  { %v3493_v9 = vld [vmem:[#allocation1] sm:$0xff]  ;;  %v3524_v19 = vpop.xlane.xlu2 %737 }
 0x135   :  { %1603 = vst [vmem:[#allocation1] ss:$9 sm:$0xff] %v1082_v59  ;;  %1018 = vmin.index.xlane.f32.xlu2 %v914_v5  ;;  %1014 = vmin.index.xlane.f32.xlu0 %v912_v14  ;;  %v1093_v59 = vperm.slane %v945_v23, 3  ;;  %v791_v5 = vadd.f32 %v3214_v34, %v3417_v32  ;;  %v796_v32 = vadd.f32 %v3214_v34, %v3383_v42 }
 0x136   :  { %1604 = vst [vmem:[#allocation1 + $0x1] ss:$9 sm:$0xff] %v1083_v56  ;;  %1010 = vmin.index.xlane.f32.xlu1 %v910_v47  ;;  %v920_v56 = vsub.f32 %v792_v0, %v856_v4  ;;  %v435_v17 = vpop.f32.mrf.mxu2  ;;  %v799_v4 = vadd.f32 %v3214_v34, %v3400_v58  ;;  %v797_v0 = vadd.f32 %v3214_v34, %v3453_v33 }
 0x137   :  { %1605 = vst [vmem:[#allocation1 + $0x2] ss:$9 sm:$0xff] %v1084_v8 }
 0x138   :  { %1606 = vst [vmem:[#allocation1 + $0x3] ss:$9 sm:$0xff] %v1085_v31  ;;  %v3526_v8 = vpop.xlane.xlu0 %734  ;;  %v795_v31 = vadd.f32 %v3214_v34, %v3385_v24  ;;  %v860_v24 = vmul.f32 2.0, %v3402_v48 }
 0x139   :  { %1607 = vst [vmem:[#allocation1 + $0x4] ss:$9 sm:$0xff] %v1086_v40  ;;  %v857_v40 = vmul.f32 2.0, %v435_v17  ;;  %v3534_v14 = vpop.f32.mrf.mxu3 }
 0x13a   :  { %1608 = vst [vmem:[#allocation1 + $0x5] ss:$9 sm:$0xff] %v1087_v44  ;;  %v855_v44 = vmul.f32 2.0, %v3491_v28  ;;  %v862_v28 = vmul.f32 2.0, %v3441_v36 }
 0x13b   :  { %1609 = vst [vmem:[#allocation1 + $0x6] ss:$9 sm:$0xff] %v1088_v15  ;;  %v793_v15 = vadd.f32 %v3214_v34, %v3365_v18 }
 0x13c   :  { %1610 = vst [vmem:[#allocation1 + $0x7] ss:$9 sm:$0xff] %v1089_v61  ;;  %v947_v47 = vpop.xlane.xlu2 %946  ;;  %v923_v61 = vsub.f32 %v795_v31, %v859_v22  ;;  %v919_v53 = vsub.f32 %v791_v5, %v855_v44  ;;  %v926_v20 = vsub.f32 %v798_v43, %v862_v28  ;;  %v4141_v31 = vld [vmem:[#allocation9_spill] sm:$0xff]  ;;  %v864_v44 = vmul.f32 2.0, %v3480_v26 }
 0x13d   :  { %1024 = vmin.index.xlane.f32.xlu2 %v917_v13  ;;  %1020 = vmin.index.xlane.f32.xlu0 %v915_v27  ;;  %v921_v45 = vsub.f32 %v793_v15, %v857_v40  ;;  %v1098_v55 = vperm.slane %v947_v47, 0  ;;  %v1099_v18 = vperm.slane %v947_v47, 1  ;;  %v1100_v48 = vperm.slane %v947_v47, 2 }
 0x13e   :  { %1016 = vmin.index.xlane.f32.xlu1 %v913_v54  ;;  %v1101_v13 = vperm.slane %v947_v47, 3  ;;  %v1102_v27 = vperm.slane %v947_v47, 4  ;;  %v1103_v42 = vperm.slane %v947_v47, 5  ;;  %v924_v54 = vsub.f32 %v796_v32, %v860_v24 }
 0x13f   :  { %v1105_v11 = vperm.slane %v947_v47, 7  ;;  %v804_v33 = vadd.f32 %v3214_v34, %v4141_v31  ;;  %v800_v5 = vadd.f32 %v3214_v34, %v3478_v46  ;;  %v867_v46 = vmul.f32 2.0, %v3534_v14 }
 0x140   :  { %v3549_v23 = vpop.xlane.xlu0 %740  ;;  %v803_v28 = vadd.f32 %v3214_v34, %v3495_v62  ;;  %v805_v43 = vadd.f32 %v3214_v34, %v3510_v50  ;;  %v807_v50 = vadd.f32 %v3214_v34, %v3526_v8  ;;  %v806_v8 = vadd.f32 %v3214_v34, %v3505_v49 }
 0x141   :  { %v468_v36 = vpop.f32.mrf.mxu3 }
 0x143   :  { %v3520_v3 = vld [vmem:[#allocation1] sm:$0xff] }
 0x144   :  { %1612 = vst [vmem:[#allocation1] ss:$9 sm:$0xff] %v1090_v29  ;;  %v1104_v29 = vperm.slane %v947_v47, 6 }
 0x145   :  { %1613 = vst [vmem:[#allocation1 + $0x1] ss:$9 sm:$0xff] %v1091_v57  ;;  %1030 = vmin.index.xlane.f32.xlu2 %v920_v56  ;;  %1026 = vmin.index.xlane.f32.xlu0 %v918_v37  ;;  %v922_v57 = vsub.f32 %v794_v10, %v858_v35  ;;  %v931_v35 = vsub.f32 %v803_v28, %v867_v46 }
 0x146   :  { %1614 = vst [vmem:[#allocation1 + $0x2] ss:$9 sm:$0xff] %v1092_v63  ;;  %1022 = vmin.index.xlane.f32.xlu1 %v916_v16  ;;  %v4138_v63 = vld [vmem:[#allocation7_spill] sm:$0xff]  ;;  %v4140_v16 = vld [vmem:[#allocation6_spill] sm:$0xff] }
 0x147   :  { %1615 = vst [vmem:[#allocation1 + $0x3] ss:$9 sm:$0xff] %v1093_v59  ;;  %v801_v30 = vadd.f32 %v3214_v34, %v4138_v63  ;;  %v861_v59 = vmul.f32 2.0, %v4139_v7  ;;  %v802_v22 = vadd.f32 %v3214_v34, %v4140_v16 }
 0x148   :  { %1616 = vst [vmem:[#allocation1 + $0x4] ss:$9 sm:$0xff] %v1094_v6  ;;  %v949_v6 = vpop.xlane.xlu0 %948 }
 0x149   :  { %1617 = vst [vmem:[#allocation1 + $0x5] ss:$9 sm:$0xff] %v1095_v51  ;;  %v929_v51 = vsub.f32 %v801_v30, %v865_v39  ;;  %v471_v56 = vpop.f32.mrf.mxu3  ;;  %v925_v37 = vsub.f32 %v797_v0, %v861_v59  ;;  %v1106_v41 = vperm.slane %v949_v6, 0  ;;  %v1107_v17 = vperm.slane %v949_v6, 1 }
 0x14a   :  { %1618 = vst [vmem:[#allocation1 + $0x6] ss:$9 sm:$0xff] %v1096_v38  ;;  %v927_v38 = vsub.f32 %v799_v4, %v863_v2  ;;  %v1108_v40 = vperm.slane %v949_v6, 2  ;;  %v1109_v15 = vperm.slane %v949_v6, 3  ;;  %v1110_v25 = vperm.slane %v949_v6, 4 }
 0x14b   :  { %1619 = vst [vmem:[#allocation1 + $0x7] ss:$9 sm:$0xff] %v1097_v52  ;;  %v868_v52 = vmul.f32 2.0, %v468_v36  ;;  %v1111_v47 = vperm.slane %v949_v6, 5  ;;  %v1113_v24 = vperm.slane %v949_v6, 7  ;;  %v869_v32 = vmul.f32 2.0, %v471_v56 }
 0x14d   :  { %1036 = vmin.index.xlane.f32.xlu2 %v923_v61  ;;  %1032 = vmin.index.xlane.f32.xlu0 %v921_v45  ;;  %v1112_v61 = vperm.slane %v949_v6, 6  ;;  %v932_v45 = vsub.f32 %v804_v33, %v868_v52 }
 0x14e   :  { %1028 = vmin.index.xlane.f32.xlu1 %v919_v53  ;;  %v930_v53 = vsub.f32 %v802_v22, %v866_v1 }
 0x151   :  { %v474_v26 = vpop.f32.mrf.mxu3 }
 0x152   :  { %v3544_v12 = vld [vmem:[#allocation1] sm:$0xff]  ;;  %v870_v30 = vmul.f32 2.0, %v474_v26 }
 0x153   :  { %1621 = vst [vmem:[#allocation1] ss:$9 sm:$0xff] %v1098_v55  ;;  %v928_v55 = vsub.f32 %v800_v5, %v864_v44 }
 0x154   :  { %1622 = vst [vmem:[#allocation1 + $0x1] ss:$9 sm:$0xff] %v1099_v18  ;;  %v951_v18 = vpop.xlane.xlu1 %950 }
 0x155   :  { %1623 = vst [vmem:[#allocation1 + $0x2] ss:$9 sm:$0xff] %v1100_v48  ;;  %1042 = vmin.index.xlane.f32.xlu2 %v926_v20  ;;  %1038 = vmin.index.xlane.f32.xlu0 %v924_v54  ;;  %v1114_v21 = vperm.slane %v951_v18, 0  ;;  %v1115_v48 = vperm.slane %v951_v18, 1  ;;  %v1116_v36 = vperm.slane %v951_v18, 2  ;;  %v1119_v20 = vperm.slane %v951_v18, 5 }
 0x156   :  { %1624 = vst [vmem:[#allocation1 + $0x3] ss:$9 sm:$0xff] %v1101_v13  ;;  %1034 = vmin.index.xlane.f32.xlu1 %v922_v57  ;;  %v933_v13 = vsub.f32 %v805_v43, %v869_v32  ;;  %v1120_v54 = vperm.slane %v951_v18, 6 }
 0x157   :  { %1625 = vst [vmem:[#allocation1 + $0x4] ss:$9 sm:$0xff] %v1102_v27  ;;  %v1117_v27 = vperm.slane %v951_v18, 3 }
 0x158   :  { %1626 = vst [vmem:[#allocation1 + $0x5] ss:$9 sm:$0xff] %v1103_v42  ;;  %v1118_v42 = vperm.slane %v951_v18, 4 }
 0x159   :  { %1627 = vst [vmem:[#allocation1 + $0x6] ss:$9 sm:$0xff] %v1104_v29  ;;  %v477_v14 = vpop.f32.mrf.mxu3  ;;  %v1121_v29 = vperm.slane %v951_v18, 7 }
 0x15a   :  { %1628 = vst [vmem:[#allocation1 + $0x7] ss:$9 sm:$0xff] %v1105_v11  ;;  %v871_v62 = vmul.f32 2.0, %v477_v14  ;;  %v953_v11 = vpop.xlane.xlu2 %952 }
 0x15b   :  { %v1122_v2 = vperm.slane %v953_v11, 0  ;;  %v1123_v4 = vperm.slane %v953_v11, 1  ;;  %v1124_v63 = vperm.slane %v953_v11, 2  ;;  %v1125_v7 = vperm.slane %v953_v11, 3 }
 0x15c   :  { %v935_v57 = vsub.f32 %v807_v50, %v871_v62  ;;  %v1126_v59 = vperm.slane %v953_v11, 4  ;;  %v1127_v0 = vperm.slane %v953_v11, 5  ;;  %v1128_v6 = vperm.slane %v953_v11, 6 }
 0x15d   :  { %1048 = vmin.index.xlane.f32.xlu2 %v929_v51  ;;  %1044 = vmin.index.xlane.f32.xlu0 %v927_v38  ;;  %v1129_v51 = vperm.slane %v953_v11, 7  ;;  %v934_v38 = vsub.f32 %v806_v8, %v870_v30 }
 0x15e   :  { %1040 = vmin.index.xlane.f32.xlu1 %v925_v37  ;;  %v2613_v37 = vld [vmem:[%s4130_s2] ss:$0 sm:$0xff]  ;;  %s2641_s2 = smov [#allocation2]  }
 0x15f   :  { %v808_v34 = vadd.f32 %v2613_v37, %v3524_v19  ;;  %v957_v19 = vpop.xlane.xlu1 %956  ;;  %v809_v28 = vadd.f32 %v2613_v37, %v3549_v23  ;;  %s2528_s5 = sshll.u32 %s2641_s2, 4  ;;  %s2529_s5 = int_to_ptr.vmem [resolvable:$true] %s2528_s5 }
 0x160   :  { %v1145_v46 = vperm.slane %v957_v19, 7 }
 0x161   :  { %v3561_v58 = vld [vmem:[#allocation1] sm:$0xff]  ;;  %v480_v56 = vpop.f32.mrf.mxu3 }
 0x162   :  { %1630 = vst [vmem:[#allocation1] ss:$9 sm:$0xff] %v1106_v41  ;;  %v872_v49 = vmul.f32 2.0, %v480_v56  ;;  %v955_v41 = vpop.xlane.xlu0 %954  ;;  %v959_v43 = vpop.xlane.xlu2 %958 }
 0x163   :  { %1631 = vst [vmem:[#allocation1 + $0x1] ss:$9 sm:$0xff] %v1107_v17  ;;  %v1130_v1 = vperm.slane %v955_v41, 0  ;;  %v1131_v16 = vperm.slane %v955_v41, 1  ;;  %v1132_v22 = vperm.slane %v955_v41, 2  ;;  %v1133_v31 = vperm.slane %v955_v41, 3 }
 0x164   :  { %1632 = vst [vmem:[#allocation1 + $0x2] ss:$9 sm:$0xff] %v1108_v40  ;;  %v936_v17 = vsub.f32 %v808_v34, %v872_v49  ;;  %v1134_v33 = vperm.slane %v955_v41, 4  ;;  %v1135_v40 = vperm.slane %v955_v41, 5  ;;  %v1136_v44 = vperm.slane %v955_v41, 6 }
 0x165   :  { %1633 = vst [vmem:[#allocation1 + $0x3] ss:$9 sm:$0xff] %v1109_v15  ;;  %1054 = vmin.index.xlane.f32.xlu2 %v932_v45  ;;  %1050 = vmin.index.xlane.f32.xlu0 %v930_v53  ;;  %v1137_v5 = vperm.slane %v955_v41, 7  ;;  %v1138_v15 = vperm.slane %v957_v19, 0  ;;  %v1141_v45 = vperm.slane %v957_v19, 3  ;;  %v1142_v53 = vperm.slane %v957_v19, 4 }
 0x166   :  { %1634 = vst [vmem:[#allocation1 + $0x4] ss:$9 sm:$0xff] %v1110_v25  ;;  %1046 = vmin.index.xlane.f32.xlu1 %v928_v55  ;;  %v1144_v55 = vperm.slane %v957_v19, 6  ;;  %v1151_v14 = vperm.slane %v959_v43, 5  ;;  %v1153_v62 = vperm.slane %v959_v43, 7 }
 0x167   :  { %1635 = vst [vmem:[#allocation1 + $0x5] ss:$9 sm:$0xff] %v1111_v47  ;;  %v1139_v47 = vperm.slane %v957_v19, 1  ;;  %v963_v30 = vpop.xlane.xlu1 %962 }
 0x168   :  { %1636 = vst [vmem:[#allocation1 + $0x6] ss:$9 sm:$0xff] %v1112_v61  ;;  %v1140_v61 = vperm.slane %v957_v19, 2  ;;  %v1162_v8 = vperm.slane %v963_v30, 0  ;;  %v1168_v56 = vperm.slane %v963_v30, 6  ;;  %v1169_v37 = vperm.slane %v963_v30, 7 }
 0x169   :  { %1637 = vst [vmem:[#allocation1 + $0x7] ss:$9 sm:$0xff] %v1113_v24  ;;  %v1143_v24 = vperm.slane %v957_v19, 5  ;;  %v483_v26 = vpop.f32.mrf.mxu3 }
 0x16a   :  { %v873_v32 = vmul.f32 2.0, %v483_v26  ;;  %v961_v23 = vpop.xlane.xlu0 %960  ;;  %v965_v34 = vpop.xlane.xlu2 %964 }
 0x16b   :  { %v1154_v50 = vperm.slane %v961_v23, 0  ;;  %v1158_v11 = vperm.slane %v961_v23, 4  ;;  %v1170_v49 = vperm.slane %v965_v34, 0 }
 0x16c   :  { %v937_v18 = vsub.f32 %v809_v28, %v873_v32 }
 0x16d   :  { %1056 = vmin.index.xlane.f32.xlu0 %v933_v13  ;;  %1060 = vmin.index.xlane.f32.xlu2 %v935_v57  ;;  %v1148_v13 = vperm.slane %v959_v43, 2  ;;  %v1157_v57 = vperm.slane %v961_v23, 3 }
 0x16e   :  { %1052 = vmin.index.xlane.f32.xlu1 %v931_v35 }
 0x170   :  { %v3575_v10 = vld [vmem:[#allocation1] sm:$0xff] }
 0x171   :  { %1639 = vst [vmem:[#allocation1] ss:$9 sm:$0xff] %v1114_v21  ;;  %v1146_v21 = vperm.slane %v959_v43, 0  ;;  %v969_v26 = vpop.xlane.xlu1 %968 }
 0x172   :  { %1640 = vst [vmem:[#allocation1 + $0x1] ss:$9 sm:$0xff] %v1115_v48  ;;  %v1147_v48 = vperm.slane %v959_v43, 1  ;;  %v1187_v32 = vperm.slane %v969_v26, 1 }
 0x173   :  { %1641 = vst [vmem:[#allocation1 + $0x2] ss:$9 sm:$0xff] %v1116_v36  ;;  %v1149_v36 = vperm.slane %v959_v43, 3 }
 0x174   :  { %1642 = vst [vmem:[#allocation1 + $0x3] ss:$9 sm:$0xff] %v1117_v27  ;;  %v1150_v27 = vperm.slane %v959_v43, 4 }
 0x175   :  { %1643 = vst [vmem:[#allocation1 + $0x4] ss:$9 sm:$0xff] %v1118_v42  ;;  %1062 = vmin.index.xlane.f32.xlu0 %v936_v17  ;;  %v1152_v42 = vperm.slane %v959_v43, 6  ;;  %v1172_v17 = vperm.slane %v965_v34, 2  ;;  %v1188_v43 = vperm.slane %v969_v26, 2 }
 0x176   :  { %1644 = vst [vmem:[#allocation1 + $0x5] ss:$9 sm:$0xff] %v1119_v20  ;;  %1058 = vmin.index.xlane.f32.xlu1 %v934_v38  ;;  %v1167_v38 = vperm.slane %v963_v30, 5 }
 0x177   :  { %1645 = vst [vmem:[#allocation1 + $0x6] ss:$9 sm:$0xff] %v1120_v54  ;;  %v1155_v54 = vperm.slane %v961_v23, 1 }
 0x178   :  { %1646 = vst [vmem:[#allocation1 + $0x7] ss:$9 sm:$0xff] %v1121_v29  ;;  %v1156_v29 = vperm.slane %v961_v23, 2 }
 0x17e   :  { %1064 = vmin.index.xlane.f32.xlu1 %v937_v18  ;;  %v1189_v18 = vperm.slane %v969_v26, 3 }
 0x17f   :  { %v3579_v39 = vld [vmem:[#allocation1] sm:$0xff] }
 0x180   :  { %1648 = vst [vmem:[#allocation1] ss:$9 sm:$0xff] %v1122_v2  ;;  %v1159_v2 = vperm.slane %v961_v23, 5 }
 0x181   :  { %1649 = vst [vmem:[#allocation1 + $0x1] ss:$9 sm:$0xff] %v1123_v4  ;;  %v1160_v4 = vperm.slane %v961_v23, 6 }
 0x182   :  { %1650 = vst [vmem:[#allocation1 + $0x2] ss:$9 sm:$0xff] %v1124_v63  ;;  %v1161_v63 = vperm.slane %v961_v23, 7 }
 0x183   :  { %1651 = vst [vmem:[#allocation1 + $0x3] ss:$9 sm:$0xff] %v1125_v7 }
 0x184   :  { %1652 = vst [vmem:[#allocation1 + $0x4] ss:$9 sm:$0xff] %v1126_v59  ;;  %v1163_v59 = vperm.slane %v963_v30, 1 }
 0x185   :  { %1653 = vst [vmem:[#allocation1 + $0x5] ss:$9 sm:$0xff] %v1127_v0  ;;  %v1164_v0 = vperm.slane %v963_v30, 2 }
 0x186   :  { %1654 = vst [vmem:[#allocation1 + $0x6] ss:$9 sm:$0xff] %v1128_v6  ;;  %v1165_v6 = vperm.slane %v963_v30, 3 }
 0x187   :  { %1655 = vst [vmem:[#allocation1 + $0x7] ss:$9 sm:$0xff] %v1129_v51  ;;  %v1166_v51 = vperm.slane %v963_v30, 4 }
 0x18e   :  { %v3587_v52 = vld [vmem:[#allocation1] sm:$0xff] }
 0x18f   :  { %1657 = vst [vmem:[#allocation1] ss:$9 sm:$0xff] %v1130_v1  ;;  %v1171_v1 = vperm.slane %v965_v34, 1 }
 0x190   :  { %1658 = vst [vmem:[#allocation1 + $0x1] ss:$9 sm:$0xff] %v1131_v16  ;;  %v1173_v16 = vperm.slane %v965_v34, 3 }
 0x191   :  { %1659 = vst [vmem:[#allocation1 + $0x2] ss:$9 sm:$0xff] %v1132_v22  ;;  %v1174_v22 = vperm.slane %v965_v34, 4 }
 0x192   :  { %1660 = vst [vmem:[#allocation1 + $0x3] ss:$9 sm:$0xff] %v1133_v31  ;;  %v1175_v31 = vperm.slane %v965_v34, 5 }
 0x193   :  { %1661 = vst [vmem:[#allocation1 + $0x4] ss:$9 sm:$0xff] %v1134_v33  ;;  %v1176_v33 = vperm.slane %v965_v34, 6 }
 0x194   :  { %1662 = vst [vmem:[#allocation1 + $0x5] ss:$9 sm:$0xff] %v1135_v40  ;;  %v1177_v40 = vperm.slane %v965_v34, 7 }
 0x195   :  { %1663 = vst [vmem:[#allocation1 + $0x6] ss:$9 sm:$0xff] %v1136_v44  ;;  %v967_v44 = vpop.xlane.xlu0 %966 }
 0x196   :  { %1664 = vst [vmem:[#allocation1 + $0x7] ss:$9 sm:$0xff] %v1137_v5  ;;  %v1178_v5 = vperm.slane %v967_v44, 0 }
 0x19d   :  { %v3589_v25 = vld [vmem:[#allocation1] sm:$0xff] }
 0x19e   :  { %1666 = vst [vmem:[#allocation1] ss:$9 sm:$0xff] %v1138_v15  ;;  %v1179_v15 = vperm.slane %v967_v44, 1 }
 0x19f   :  { %1667 = vst [vmem:[#allocation1 + $0x1] ss:$9 sm:$0xff] %v1139_v47  ;;  %v1180_v47 = vperm.slane %v967_v44, 2 }
 0x1a0   :  { %1668 = vst [vmem:[#allocation1 + $0x2] ss:$9 sm:$0xff] %v1140_v61  ;;  %v1181_v61 = vperm.slane %v967_v44, 3 }
 0x1a1   :  { %1669 = vst [vmem:[#allocation1 + $0x3] ss:$9 sm:$0xff] %v1141_v45  ;;  %v1182_v45 = vperm.slane %v967_v44, 4 }
 0x1a2   :  { %1670 = vst [vmem:[#allocation1 + $0x4] ss:$9 sm:$0xff] %v1142_v53  ;;  %v1183_v53 = vperm.slane %v967_v44, 5 }
 0x1a3   :  { %1671 = vst [vmem:[#allocation1 + $0x5] ss:$9 sm:$0xff] %v1143_v24  ;;  %v1184_v24 = vperm.slane %v967_v44, 6 }
 0x1a4   :  { %1672 = vst [vmem:[#allocation1 + $0x6] ss:$9 sm:$0xff] %v1144_v55  ;;  %v1185_v55 = vperm.slane %v967_v44, 7 }
 0x1a5   :  { %1673 = vst [vmem:[#allocation1 + $0x7] ss:$9 sm:$0xff] %v1145_v46  ;;  %v1186_v46 = vperm.slane %v969_v26, 0 }
 0x1ac   :  { %v3592_v35 = vld [vmem:[#allocation1] sm:$0xff] }
 0x1ad   :  { %1675 = vst [vmem:[#allocation1] ss:$9 sm:$0xff] %v1146_v21  ;;  %v1190_v21 = vperm.slane %v969_v26, 4 }
 0x1ae   :  { %1676 = vst [vmem:[#allocation1 + $0x1] ss:$9 sm:$0xff] %v1147_v48  ;;  %v1191_v48 = vperm.slane %v969_v26, 5 }
 0x1af   :  { %1677 = vst [vmem:[#allocation1 + $0x2] ss:$9 sm:$0xff] %v1148_v13  ;;  %v1192_v13 = vperm.slane %v969_v26, 6 }
 0x1b0   :  { %1678 = vst [vmem:[#allocation1 + $0x3] ss:$9 sm:$0xff] %v1149_v36  ;;  %v1193_v36 = vperm.slane %v969_v26, 7 }
 0x1b1   :  { %1679 = vst [vmem:[#allocation1 + $0x4] ss:$9 sm:$0xff] %v1150_v27  ;;  %v971_v27 = vpop.xlane.xlu2 %970 }
 0x1b2   :  { %1680 = vst [vmem:[#allocation1 + $0x5] ss:$9 sm:$0xff] %v1151_v14  ;;  %v1194_v14 = vperm.slane %v971_v27, 0  ;;  %v1196_v23 = vperm.slane %v971_v27, 2 }
 0x1b3   :  { %1681 = vst [vmem:[#allocation1 + $0x6] ss:$9 sm:$0xff] %v1152_v42  ;;  %v1195_v42 = vperm.slane %v971_v27, 1 }
 0x1b4   :  { %1682 = vst [vmem:[#allocation1 + $0x7] ss:$9 sm:$0xff] %v1153_v62 }
 0x1bb   :  { %v3594_v20 = vld [vmem:[#allocation1] sm:$0xff] }
 0x1bc   :  { %1684 = vst [vmem:[#allocation1] ss:$9 sm:$0xff] %v1154_v50  ;;  %v1197_v50 = vperm.slane %v971_v27, 3 }
 0x1bd   :  { %1685 = vst [vmem:[#allocation1 + $0x1] ss:$9 sm:$0xff] %v1155_v54  ;;  %v1198_v54 = vperm.slane %v971_v27, 4 }
 0x1be   :  { %1686 = vst [vmem:[#allocation1 + $0x2] ss:$9 sm:$0xff] %v1156_v29  ;;  %v1199_v29 = vperm.slane %v971_v27, 5 }
 0x1bf   :  { %1687 = vst [vmem:[#allocation1 + $0x3] ss:$9 sm:$0xff] %v1157_v57  ;;  %v1200_v57 = vperm.slane %v971_v27, 6 }
 0x1c0   :  { %1688 = vst [vmem:[#allocation1 + $0x4] ss:$9 sm:$0xff] %v1158_v11  ;;  %v1201_v11 = vperm.slane %v971_v27, 7 }
 0x1c1   :  { %1689 = vst [vmem:[#allocation1 + $0x5] ss:$9 sm:$0xff] %v1159_v2  ;;  %v2640_v2 = vmov 0  }
 0x1c2   :  { %1690 = vst [vmem:[#allocation1 + $0x6] ss:$9 sm:$0xff] %v1160_v4  ;;  %2609 = vset.pattern.permute.xlu2 %v2640_v2  ;;  %2610 = vset.pattern.permute.xlu0 %v2640_v2  ;;  %v973_v4 = vpop.xlane.xlu0 %972 }
 0x1c3   :  { %1691 = vst [vmem:[#allocation1 + $0x7] ss:$9 sm:$0xff] %v1161_v63  ;;  %2162 = vperm.xlu2 %2609, %v3465_v60   ;;  %2165 = vperm.xlu0 %2610, %v3493_v9   ;;  %v1202_v63 = vperm.slane %v973_v4, 0  ;;  %v1203_v30 = vperm.slane %v973_v4, 1  ;;  %v1208_v60 = vperm.slane %v973_v4, 6  ;;  %v1209_v9 = vperm.slane %v973_v4, 7 }
 0x1c4   :  { %2611 = vset.pattern.permute.xlu1 %v2640_v2 }
 0x1c5   :  { %2168 = vperm.xlu1 %2611, %v3520_v3   ;;  %v975_v3 = vpop.xlane.xlu1 %974 }
 0x1c6   :  { %v1214_v34 = vperm.slane %v975_v3, 4 }
 0x1ca   :  { %v3596_v7 = vld [vmem:[#allocation1] sm:$0xff] }
 0x1cb   :  { %1693 = vst [vmem:[#allocation1] ss:$9 sm:$0xff] %v1162_v8  ;;  %2171 = vperm.xlu2 %2609, %v3544_v12   ;;  %2186 = vperm.xlu0 %2610, %v3589_v25   ;;  %v1211_v12 = vperm.slane %v975_v3, 1  ;;  %v1213_v25 = vperm.slane %v975_v3, 3 }
 0x1cc   :  { %1694 = vst [vmem:[#allocation1 + $0x1] ss:$9 sm:$0xff] %v1163_v59  ;;  %v1204_v59 = vperm.slane %v973_v4, 2 }
 0x1cd   :  { %1695 = vst [vmem:[#allocation1 + $0x2] ss:$9 sm:$0xff] %v1164_v0  ;;  %v1205_v0 = vperm.slane %v973_v4, 3  ;;  %2177 = vperm.xlu1 %2611, %v3575_v10   ;;  %v1216_v10 = vperm.slane %v975_v3, 6 }
 0x1ce   :  { %1696 = vst [vmem:[#allocation1 + $0x3] ss:$9 sm:$0xff] %v1165_v6  ;;  %v1206_v6 = vperm.slane %v973_v4, 4 }
 0x1cf   :  { %1697 = vst [vmem:[#allocation1 + $0x4] ss:$9 sm:$0xff] %v1166_v51  ;;  %v1207_v51 = vperm.slane %v973_v4, 5 }
 0x1d0   :  { %1698 = vst [vmem:[#allocation1 + $0x5] ss:$9 sm:$0xff] %v1167_v38  ;;  %v1210_v38 = vperm.slane %v975_v3, 0 }
 0x1d1   :  { %1699 = vst [vmem:[#allocation1 + $0x6] ss:$9 sm:$0xff] %v1168_v56 }
 0x1d2   :  { %1700 = vst [vmem:[#allocation1 + $0x7] ss:$9 sm:$0xff] %v1169_v37  ;;  %v1212_v37 = vperm.slane %v975_v3, 2 }
 0x1d3   :  { %2174 = vperm.xlu2 %2609, %v3561_v58   ;;  %2195 = vperm.xlu0 %2610, %v3596_v7   ;;  %v1217_v58 = vperm.slane %v975_v3, 7 }
 0x1d5   :  { %2183 = vperm.xlu1 %2611, %v3587_v52   ;;  %v977_v52 = vpop.xlane.xlu2 %976 }
 0x1d6   :  { %v1218_v7 = vperm.slane %v977_v52, 0 }
 0x1d9   :  { %v3598_v41 = vld [vmem:[#allocation1] sm:$0xff] }
 0x1da   :  { %1702 = vst [vmem:[#allocation1] ss:$9 sm:$0xff] %v1170_v49  ;;  %v1215_v49 = vperm.slane %v975_v3, 5 }
 0x1db   :  { %1703 = vst [vmem:[#allocation1 + $0x1] ss:$9 sm:$0xff] %v1171_v1  ;;  %2180 = vperm.xlu2 %2609, %v3579_v39   ;;  %v1219_v1 = vperm.slane %v977_v52, 1  ;;  %v1221_v39 = vperm.slane %v977_v52, 3 }
 0x1dc   :  { %1704 = vst [vmem:[#allocation1 + $0x2] ss:$9 sm:$0xff] %v1172_v17 }
 0x1dd   :  { %1705 = vst [vmem:[#allocation1 + $0x3] ss:$9 sm:$0xff] %v1173_v16  ;;  %2192 = vperm.xlu1 %2611, %v3594_v20   ;;  %v1220_v16 = vperm.slane %v977_v52, 2  ;;  %v1225_v20 = vperm.slane %v977_v52, 7 }
 0x1de   :  { %1706 = vst [vmem:[#allocation1 + $0x4] ss:$9 sm:$0xff] %v1174_v22  ;;  %v1222_v22 = vperm.slane %v977_v52, 4 }
 0x1df   :  { %1707 = vst [vmem:[#allocation1 + $0x5] ss:$9 sm:$0xff] %v1175_v31  ;;  %v1223_v31 = vperm.slane %v977_v52, 5 }
 0x1e0   :  { %1708 = vst [vmem:[#allocation1 + $0x6] ss:$9 sm:$0xff] %v1176_v33  ;;  %v1224_v33 = vperm.slane %v977_v52, 6 }
 0x1e1   :  { %1709 = vst [vmem:[#allocation1 + $0x7] ss:$9 sm:$0xff] %v1177_v40 }
 0x1e3   :  { %2189 = vperm.xlu2 %2609, %v3592_v35   ;;  %v979_v35 = vpop.xlane.xlu0 %978 }
 0x1e4   :  { %v1226_v40 = vperm.slane %v979_v35, 0  ;;  %v1227_v44 = vperm.slane %v979_v35, 1 }
 0x1e8   :  { %v3600_v19 = vld [vmem:[#allocation1] sm:$0xff] }
 0x1e9   :  { %1711 = vst [vmem:[#allocation1] ss:$9 sm:$0xff] %v1178_v5  ;;  %2201 = vperm.xlu1 %2611, %v3600_v19   ;;  %v1228_v19 = vperm.slane %v979_v35, 2 }
 0x1ea   :  { %1712 = vst [vmem:[#allocation1 + $0x1] ss:$9 sm:$0xff] %v1179_v15  ;;  %v1229_v15 = vperm.slane %v979_v35, 3 }
 0x1eb   :  { %1713 = vst [vmem:[#allocation1 + $0x2] ss:$9 sm:$0xff] %v1180_v47  ;;  %2198 = vperm.xlu2 %2609, %v3598_v41   ;;  %v1230_v47 = vperm.slane %v979_v35, 4  ;;  %v1232_v41 = vperm.slane %v979_v35, 6 }
 0x1ec   :  { %1714 = vst [vmem:[#allocation1 + $0x3] ss:$9 sm:$0xff] %v1181_v61  ;;  %v1231_v61 = vperm.slane %v979_v35, 5 }
 0x1ed   :  { %1715 = vst [vmem:[#allocation1 + $0x4] ss:$9 sm:$0xff] %v1182_v45  ;;  %v1233_v45 = vperm.slane %v979_v35, 7 }
 0x1ee   :  { %1716 = vst [vmem:[#allocation1 + $0x5] ss:$9 sm:$0xff] %v1183_v53  ;;  %v981_v53 = vpop.xlane.xlu1 %980 }
 0x1ef   :  { %1717 = vst [vmem:[#allocation1 + $0x6] ss:$9 sm:$0xff] %v1184_v24  ;;  %v1234_v24 = vperm.slane %v981_v53, 0  ;;  %v1235_v26 = vperm.slane %v981_v53, 1 }
 0x1f0   :  { %1718 = vst [vmem:[#allocation1 + $0x7] ss:$9 sm:$0xff] %v1185_v55 }
 0x1f7   :  { %v3602_v28 = vld [vmem:[#allocation1] sm:$0xff] }
 0x1f8   :  { %1720 = vst [vmem:[#allocation1] ss:$9 sm:$0xff] %v1186_v46  ;;  %2204 = vperm.xlu0 %2610, %v3602_v28   ;;  %v1236_v46 = vperm.slane %v981_v53, 2  ;;  %v1237_v28 = vperm.slane %v981_v53, 3 }
 0x1f9   :  { %1721 = vst [vmem:[#allocation1 + $0x1] ss:$9 sm:$0xff] %v1187_v32  ;;  %v1238_v32 = vperm.slane %v981_v53, 4 }
 0x1fa   :  { %1722 = vst [vmem:[#allocation1 + $0x2] ss:$9 sm:$0xff] %v1188_v43  ;;  %v1239_v43 = vperm.slane %v981_v53, 5 }
 0x1fb   :  { %1723 = vst [vmem:[#allocation1 + $0x3] ss:$9 sm:$0xff] %v1189_v18  ;;  %v1240_v18 = vperm.slane %v981_v53, 6 }
 0x1fc   :  { %1724 = vst [vmem:[#allocation1 + $0x4] ss:$9 sm:$0xff] %v1190_v21  ;;  %v1241_v21 = vperm.slane %v981_v53, 7 }
 0x1fd   :  { %1725 = vst [vmem:[#allocation1 + $0x5] ss:$9 sm:$0xff] %v1191_v48  ;;  %v983_v48 = vpop.xlane.xlu2 %982 }
 0x1fe   :  { %1726 = vst [vmem:[#allocation1 + $0x6] ss:$9 sm:$0xff] %v1192_v13  ;;  %v1242_v13 = vperm.slane %v983_v48, 0 }
 0x1ff   :  { %1727 = vst [vmem:[#allocation1 + $0x7] ss:$9 sm:$0xff] %v1193_v36  ;;  %v1243_v36 = vperm.slane %v983_v48, 1 }
 0x206   :  { %v3604_v62 = vld [vmem:[#allocation1] sm:$0xff] }
 0x207   :  { %1729 = vst [vmem:[#allocation1] ss:$9 sm:$0xff] %v1194_v14  ;;  %2207 = vperm.xlu2 %2609, %v3604_v62   ;;  %v1244_v14 = vperm.slane %v983_v48, 2  ;;  %v1246_v62 = vperm.slane %v983_v48, 4 }
 0x208   :  { %1730 = vst [vmem:[#allocation1 + $0x1] ss:$9 sm:$0xff] %v1195_v42  ;;  %v1245_v42 = vperm.slane %v983_v48, 3 }
 0x209   :  { %1731 = vst [vmem:[#allocation1 + $0x2] ss:$9 sm:$0xff] %v1196_v23  ;;  %v1247_v23 = vperm.slane %v983_v48, 5 }
 0x20a   :  { %1732 = vst [vmem:[#allocation1 + $0x3] ss:$9 sm:$0xff] %v1197_v50  ;;  %v1248_v50 = vperm.slane %v983_v48, 6 }
 0x20b   :  { %1733 = vst [vmem:[#allocation1 + $0x4] ss:$9 sm:$0xff] %v1198_v54  ;;  %v1249_v54 = vperm.slane %v983_v48, 7 }
 0x20c   :  { %1734 = vst [vmem:[#allocation1 + $0x5] ss:$9 sm:$0xff] %v1199_v29  ;;  %v985_v29 = vpop.xlane.xlu0 %984 }
 0x20d   :  { %1735 = vst [vmem:[#allocation1 + $0x6] ss:$9 sm:$0xff] %v1200_v57  ;;  %v1250_v57 = vperm.slane %v985_v29, 0  ;;  %v1252_v4 = vperm.slane %v985_v29, 2 }
 0x20e   :  { %1736 = vst [vmem:[#allocation1 + $0x7] ss:$9 sm:$0xff] %v1201_v11  ;;  %v1251_v11 = vperm.slane %v985_v29, 1 }
 0x215   :  { %v3609_v8 = vld [vmem:[#allocation1] sm:$0xff] }
 0x216   :  { %1738 = vst [vmem:[#allocation1] ss:$9 sm:$0xff] %v1202_v63  ;;  %2210 = vperm.xlu1 %2611, %v3609_v8   ;;  %v1253_v63 = vperm.slane %v985_v29, 3  ;;  %v1255_v8 = vperm.slane %v985_v29, 5 }
 0x217   :  { %1739 = vst [vmem:[#allocation1 + $0x1] ss:$9 sm:$0xff] %v1203_v30  ;;  %v1254_v30 = vperm.slane %v985_v29, 4 }
 0x218   :  { %1740 = vst [vmem:[#allocation1 + $0x2] ss:$9 sm:$0xff] %v1204_v59  ;;  %v1256_v59 = vperm.slane %v985_v29, 6 }
 0x219   :  { %1741 = vst [vmem:[#allocation1 + $0x3] ss:$9 sm:$0xff] %v1205_v0  ;;  %v1257_v0 = vperm.slane %v985_v29, 7 }
 0x21a   :  { %1742 = vst [vmem:[#allocation1 + $0x4] ss:$9 sm:$0xff] %v1206_v6  ;;  %v987_v6 = vpop.xlane.xlu1 %986 }
 0x21b   :  { %1743 = vst [vmem:[#allocation1 + $0x5] ss:$9 sm:$0xff] %v1207_v51  ;;  %v1258_v51 = vperm.slane %v987_v6, 0  ;;  %v1260_v3 = vperm.slane %v987_v6, 2 }
 0x21c   :  { %1744 = vst [vmem:[#allocation1 + $0x6] ss:$9 sm:$0xff] %v1208_v60 }
 0x21d   :  { %1745 = vst [vmem:[#allocation1 + $0x7] ss:$9 sm:$0xff] %v1209_v9  ;;  %v1259_v9 = vperm.slane %v987_v6, 1 }
 0x224   :  { %v1746_v56 = vld [vmem:[#allocation1] sm:$0xff] }
 0x225   :  { %1747 = vst [vmem:[#allocation1] ss:$9 sm:$0xff] %v1210_v38  ;;  %2213 = vperm.xlu0 %2610, %v1746_v56   ;;  %v1261_v38 = vperm.slane %v987_v6, 3  ;;  %v1262_v56 = vperm.slane %v987_v6, 4 }
 0x226   :  { %1748 = vst [vmem:[#allocation1 + $0x1] ss:$9 sm:$0xff] %v1211_v12  ;;  %v1263_v12 = vperm.slane %v987_v6, 5 }
 0x227   :  { %1749 = vst [vmem:[#allocation1 + $0x2] ss:$9 sm:$0xff] %v1212_v37  ;;  %v1264_v37 = vperm.slane %v987_v6, 6 }
 0x228   :  { %1750 = vst [vmem:[#allocation1 + $0x3] ss:$9 sm:$0xff] %v1213_v25  ;;  %v1265_v25 = vperm.slane %v987_v6, 7 }
 0x229   :  { %1751 = vst [vmem:[#allocation1 + $0x4] ss:$9 sm:$0xff] %v1214_v34  ;;  %v989_v34 = vpop.xlane.xlu2 %988 }
 0x22a   :  { %1752 = vst [vmem:[#allocation1 + $0x5] ss:$9 sm:$0xff] %v1215_v49  ;;  %v1266_v49 = vperm.slane %v989_v34, 0  ;;  %v1268_v52 = vperm.slane %v989_v34, 2 }
 0x22b   :  { %1753 = vst [vmem:[#allocation1 + $0x6] ss:$9 sm:$0xff] %v1216_v10  ;;  %v1267_v10 = vperm.slane %v989_v34, 1 }
 0x22c   :  { %1754 = vst [vmem:[#allocation1 + $0x7] ss:$9 sm:$0xff] %v1217_v58 }
 0x233   :  { %v1755_v17 = vld [vmem:[#allocation1] sm:$0xff] }
 0x234   :  { %1756 = vst [vmem:[#allocation1] ss:$9 sm:$0xff] %v1218_v7  ;;  %2216 = vperm.xlu2 %2609, %v1755_v17   ;;  %v1269_v7 = vperm.slane %v989_v34, 3  ;;  %v1271_v17 = vperm.slane %v989_v34, 5 }
 0x235   :  { %1757 = vst [vmem:[#allocation1 + $0x1] ss:$9 sm:$0xff] %v1219_v1  ;;  %v1270_v1 = vperm.slane %v989_v34, 4 }
 0x236   :  { %1758 = vst [vmem:[#allocation1 + $0x2] ss:$9 sm:$0xff] %v1220_v16  ;;  %v1272_v16 = vperm.slane %v989_v34, 6 }
 0x237   :  { %1759 = vst [vmem:[#allocation1 + $0x3] ss:$9 sm:$0xff] %v1221_v39  ;;  %v1273_v39 = vperm.slane %v989_v34, 7 }
 0x238   :  { %1760 = vst [vmem:[#allocation1 + $0x4] ss:$9 sm:$0xff] %v1222_v22  ;;  %v991_v22 = vpop.xlane.xlu0 %990 }
 0x239   :  { %1761 = vst [vmem:[#allocation1 + $0x5] ss:$9 sm:$0xff] %v1223_v31  ;;  %v1274_v31 = vperm.slane %v991_v22, 0  ;;  %v1276_v35 = vperm.slane %v991_v22, 2 }
 0x23a   :  { %1762 = vst [vmem:[#allocation1 + $0x6] ss:$9 sm:$0xff] %v1224_v33  ;;  %v1275_v33 = vperm.slane %v991_v22, 1 }
 0x23b   :  { %1763 = vst [vmem:[#allocation1 + $0x7] ss:$9 sm:$0xff] %v1225_v20 }
 0x242   :  { %v1764_v5 = vld [vmem:[#allocation1] sm:$0xff] }
 0x243   :  { %1765 = vst [vmem:[#allocation1] ss:$9 sm:$0xff] %v1226_v40  ;;  %2219 = vperm.xlu1 %2611, %v1764_v5   ;;  %v1277_v40 = vperm.slane %v991_v22, 3  ;;  %v1279_v5 = vperm.slane %v991_v22, 5 }
 0x244   :  { %1766 = vst [vmem:[#allocation1 + $0x1] ss:$9 sm:$0xff] %v1227_v44  ;;  %v1278_v44 = vperm.slane %v991_v22, 4 }
 0x245   :  { %1767 = vst [vmem:[#allocation1 + $0x2] ss:$9 sm:$0xff] %v1228_v19  ;;  %v1280_v19 = vperm.slane %v991_v22, 6 }
 0x246   :  { %1768 = vst [vmem:[#allocation1 + $0x3] ss:$9 sm:$0xff] %v1229_v15  ;;  %v1281_v15 = vperm.slane %v991_v22, 7 }
 0x247   :  { %1769 = vst [vmem:[#allocation1 + $0x4] ss:$9 sm:$0xff] %v1230_v47  ;;  %v993_v47 = vpop.xlane.xlu1 %992 }
 0x248   :  { %1770 = vst [vmem:[#allocation1 + $0x5] ss:$9 sm:$0xff] %v1231_v61  ;;  %v1282_v61 = vperm.slane %v993_v47, 0  ;;  %v1284_v53 = vperm.slane %v993_v47, 2 }
 0x249   :  { %1771 = vst [vmem:[#allocation1 + $0x6] ss:$9 sm:$0xff] %v1232_v41 }
 0x24a   :  { %1772 = vst [vmem:[#allocation1 + $0x7] ss:$9 sm:$0xff] %v1233_v45  ;;  %v1283_v45 = vperm.slane %v993_v47, 1 }
 0x251   :  { %v1773_v55 = vld [vmem:[#allocation1] sm:$0xff] }
 0x252   :  { %1774 = vst [vmem:[#allocation1] ss:$9 sm:$0xff] %v1234_v24  ;;  %2222 = vperm.xlu0 %2610, %v1773_v55   ;;  %v1285_v24 = vperm.slane %v993_v47, 3  ;;  %v1286_v55 = vperm.slane %v993_v47, 4 }
 0x253   :  { %1775 = vst [vmem:[#allocation1 + $0x1] ss:$9 sm:$0xff] %v1235_v26  ;;  %v1287_v26 = vperm.slane %v993_v47, 5 }
 0x254   :  { %1776 = vst [vmem:[#allocation1 + $0x2] ss:$9 sm:$0xff] %v1236_v46  ;;  %v1288_v46 = vperm.slane %v993_v47, 6 }
 0x255   :  { %1777 = vst [vmem:[#allocation1 + $0x3] ss:$9 sm:$0xff] %v1237_v28  ;;  %v1289_v28 = vperm.slane %v993_v47, 7 }
 0x256   :  { %1778 = vst [vmem:[#allocation1 + $0x4] ss:$9 sm:$0xff] %v1238_v32  ;;  %v995_v32 = vpop.xlane.xlu2 %994 }
 0x257   :  { %1779 = vst [vmem:[#allocation1 + $0x5] ss:$9 sm:$0xff] %v1239_v43  ;;  %v1290_v43 = vperm.slane %v995_v32, 0  ;;  %v1292_v48 = vperm.slane %v995_v32, 2 }
 0x258   :  { %1780 = vst [vmem:[#allocation1 + $0x6] ss:$9 sm:$0xff] %v1240_v18  ;;  %v1291_v18 = vperm.slane %v995_v32, 1 }
 0x259   :  { %1781 = vst [vmem:[#allocation1 + $0x7] ss:$9 sm:$0xff] %v1241_v21 }
 0x260   :  { %v1782_v27 = vld [vmem:[#allocation1] sm:$0xff] }
 0x261   :  { %1783 = vst [vmem:[#allocation1] ss:$9 sm:$0xff] %v1242_v13  ;;  %2225 = vperm.xlu2 %2609, %v1782_v27   ;;  %v1293_v13 = vperm.slane %v995_v32, 3  ;;  %v1295_v27 = vperm.slane %v995_v32, 5 }
 0x262   :  { %1784 = vst [vmem:[#allocation1 + $0x1] ss:$9 sm:$0xff] %v1243_v36  ;;  %v1294_v36 = vperm.slane %v995_v32, 4 }
 0x263   :  { %1785 = vst [vmem:[#allocation1 + $0x2] ss:$9 sm:$0xff] %v1244_v14  ;;  %v1296_v14 = vperm.slane %v995_v32, 6 }
 0x264   :  { %1786 = vst [vmem:[#allocation1 + $0x3] ss:$9 sm:$0xff] %v1245_v42  ;;  %v1297_v42 = vperm.slane %v995_v32, 7 }
 0x265   :  { %1787 = vst [vmem:[#allocation1 + $0x4] ss:$9 sm:$0xff] %v1246_v62  ;;  %v997_v62 = vpop.xlane.xlu0 %996 }
 0x266   :  { %1788 = vst [vmem:[#allocation1 + $0x5] ss:$9 sm:$0xff] %v1247_v23  ;;  %v1298_v23 = vperm.slane %v997_v62, 0  ;;  %v1300_v29 = vperm.slane %v997_v62, 2 }
 0x267   :  { %1789 = vst [vmem:[#allocation1 + $0x6] ss:$9 sm:$0xff] %v1248_v50  ;;  %v1299_v50 = vperm.slane %v997_v62, 1 }
 0x268   :  { %1790 = vst [vmem:[#allocation1 + $0x7] ss:$9 sm:$0xff] %v1249_v54 }
 0x26f   :  { %v1791_v2 = vld [vmem:[#allocation1] sm:$0xff] }
 0x270   :  { %1792 = vst [vmem:[#allocation1] ss:$9 sm:$0xff] %v1250_v57  ;;  %2228 = vperm.xlu1 %2611, %v1791_v2   ;;  %v1301_v57 = vperm.slane %v997_v62, 3  ;;  %v1303_v2 = vperm.slane %v997_v62, 5 }
 0x271   :  { %1793 = vst [vmem:[#allocation1 + $0x1] ss:$9 sm:$0xff] %v1251_v11  ;;  %v1302_v11 = vperm.slane %v997_v62, 4 }
 0x272   :  { %1794 = vst [vmem:[#allocation1 + $0x2] ss:$9 sm:$0xff] %v1252_v4  ;;  %v1304_v4 = vperm.slane %v997_v62, 6 }
 0x273   :  { %1795 = vst [vmem:[#allocation1 + $0x3] ss:$9 sm:$0xff] %v1253_v63  ;;  %v1305_v63 = vperm.slane %v997_v62, 7 }
 0x274   :  { %1796 = vst [vmem:[#allocation1 + $0x4] ss:$9 sm:$0xff] %v1254_v30  ;;  %v999_v30 = vpop.xlane.xlu1 %998 }
 0x275   :  { %1797 = vst [vmem:[#allocation1 + $0x5] ss:$9 sm:$0xff] %v1255_v8  ;;  %v1001_v8 = vpop.xlane.xlu2 %1000  ;;  %v1307_v6 = vperm.slane %v999_v30, 1 }
 0x276   :  { %1798 = vst [vmem:[#allocation1 + $0x6] ss:$9 sm:$0xff] %v1256_v59  ;;  %v1306_v59 = vperm.slane %v999_v30, 0  ;;  %v1315_v34 = vperm.slane %v1001_v8, 1 }
 0x277   :  { %1799 = vst [vmem:[#allocation1 + $0x7] ss:$9 sm:$0xff] %v1257_v0 }
 0x27c   :  { %v1005_v22 = vpop.xlane.xlu1 %1004 }
 0x27e   :  { %v1800_v60 = vld [vmem:[#allocation1] sm:$0xff] }
 0x27f   :  { %1801 = vst [vmem:[#allocation1] ss:$9 sm:$0xff] %v1258_v51  ;;  %2231 = vperm.xlu0 %2610, %v1800_v60   ;;  %v1308_v51 = vperm.slane %v999_v30, 2  ;;  %v1309_v60 = vperm.slane %v999_v30, 3 }
 0x280   :  { %1802 = vst [vmem:[#allocation1 + $0x1] ss:$9 sm:$0xff] %v1259_v9  ;;  %v1310_v9 = vperm.slane %v999_v30, 4 }
 0x281   :  { %1803 = vst [vmem:[#allocation1 + $0x2] ss:$9 sm:$0xff] %v1260_v3  ;;  %v1311_v3 = vperm.slane %v999_v30, 5 }
 0x282   :  { %1804 = vst [vmem:[#allocation1 + $0x3] ss:$9 sm:$0xff] %v1261_v38  ;;  %v1312_v38 = vperm.slane %v999_v30, 6 }
 0x283   :  { %1805 = vst [vmem:[#allocation1 + $0x4] ss:$9 sm:$0xff] %v1262_v56  ;;  %v1313_v56 = vperm.slane %v999_v30, 7 }
 0x284   :  { %1806 = vst [vmem:[#allocation1 + $0x5] ss:$9 sm:$0xff] %v1263_v12  ;;  %v3625_v12 = vpop.xlane.xlu2 %1006 }
 0x285   :  { %1807 = vst [vmem:[#allocation1 + $0x6] ss:$9 sm:$0xff] %v1264_v37  ;;  %v1314_v37 = vperm.slane %v1001_v8, 0  ;;  %v1339_v62 = vperm.slane %v3625_v12, 1 }
 0x286   :  { %1808 = vst [vmem:[#allocation1 + $0x7] ss:$9 sm:$0xff] %v1265_v25  ;;  %v1003_v25 = vpop.xlane.xlu0 %1002 }
 0x287   :  { %v1328_v47 = vperm.slane %v1003_v25, 6 }
 0x28d   :  { %v1809_v58 = vld [vmem:[#allocation1] sm:$0xff] }
 0x28e   :  { %1810 = vst [vmem:[#allocation1] ss:$9 sm:$0xff] %v1266_v49  ;;  %2234 = vperm.xlu2 %2609, %v1809_v58   ;;  %v1317_v58 = vperm.slane %v1001_v8, 3 }
 0x28f   :  { %1811 = vst [vmem:[#allocation1 + $0x1] ss:$9 sm:$0xff] %v1267_v10  ;;  %v1316_v10 = vperm.slane %v1001_v8, 2 }
 0x290   :  { %1812 = vst [vmem:[#allocation1 + $0x2] ss:$9 sm:$0xff] %v1268_v52  ;;  %v3627_v52 = vpop.xlane.xlu2 %1012 }
 0x291   :  { %1813 = vst [vmem:[#allocation1 + $0x3] ss:$9 sm:$0xff] %v1269_v7  ;;  %v1318_v7 = vperm.slane %v1001_v8, 4 }
 0x292   :  { %1814 = vst [vmem:[#allocation1 + $0x4] ss:$9 sm:$0xff] %v1270_v1  ;;  %v1319_v1 = vperm.slane %v1001_v8, 5 }
 0x293   :  { %1815 = vst [vmem:[#allocation1 + $0x5] ss:$9 sm:$0xff] %v1271_v17  ;;  %v1320_v17 = vperm.slane %v1001_v8, 6 }
 0x294   :  { %1816 = vst [vmem:[#allocation1 + $0x6] ss:$9 sm:$0xff] %v1272_v16  ;;  %v1321_v16 = vperm.slane %v1001_v8, 7 }
 0x295   :  { %1817 = vst [vmem:[#allocation1 + $0x7] ss:$9 sm:$0xff] %v1273_v39  ;;  %v3629_v39 = vpop.xlane.xlu0 %1008 }
 0x296   :  { %v1346_v8 = vperm.slane %v3629_v39, 0 }
 0x29c   :  { %v1818_v20 = vld [vmem:[#allocation1] sm:$0xff] }
 0x29d   :  { %1819 = vst [vmem:[#allocation1] ss:$9 sm:$0xff] %v1274_v31  ;;  %2237 = vperm.xlu1 %2611, %v1818_v20   ;;  %v3631_v31 = vpop.xlane.xlu2 %1018  ;;  %v1323_v20 = vperm.slane %v1003_v25, 1 }
 0x29e   :  { %1820 = vst [vmem:[#allocation1 + $0x1] ss:$9 sm:$0xff] %v1275_v33  ;;  %v1322_v33 = vperm.slane %v1003_v25, 0 }
 0x29f   :  { %1821 = vst [vmem:[#allocation1 + $0x2] ss:$9 sm:$0xff] %v1276_v35 }
 0x2a0   :  { %1822 = vst [vmem:[#allocation1 + $0x3] ss:$9 sm:$0xff] %v1277_v40  ;;  %v1324_v40 = vperm.slane %v1003_v25, 2 }
 0x2a1   :  { %1823 = vst [vmem:[#allocation1 + $0x4] ss:$9 sm:$0xff] %v1278_v44  ;;  %v1325_v44 = vperm.slane %v1003_v25, 3 }
 0x2a2   :  { %1824 = vst [vmem:[#allocation1 + $0x5] ss:$9 sm:$0xff] %v1279_v5  ;;  %v1326_v5 = vperm.slane %v1003_v25, 4 }
 0x2a3   :  { %1825 = vst [vmem:[#allocation1 + $0x6] ss:$9 sm:$0xff] %v1280_v19  ;;  %v1327_v19 = vperm.slane %v1003_v25, 5 }
 0x2a4   :  { %1826 = vst [vmem:[#allocation1 + $0x7] ss:$9 sm:$0xff] %v1281_v15  ;;  %v3633_v15 = vpop.xlane.xlu0 %1014 }
 0x2ab   :  { %v1827_v41 = vld [vmem:[#allocation1] sm:$0xff] }
 0x2ac   :  { %1828 = vst [vmem:[#allocation1] ss:$9 sm:$0xff] %v1282_v61  ;;  %2240 = vperm.xlu0 %2610, %v1827_v41   ;;  %v1329_v61 = vperm.slane %v1003_v25, 7  ;;  %v3635_v41 = vpop.xlane.xlu1 %1010 }
 0x2ad   :  { %1829 = vst [vmem:[#allocation1 + $0x1] ss:$9 sm:$0xff] %v1283_v45  ;;  %v3637_v45 = vpop.xlane.xlu2 %1024 }
 0x2ae   :  { %1830 = vst [vmem:[#allocation1 + $0x2] ss:$9 sm:$0xff] %v1284_v53  ;;  %v1330_v53 = vperm.slane %v1005_v22, 0 }
 0x2af   :  { %1831 = vst [vmem:[#allocation1 + $0x3] ss:$9 sm:$0xff] %v1285_v24  ;;  %v3639_v24 = vpop.xlane.xlu0 %1020 }
 0x2b0   :  { %1832 = vst [vmem:[#allocation1 + $0x4] ss:$9 sm:$0xff] %v1286_v55 }
 0x2b1   :  { %1833 = vst [vmem:[#allocation1 + $0x5] ss:$9 sm:$0xff] %v1287_v26  ;;  %v1331_v26 = vperm.slane %v1005_v22, 1 }
 0x2b2   :  { %1834 = vst [vmem:[#allocation1 + $0x6] ss:$9 sm:$0xff] %v1288_v46  ;;  %v1332_v46 = vperm.slane %v1005_v22, 2 }
 0x2b3   :  { %1835 = vst [vmem:[#allocation1 + $0x7] ss:$9 sm:$0xff] %v1289_v28  ;;  %v1333_v28 = vperm.slane %v1005_v22, 3 }
 0x2b4   :  { %v3641_v32 = vpop.xlane.xlu1 %1016 }
 0x2ba   :  { %v1836_v21 = vld [vmem:[#allocation1] sm:$0xff] }
 0x2bb   :  { %1837 = vst [vmem:[#allocation1] ss:$9 sm:$0xff] %v1290_v43  ;;  %2243 = vperm.xlu2 %2609, %v1836_v21   ;;  %v3643_v43 = vpop.xlane.xlu2 %1030  ;;  %v1335_v21 = vperm.slane %v1005_v22, 5 }
 0x2bc   :  { %1838 = vst [vmem:[#allocation1 + $0x1] ss:$9 sm:$0xff] %v1291_v18  ;;  %v1334_v18 = vperm.slane %v1005_v22, 4 }
 0x2bd   :  { %1839 = vst [vmem:[#allocation1 + $0x2] ss:$9 sm:$0xff] %v1292_v48  ;;  %v1336_v48 = vperm.slane %v1005_v22, 6 }
 0x2be   :  { %1840 = vst [vmem:[#allocation1 + $0x3] ss:$9 sm:$0xff] %v1293_v13  ;;  %v1337_v13 = vperm.slane %v1005_v22, 7 }
 0x2bf   :  { %1841 = vst [vmem:[#allocation1 + $0x4] ss:$9 sm:$0xff] %v1294_v36  ;;  %v3645_v36 = vpop.xlane.xlu0 %1026 }
 0x2c0   :  { %1842 = vst [vmem:[#allocation1 + $0x5] ss:$9 sm:$0xff] %v1295_v27  ;;  %v3647_v27 = vpop.xlane.xlu1 %1022 }
 0x2c1   :  { %1843 = vst [vmem:[#allocation1 + $0x6] ss:$9 sm:$0xff] %v1296_v14 }
 0x2c2   :  { %1844 = vst [vmem:[#allocation1 + $0x7] ss:$9 sm:$0xff] %v1297_v42  ;;  %v1338_v42 = vperm.slane %v3625_v12, 0 }
 0x2c3   :  { %v3649_v14 = vpop.xlane.xlu2 %1036 }
 0x2c9   :  { %v1845_v54 = vld [vmem:[#allocation1] sm:$0xff] }
 0x2ca   :  { %1846 = vst [vmem:[#allocation1] ss:$9 sm:$0xff] %v1298_v23  ;;  %2246 = vperm.xlu1 %2611, %v1845_v54   ;;  %v1341_v54 = vperm.slane %v3625_v12, 3 }
 0x2cb   :  { %1847 = vst [vmem:[#allocation1 + $0x1] ss:$9 sm:$0xff] %v1299_v50  ;;  %v1340_v50 = vperm.slane %v3625_v12, 2  ;;  %v3663_v30 = vpop.xlane.xlu2 %1042 }
 0x2cc   :  { %1848 = vst [vmem:[#allocation1 + $0x2] ss:$9 sm:$0xff] %v1300_v29  ;;  %v1342_v29 = vperm.slane %v3625_v12, 4 }
 0x2cd   :  { %1849 = vst [vmem:[#allocation1 + $0x3] ss:$9 sm:$0xff] %v1301_v57  ;;  %v1343_v57 = vperm.slane %v3625_v12, 5 }
 0x2ce   :  { %1850 = vst [vmem:[#allocation1 + $0x4] ss:$9 sm:$0xff] %v1302_v11  ;;  %v3657_v11 = vpop.xlane.xlu0 %1032 }
 0x2cf   :  { %1851 = vst [vmem:[#allocation1 + $0x5] ss:$9 sm:$0xff] %v1303_v2  ;;  %v1344_v2 = vperm.slane %v3625_v12, 6 }
 0x2d0   :  { %1852 = vst [vmem:[#allocation1 + $0x6] ss:$9 sm:$0xff] %v1304_v4  ;;  %v1345_v4 = vperm.slane %v3625_v12, 7  ;;  %v1352_v12 = vperm.slane %v3629_v39, 6 }
 0x2d1   :  { %1853 = vst [vmem:[#allocation1 + $0x7] ss:$9 sm:$0xff] %v1305_v63  ;;  %v3661_v63 = vpop.xlane.xlu1 %1028 }
 0x2d8   :  { %v1854_v0 = vld [vmem:[#allocation1] sm:$0xff] }
 0x2d9   :  { %1855 = vst [vmem:[#allocation1] ss:$9 sm:$0xff] %v1306_v59  ;;  %2249 = vperm.xlu0 %2610, %v1854_v0   ;;  %v3666_v59 = vpop.xlane.xlu0 %1038  ;;  %v1347_v0 = vperm.slane %v3629_v39, 1 }
 0x2da   :  { %1856 = vst [vmem:[#allocation1 + $0x1] ss:$9 sm:$0xff] %v1307_v6 }
 0x2db   :  { %1857 = vst [vmem:[#allocation1 + $0x2] ss:$9 sm:$0xff] %v1308_v51  ;;  %v1348_v51 = vperm.slane %v3629_v39, 2 }
 0x2dc   :  { %1858 = vst [vmem:[#allocation1 + $0x3] ss:$9 sm:$0xff] %v1309_v60  ;;  %v1349_v60 = vperm.slane %v3629_v39, 3 }
 0x2dd   :  { %1859 = vst [vmem:[#allocation1 + $0x4] ss:$9 sm:$0xff] %v1310_v9  ;;  %v3671_v9 = vpop.xlane.xlu1 %1034 }
 0x2de   :  { %1860 = vst [vmem:[#allocation1 + $0x5] ss:$9 sm:$0xff] %v1311_v3  ;;  %v3673_v3 = vpop.xlane.xlu2 %1048 }
 0x2df   :  { %1861 = vst [vmem:[#allocation1 + $0x6] ss:$9 sm:$0xff] %v1312_v38  ;;  %v1350_v38 = vperm.slane %v3629_v39, 4 }
 0x2e0   :  { %1862 = vst [vmem:[#allocation1 + $0x7] ss:$9 sm:$0xff] %v1313_v56  ;;  %v1351_v56 = vperm.slane %v3629_v39, 5 }
 0x2e1   :  { %v3679_v25 = vpop.xlane.xlu0 %1044 }
 0x2e7   :  { %v1863_v49 = vld [vmem:[#allocation1] sm:$0xff] }
 0x2e8   :  { %1864 = vst [vmem:[#allocation1] ss:$9 sm:$0xff] %v1314_v37  ;;  %2252 = vperm.xlu2 %2609, %v1863_v49   ;;  %v1353_v37 = vperm.slane %v3629_v39, 7  ;;  %v3683_v49 = vpop.xlane.xlu2 %1054  ;;  %v1359_v39 = vperm.slane %v3635_v41, 5 }
 0x2e9   :  { %1865 = vst [vmem:[#allocation1 + $0x1] ss:$9 sm:$0xff] %v1315_v34  ;;  %v3681_v34 = vpop.xlane.xlu1 %1040  ;;  %v3691_v22 = vpop.xlane.xlu0 %1050 }
 0x2ea   :  { %1866 = vst [vmem:[#allocation1 + $0x2] ss:$9 sm:$0xff] %v1316_v10  ;;  %v1354_v10 = vperm.slane %v3635_v41, 0 }
 0x2eb   :  { %1867 = vst [vmem:[#allocation1 + $0x3] ss:$9 sm:$0xff] %v1317_v58 }
 0x2ec   :  { %1868 = vst [vmem:[#allocation1 + $0x4] ss:$9 sm:$0xff] %v1318_v7  ;;  %v1355_v7 = vperm.slane %v3635_v41, 1 }
 0x2ed   :  { %1869 = vst [vmem:[#allocation1 + $0x5] ss:$9 sm:$0xff] %v1319_v1  ;;  %v1356_v1 = vperm.slane %v3635_v41, 2 }
 0x2ee   :  { %1870 = vst [vmem:[#allocation1 + $0x6] ss:$9 sm:$0xff] %v1320_v17  ;;  %v1357_v17 = vperm.slane %v3635_v41, 3 }
 0x2ef   :  { %1871 = vst [vmem:[#allocation1 + $0x7] ss:$9 sm:$0xff] %v1321_v16  ;;  %v1358_v16 = vperm.slane %v3635_v41, 4 }
 0x2f6   :  { %v1872_v35 = vld [vmem:[#allocation1] sm:$0xff] }
 0x2f7   :  { %1873 = vst [vmem:[#allocation1] ss:$9 sm:$0xff] %v1322_v33  ;;  %2255 = vperm.xlu1 %2611, %v1872_v35   ;;  %v1360_v33 = vperm.slane %v3635_v41, 6  ;;  %v1361_v35 = vperm.slane %v3635_v41, 7 }
 0x2f8   :  { %1874 = vst [vmem:[#allocation1 + $0x1] ss:$9 sm:$0xff] %v1323_v20  ;;  %v3694_v20 = vpop.xlane.xlu2 %1060 }
 0x2f9   :  { %1875 = vst [vmem:[#allocation1 + $0x2] ss:$9 sm:$0xff] %v1324_v40  ;;  %v3697_v40 = vpop.xlane.xlu1 %1046 }
 0x2fa   :  { %1876 = vst [vmem:[#allocation1 + $0x3] ss:$9 sm:$0xff] %v1325_v44 }
 0x2fb   :  { %1877 = vst [vmem:[#allocation1 + $0x4] ss:$9 sm:$0xff] %v1326_v5  ;;  %v1362_v5 = vperm.slane %v3627_v52, 0 }
 0x2fc   :  { %1878 = vst [vmem:[#allocation1 + $0x5] ss:$9 sm:$0xff] %v1327_v19  ;;  %v3700_v19 = vpop.xlane.xlu0 %1056 }
 0x2fd   :  { %1879 = vst [vmem:[#allocation1 + $0x6] ss:$9 sm:$0xff] %v1328_v47  ;;  %v1363_v47 = vperm.slane %v3627_v52, 1 }
 0x2fe   :  { %1880 = vst [vmem:[#allocation1 + $0x7] ss:$9 sm:$0xff] %v1329_v61 }
 0x300   :  { %v2163_v44 = vpop.permute.xlu2 %2162 }
 0x301   :  { %v3705_v41 = vpop.xlane.xlu1 %1052 }
 0x305   :  { %v1881_v55 = vld [vmem:[#allocation1] sm:$0xff] }
 0x306   :  { %1882 = vst [vmem:[#allocation1] ss:$9 sm:$0xff] %v1330_v53  ;;  %2258 = vperm.xlu0 %2610, %v1881_v55   ;;  %v1364_v53 = vperm.slane %v3627_v52, 2  ;;  %v1365_v55 = vperm.slane %v3627_v52, 3 }
 0x307   :  { %1883 = vst [vmem:[#allocation1 + $0x1] ss:$9 sm:$0xff] %v1331_v26  ;;  %v1366_v26 = vperm.slane %v3627_v52, 4 }
 0x308   :  { %1884 = vst [vmem:[#allocation1 + $0x2] ss:$9 sm:$0xff] %v1332_v46  ;;  %v1367_v46 = vperm.slane %v3627_v52, 5 }
 0x309   :  { %1885 = vst [vmem:[#allocation1 + $0x3] ss:$9 sm:$0xff] %v1333_v28  ;;  %v1368_v28 = vperm.slane %v3627_v52, 6 }
 0x30a   :  { %1886 = vst [vmem:[#allocation1 + $0x4] ss:$9 sm:$0xff] %v1334_v18  ;;  %v1369_v18 = vperm.slane %v3627_v52, 7 }
 0x30b   :  { %1887 = vst [vmem:[#allocation1 + $0x5] ss:$9 sm:$0xff] %v1335_v21  ;;  %v2172_v21 = vpop.permute.xlu2 %2171 }
 0x30c   :  { %1888 = vst [vmem:[#allocation1 + $0x6] ss:$9 sm:$0xff] %v1336_v48  ;;  %v3711_v48 = vpop.xlane.xlu0 %1062 }
 0x30d   :  { %1889 = vst [vmem:[#allocation1 + $0x7] ss:$9 sm:$0xff] %v1337_v13  ;;  %v2353_v13 = vlaneseq }
 0x314   :  { %v1890_v23 = vld [vmem:[#allocation1] sm:$0xff] }
 0x315   :  { %1891 = vst [vmem:[#allocation1] ss:$9 sm:$0xff] %v1338_v42  ;;  %2261 = vperm.xlu2 %2609, %v1890_v23   ;;  %v3713_v42 = vpop.xlane.xlu1 %1058  ;;  %v3717_v23 = vand.u32 127, %v2353_v13 }
 0x316   :  { %1892 = vst [vmem:[#allocation1 + $0x1] ss:$9 sm:$0xff] %v1339_v62  ;;  %v1370_v62 = vperm.slane %v3633_v15, 0 }
 0x317   :  { %1893 = vst [vmem:[#allocation1 + $0x2] ss:$9 sm:$0xff] %v1340_v50  ;;  %v1371_v50 = vperm.slane %v3633_v15, 1  ;;  %v3722_v52 = vadd.s32 4294967288, %v3717_v23 }
 0x318   :  { %1894 = vst [vmem:[#allocation1 + $0x3] ss:$9 sm:$0xff] %v1341_v54 }
 0x319   :  { %1895 = vst [vmem:[#allocation1 + $0x4] ss:$9 sm:$0xff] %v1342_v29  ;;  %v1372_v29 = vperm.slane %v3633_v15, 2 }
 0x31a   :  { %1896 = vst [vmem:[#allocation1 + $0x5] ss:$9 sm:$0xff] %v1343_v57  ;;  %v1373_v57 = vperm.slane %v3633_v15, 3 }
 0x31b   :  { %1897 = vst [vmem:[#allocation1 + $0x6] ss:$9 sm:$0xff] %v1344_v2  ;;  %v2166_v2 = vpop.permute.xlu0 %2165 }
 0x31c   :  { %1898 = vst [vmem:[#allocation1 + $0x7] ss:$9 sm:$0xff] %v1345_v4  ;;  %v1374_v4 = vperm.slane %v3633_v15, 4 }
 0x323   :  { %v1899_v6 = vld [vmem:[#allocation1] sm:$0xff] }
 0x324   :  { %1900 = vst [vmem:[#allocation1] ss:$9 sm:$0xff] %v1346_v8  ;;  %2264 = vperm.xlu1 %2611, %v1899_v6   ;;  %v2355_v8 = vperm.slane %v2163_v44, %v3717_v23  ;;  %v2357_v6 = vperm.slane %v2166_v2, %v3722_v52 }
 0x325   :  { %1901 = vst [vmem:[#allocation1 + $0x1] ss:$9 sm:$0xff] %v1347_v0  ;;  %v2175_v0 = vpop.permute.xlu2 %2174 }
 0x326   :  { %1902 = vst [vmem:[#allocation1 + $0x2] ss:$9 sm:$0xff] %v1348_v51  ;;  %v1375_v51 = vperm.slane %v3633_v15, 5 }
 0x327   :  { %1903 = vst [vmem:[#allocation1 + $0x3] ss:$9 sm:$0xff] %v1349_v60  ;;  %v1376_v60 = vperm.slane %v3633_v15, 6 }
 0x328   :  { %1904 = vst [vmem:[#allocation1 + $0x4] ss:$9 sm:$0xff] %v1350_v38  ;;  %v2359_v38 = vsel %vm2358_vm2, %v2357_v6, %v2355_v8  ;;  %v3769_v8 = vadd.s32 4294967232, %v3717_v23 }
 0x329   :  { %1905 = vst [vmem:[#allocation1 + $0x5] ss:$9 sm:$0xff] %v1351_v56  ;;  %v1377_v56 = vperm.slane %v3633_v15, 7  ;;  %v1379_v15 = vperm.slane %v3641_v32, 1 }
 0x32a   :  { %1906 = vst [vmem:[#allocation1 + $0x6] ss:$9 sm:$0xff] %v1352_v12  ;;  %v3732_v12 = vpop.xlane.xlu1 %1064 }
 0x32b   :  { %1907 = vst [vmem:[#allocation1 + $0x7] ss:$9 sm:$0xff] %v1353_v37  ;;  %v3735_v37 = vadd.s32 4294967272, %v3717_v23 }
 0x32d   :  { %v2365_v44 = vperm.slane %v2172_v21, %v3735_v37  ;;  %v2187_v21 = vpop.permute.xlu0 %2186 }
 0x332   :  { %v1908_v58 = vld [vmem:[#allocation1] sm:$0xff] }
 0x333   :  { %1909 = vst [vmem:[#allocation1] ss:$9 sm:$0xff] %v1354_v10  ;;  %2267 = vperm.xlu0 %2610, %v1908_v58   ;;  %v2181_v10 = vpop.permute.xlu2 %2180  ;;  %v1378_v58 = vperm.slane %v3641_v32, 0 }
 0x334   :  { %1910 = vst [vmem:[#allocation1 + $0x1] ss:$9 sm:$0xff] %v1355_v7  ;;  %v3739_v7 = vadd.s32 4294967264, %v3717_v23 }
 0x335   :  { %1911 = vst [vmem:[#allocation1 + $0x2] ss:$9 sm:$0xff] %v1356_v1  ;;  %v3742_v1 = vadd.s32 4294967280, %v3717_v23 }
 0x336   :  { %1912 = vst [vmem:[#allocation1 + $0x3] ss:$9 sm:$0xff] %v1357_v17 }
 0x337   :  { %1913 = vst [vmem:[#allocation1 + $0x4] ss:$9 sm:$0xff] %v1358_v16  ;;  %v2169_v16 = vpop.permute.xlu1 %2168 }
 0x338   :  { %1914 = vst [vmem:[#allocation1 + $0x5] ss:$9 sm:$0xff] %v1359_v39  ;;  %v1380_v39 = vperm.slane %v3641_v32, 2 }
 0x339   :  { %1915 = vst [vmem:[#allocation1 + $0x6] ss:$9 sm:$0xff] %v1360_v33  ;;  %v2361_v33 = vperm.slane %v2169_v16, %v3742_v1  ;;  %v2196_v16 = vpop.permute.xlu0 %2195 }
 0x33a   :  { %1916 = vst [vmem:[#allocation1 + $0x7] ss:$9 sm:$0xff] %v1361_v35  ;;  %v1381_v35 = vperm.slane %v3641_v32, 3 }
 0x341   :  { %v1917_v61 = vld [vmem:[#allocation1] sm:$0xff] }
 0x342   :  { %1918 = vst [vmem:[#allocation1] ss:$9 sm:$0xff] %v1362_v5  ;;  %2270 = vperm.xlu2 %2609, %v1917_v61   ;;  %v1382_v5 = vperm.slane %v3641_v32, 4  ;;  %v2363_v61 = vsel %vm2362_vm3, %v2361_v33, %v2359_v38  ;;  %v1388_v38 = vperm.slane %v3631_v31, 2  ;;  %v1391_v33 = vperm.slane %v3631_v31, 5 }
 0x343   :  { %1919 = vst [vmem:[#allocation1 + $0x1] ss:$9 sm:$0xff] %v1363_v47  ;;  %v2369_v47 = vperm.slane %v2175_v0, %v3739_v7  ;;  %v1387_v0 = vperm.slane %v3631_v31, 1 }
 0x344   :  { %1920 = vst [vmem:[#allocation1 + $0x2] ss:$9 sm:$0xff] %v1364_v53  ;;  %v1383_v53 = vperm.slane %v3641_v32, 5 }
 0x345   :  { %1921 = vst [vmem:[#allocation1 + $0x3] ss:$9 sm:$0xff] %v1365_v55  ;;  %v2367_v55 = vsel %vm2366_vm4, %v2365_v44, %v2363_v61  ;;  %v1393_v61 = vperm.slane %v3631_v31, 7 }
 0x346   :  { %1922 = vst [vmem:[#allocation1 + $0x4] ss:$9 sm:$0xff] %v1366_v26  ;;  %v1384_v26 = vperm.slane %v3641_v32, 6 }
 0x347   :  { %1923 = vst [vmem:[#allocation1 + $0x5] ss:$9 sm:$0xff] %v1367_v46  ;;  %v2371_v46 = vsel %vm2370_vm5, %v2369_v47, %v2367_v55  ;;  %v3791_v55 = vadd.s32 4294967208, %v3717_v23 }
 0x348   :  { %1924 = vst [vmem:[#allocation1 + $0x6] ss:$9 sm:$0xff] %v1368_v28  ;;  %v1385_v28 = vperm.slane %v3641_v32, 7 }
 0x349   :  { %1925 = vst [vmem:[#allocation1 + $0x7] ss:$9 sm:$0xff] %v1369_v18  ;;  %v3758_v18 = vadd.s32 4294967248, %v3717_v23 }
 0x350   :  { %v1926_v54 = vld [vmem:[#allocation1] sm:$0xff] }
 0x351   :  { %1927 = vst [vmem:[#allocation1] ss:$9 sm:$0xff] %v1370_v62  ;;  %2273 = vperm.xlu1 %2611, %v1926_v54   ;;  %v3761_v62 = vadd.s32 4294967256, %v3717_v23  ;;  %v2178_v54 = vpop.permute.xlu1 %2177 }
 0x352   :  { %1928 = vst [vmem:[#allocation1 + $0x1] ss:$9 sm:$0xff] %v1371_v50  ;;  %v2190_v50 = vpop.permute.xlu2 %2189 }
 0x353   :  { %1929 = vst [vmem:[#allocation1 + $0x2] ss:$9 sm:$0xff] %v1372_v29  ;;  %v2373_v29 = vperm.slane %v2178_v54, %v3761_v62 }
 0x354   :  { %1930 = vst [vmem:[#allocation1 + $0x3] ss:$9 sm:$0xff] %v1373_v57  ;;  %v2377_v57 = vperm.slane %v2181_v10, %v3758_v18  ;;  %v1389_v10 = vperm.slane %v3631_v31, 3 }
 0x355   :  { %1931 = vst [vmem:[#allocation1 + $0x4] ss:$9 sm:$0xff] %v1374_v4  ;;  %v2375_v2 = vsel %vm2374_vm6, %v2373_v29, %v2371_v46  ;;  %v1386_v4 = vperm.slane %v3631_v31, 0  ;;  %v3797_v46 = vadd.s32 4294967216, %v3717_v23  ;;  %v2205_v29 = vpop.permute.xlu0 %2204 }
 0x356   :  { %1932 = vst [vmem:[#allocation1 + $0x5] ss:$9 sm:$0xff] %v1375_v51  ;;  %v2379_v32 = vsel %vm2378_vm7, %v2377_v57, %v2375_v2  ;;  %v3773_v51 = vadd.s32 4294967224, %v3717_v23 }
 0x357   :  { %1933 = vst [vmem:[#allocation1 + $0x6] ss:$9 sm:$0xff] %v1376_v60  ;;  %v3776_v60 = vadd.s32 4294967240, %v3717_v23 }
 0x358   :  { %1934 = vst [vmem:[#allocation1 + $0x7] ss:$9 sm:$0xff] %v1377_v56 }
 0x359   :  { %v2184_v56 = vpop.permute.xlu1 %2183 }
 0x35f   :  { %v1935_v17 = vld [vmem:[#allocation1] sm:$0xff] }
 0x360   :  { %1936 = vst [vmem:[#allocation1] ss:$9 sm:$0xff] %v1378_v58  ;;  %2276 = vperm.xlu0 %2610, %v1935_v17   ;;  %v2381_v58 = vperm.slane %v2184_v56, %v3776_v60  ;;  %v1390_v17 = vperm.slane %v3631_v31, 4  ;;  %v1396_v56 = vperm.slane %v3639_v24, 2 }
 0x361   :  { %1937 = vst [vmem:[#allocation1 + $0x1] ss:$9 sm:$0xff] %v1379_v15  ;;  %v2385_v15 = vperm.slane %v2187_v21, %v3769_v8 }
 0x362   :  { %1938 = vst [vmem:[#allocation1 + $0x2] ss:$9 sm:$0xff] %v1380_v39  ;;  %v2199_v39 = vpop.permute.xlu2 %2198  ;;  %v2383_v44 = vsel %vm2382_vm8, %v2381_v58, %v2379_v32  ;;  %v1394_v32 = vperm.slane %v3639_v24, 0  ;;  %v1397_v58 = vperm.slane %v3639_v24, 3 }
 0x363   :  { %1939 = vst [vmem:[#allocation1 + $0x3] ss:$9 sm:$0xff] %v1381_v35  ;;  %v2389_v35 = vperm.slane %v2190_v50, %v3773_v51  ;;  %v2387_v47 = vsel %vm2386_vm9, %v2385_v15, %v2383_v44  ;;  %v2397_v50 = vperm.slane %v2196_v16, %v3791_v55  ;;  %v1398_v15 = vperm.slane %v3639_v24, 4 }
 0x364   :  { %1940 = vst [vmem:[#allocation1 + $0x4] ss:$9 sm:$0xff] %v1382_v5  ;;  %v1392_v5 = vperm.slane %v3631_v31, 6 }
 0x365   :  { %1941 = vst [vmem:[#allocation1 + $0x5] ss:$9 sm:$0xff] %v1383_v53  ;;  %v2391_v53 = vsel %vm2390_vm10, %v2389_v35, %v2387_v47  ;;  %v1400_v35 = vperm.slane %v3639_v24, 6 }
 0x366   :  { %1942 = vst [vmem:[#allocation1 + $0x6] ss:$9 sm:$0xff] %v1384_v26  ;;  %v3794_v26 = vadd.s32 4294967200, %v3717_v23 }
 0x367   :  { %1943 = vst [vmem:[#allocation1 + $0x7] ss:$9 sm:$0xff] %v1385_v28  ;;  %v2193_v28 = vpop.permute.xlu1 %2192 }
 0x368   :  { %v2393_v21 = vperm.slane %v2193_v28, %v3797_v46  ;;  %v2401_v31 = vperm.slane %v2199_v39, %v3794_v26  ;;  %v1399_v39 = vperm.slane %v3639_v24, 5 }
 0x36a   :  { %v2395_v54 = vsel %vm2394_vm11, %v2393_v21, %v2391_v53  ;;  %v3803_v57 = vpop.permute.xlu2 %2207 }
 0x36b   :  { %v2399_v2 = vsel %vm2398_vm12, %v2397_v50, %v2395_v54 }
 0x36e   :  { %v1944_v6 = vld [vmem:[#allocation1] sm:$0xff] }
 0x36f   :  { %1945 = vst [vmem:[#allocation1] ss:$9 sm:$0xff] %v1386_v4  ;;  %2279 = vperm.xlu2 %2609, %v1944_v6   ;;  %v2403_v4 = vsel %vm2402_vm13, %v2401_v31, %v2399_v2 }
 0x370   :  { %1946 = vst [vmem:[#allocation1 + $0x1] ss:$9 sm:$0xff] %v1387_v0  ;;  %v1395_v0 = vperm.slane %v3639_v24, 1 }
 0x371   :  { %1947 = vst [vmem:[#allocation1 + $0x2] ss:$9 sm:$0xff] %v1388_v38  ;;  %v3810_v38 = vadd.s32 4294967184, %v3717_v23 }
 0x372   :  { %1948 = vst [vmem:[#allocation1 + $0x3] ss:$9 sm:$0xff] %v1389_v10  ;;  %v3814_v10 = vadd.s32 4294967192, %v3717_v23  ;;  %v2217_v53 = vpop.permute.xlu2 %2216 }
 0x373   :  { %1949 = vst [vmem:[#allocation1 + $0x4] ss:$9 sm:$0xff] %v1390_v17  ;;  %v2202_v17 = vpop.permute.xlu1 %2201  ;;  %v2419_v31 = vperm.slane %v2217_v53, %v3742_v1 }
 0x374   :  { %1950 = vst [vmem:[#allocation1 + $0x5] ss:$9 sm:$0xff] %v1391_v33  ;;  %v2405_v16 = vperm.slane %v2202_v17, %v3814_v10  ;;  %v2409_v33 = vperm.slane %v2205_v29, %v3810_v38  ;;  %v1402_v29 = vperm.slane %v3647_v27, 0 }
 0x375   :  { %1951 = vst [vmem:[#allocation1 + $0x6] ss:$9 sm:$0xff] %v1392_v5  ;;  %v1401_v5 = vperm.slane %v3639_v24, 7 }
 0x376   :  { %1952 = vst [vmem:[#allocation1 + $0x7] ss:$9 sm:$0xff] %v1393_v61  ;;  %v2407_v44 = vsel %vm2406_vm14, %v2405_v16, %v2403_v4  ;;  %v2214_v61 = vpop.permute.xlu0 %2213  ;;  %v1404_v4 = vperm.slane %v3647_v27, 2 }
 0x377   :  { %v3825_v47 = vsel %vm2410_vm15, %v2409_v33, %v2407_v44  ;;  %v2417_v21 = vperm.slane %v2214_v61, %v3722_v52 }
 0x37b   :  { %v2211_v28 = vpop.permute.xlu1 %2210 }
 0x37c   :  { %v2416_v50 = vperm.slane %v2211_v28, %v3717_v23 }
 0x37d   :  { %v1953_v6 = vld [vmem:[#allocation1] sm:$0xff] }
 0x37e   :  { %1954 = vst [vmem:[#allocation1] ss:$9 sm:$0xff] %v1394_v32  ;;  %2282 = vperm.xlu1 %2611, %v1953_v6   ;;  %v2418_v54 = vsel %vm2358_vm2, %v2417_v21, %v2416_v50  ;;  %v1403_v32 = vperm.slane %v3647_v27, 1  ;;  %v2223_v6 = vpop.permute.xlu0 %2222  ;;  %v1410_v50 = vperm.slane %v3637_v45, 0 }
 0x37f   :  { %1955 = vst [vmem:[#allocation1 + $0x1] ss:$9 sm:$0xff] %v1395_v0  ;;  %v2420_v24 = vsel %vm2362_vm3, %v2419_v31, %v2418_v54  ;;  %v1405_v0 = vperm.slane %v3647_v27, 3  ;;  %v2423_v33 = vperm.slane %v2223_v6, %v3739_v7 }
 0x380   :  { %1956 = vst [vmem:[#allocation1 + $0x2] ss:$9 sm:$0xff] %v1396_v56  ;;  %v1406_v56 = vperm.slane %v3647_v27, 4 }
 0x381   :  { %1957 = vst [vmem:[#allocation1 + $0x3] ss:$9 sm:$0xff] %v1397_v58  ;;  %v2226_v58 = vpop.permute.xlu2 %2225 }
 0x382   :  { %1958 = vst [vmem:[#allocation1 + $0x4] ss:$9 sm:$0xff] %v1398_v15  ;;  %v1407_v15 = vperm.slane %v3647_v27, 5  ;;  %v2425_v44 = vperm.slane %v2226_v58, %v3761_v62 }
 0x383   :  { %1959 = vst [vmem:[#allocation1 + $0x5] ss:$9 sm:$0xff] %v1399_v39  ;;  %v2220_v17 = vpop.permute.xlu1 %2219  ;;  %v1408_v39 = vperm.slane %v3647_v27, 6 }
 0x384   :  { %1960 = vst [vmem:[#allocation1 + $0x6] ss:$9 sm:$0xff] %v1400_v35  ;;  %v2421_v16 = vperm.slane %v2220_v17, %v3735_v37  ;;  %v1409_v35 = vperm.slane %v3647_v27, 7  ;;  %v1411_v27 = vperm.slane %v3637_v45, 1  ;;  %v1416_v17 = vperm.slane %v3637_v45, 6 }
 0x385   :  { %1961 = vst [vmem:[#allocation1 + $0x7] ss:$9 sm:$0xff] %v1401_v5 }
 0x386   :  { %v2422_v5 = vsel %vm2366_vm4, %v2421_v16, %v2420_v24  ;;  %v2232_v24 = vpop.permute.xlu0 %2231  ;;  %v1417_v16 = vperm.slane %v3637_v45, 7 }
 0x387   :  { %v2424_v61 = vsel %vm2370_vm5, %v2423_v33, %v2422_v5  ;;  %v1419_v33 = vperm.slane %v3645_v36, 1  ;;  %v1421_v5 = vperm.slane %v3645_v36, 3 }
 0x388   :  { %v2426_v53 = vsel %vm2374_vm6, %v2425_v44, %v2424_v61  ;;  %v1420_v44 = vperm.slane %v3645_v36, 2 }
 0x38b   :  { %v2229_v28 = vpop.permute.xlu1 %2228 }
 0x38c   :  { %v1962_v2 = vld [vmem:[#allocation1] sm:$0xff]  ;;  %v2427_v21 = vperm.slane %v2229_v28, %v3758_v18  ;;  %v1423_v28 = vperm.slane %v3645_v36, 5 }
 0x38d   :  { %1963 = vst [vmem:[#allocation1] ss:$9 sm:$0xff] %v1402_v29  ;;  %2285 = vperm.xlu0 %2610, %v1962_v2   ;;  %v2235_v29 = vpop.permute.xlu2 %2234  ;;  %v1412_v2 = vperm.slane %v3637_v45, 2 }
 0x38e   :  { %1964 = vst [vmem:[#allocation1 + $0x1] ss:$9 sm:$0xff] %v1403_v32  ;;  %v2428_v31 = vsel %vm2378_vm7, %v2427_v21, %v2426_v53  ;;  %v1413_v32 = vperm.slane %v3637_v45, 3  ;;  %v2431_v6 = vperm.slane %v2235_v29, %v3769_v8  ;;  %v1422_v53 = vperm.slane %v3645_v36, 4 }
 0x38f   :  { %1965 = vst [vmem:[#allocation1 + $0x2] ss:$9 sm:$0xff] %v1404_v4  ;;  %v2429_v4 = vperm.slane %v2232_v24, %v3776_v60  ;;  %v1424_v21 = vperm.slane %v3645_v36, 6 }
 0x390   :  { %1966 = vst [vmem:[#allocation1 + $0x3] ss:$9 sm:$0xff] %v1405_v0  ;;  %v1414_v0 = vperm.slane %v3637_v45, 4 }
 0x391   :  { %1967 = vst [vmem:[#allocation1 + $0x4] ss:$9 sm:$0xff] %v1406_v56  ;;  %v1415_v56 = vperm.slane %v3637_v45, 5  ;;  %v2430_v58 = vsel %vm2382_vm8, %v2429_v4, %v2428_v31  ;;  %v1425_v31 = vperm.slane %v3645_v36, 7 }
 0x392   :  { %1968 = vst [vmem:[#allocation1 + $0x5] ss:$9 sm:$0xff] %v1407_v15  ;;  %v2432_v15 = vsel %vm2386_vm9, %v2431_v6, %v2430_v58  ;;  %v1427_v6 = vperm.slane %v3661_v63, 1  ;;  %v1430_v58 = vperm.slane %v3661_v63, 4 }
 0x393   :  { %1969 = vst [vmem:[#allocation1 + $0x6] ss:$9 sm:$0xff] %v1408_v39  ;;  %v1418_v39 = vperm.slane %v3645_v36, 0  ;;  %v2238_v61 = vpop.permute.xlu1 %2237  ;;  %v1428_v36 = vperm.slane %v3661_v63, 2 }
 0x394   :  { %1970 = vst [vmem:[#allocation1 + $0x7] ss:$9 sm:$0xff] %v1409_v35  ;;  %v2433_v45 = vperm.slane %v2238_v61, %v3773_v51 }
 0x39b   :  { %v1971_v54 = vld [vmem:[#allocation1] sm:$0xff] }
 0x39c   :  { %1972 = vst [vmem:[#allocation1] ss:$9 sm:$0xff] %v1410_v50  ;;  %2288 = vperm.xlu2 %2609, %v1971_v54   ;;  %v2434_v50 = vsel %vm2390_vm10, %v2433_v45, %v2432_v15  ;;  %v2241_v54 = vpop.permute.xlu0 %2240  ;;  %v1432_v15 = vperm.slane %v3661_v63, 6  ;;  %v1437_v45 = vperm.slane %v3643_v43, 3 }
 0x39d   :  { %1973 = vst [vmem:[#allocation1 + $0x1] ss:$9 sm:$0xff] %v1411_v27  ;;  %v2244_v27 = vpop.permute.xlu2 %2243  ;;  %v2435_v29 = vperm.slane %v2241_v54, %v3797_v46 }
 0x39e   :  { %1974 = vst [vmem:[#allocation1 + $0x2] ss:$9 sm:$0xff] %v1412_v2  ;;  %v2437_v2 = vperm.slane %v2244_v27, %v3791_v55  ;;  %v1440_v27 = vperm.slane %v3643_v43, 6 }
 0x39f   :  { %1975 = vst [vmem:[#allocation1 + $0x3] ss:$9 sm:$0xff] %v1413_v32  ;;  %v2436_v24 = vsel %vm2394_vm11, %v2435_v29, %v2434_v50  ;;  %v1426_v32 = vperm.slane %v3661_v63, 0  ;;  %v1439_v50 = vperm.slane %v3643_v43, 5  ;;  %v1441_v29 = vperm.slane %v3643_v43, 7 }
 0x3a0   :  { %1976 = vst [vmem:[#allocation1 + $0x4] ss:$9 sm:$0xff] %v1414_v0  ;;  %v2438_v4 = vsel %vm2398_vm12, %v2437_v2, %v2436_v24 }
 0x3a1   :  { %1977 = vst [vmem:[#allocation1 + $0x5] ss:$9 sm:$0xff] %v1415_v56  ;;  %v1429_v56 = vperm.slane %v3661_v63, 3 }
 0x3a2   :  { %1978 = vst [vmem:[#allocation1 + $0x6] ss:$9 sm:$0xff] %v1416_v17  ;;  %v1431_v17 = vperm.slane %v3661_v63, 5 }
 0x3a3   :  { %1979 = vst [vmem:[#allocation1 + $0x7] ss:$9 sm:$0xff] %v1417_v16  ;;  %v1433_v16 = vperm.slane %v3661_v63, 7  ;;  %v1438_v63 = vperm.slane %v3643_v43, 4 }
 0x3aa   :  { %v1980_v35 = vld [vmem:[#allocation1] sm:$0xff] }
 0x3ab   :  { %1981 = vst [vmem:[#allocation1] ss:$9 sm:$0xff] %v1418_v39  ;;  %2291 = vperm.xlu1 %2611, %v1980_v35   ;;  %v2247_v39 = vpop.permute.xlu1 %2246  ;;  %v1434_v35 = vperm.slane %v3643_v43, 0 }
 0x3ac   :  { %1982 = vst [vmem:[#allocation1 + $0x1] ss:$9 sm:$0xff] %v1419_v33  ;;  %v2439_v33 = vperm.slane %v2247_v39, %v3794_v26 }
 0x3ad   :  { %1983 = vst [vmem:[#allocation1 + $0x2] ss:$9 sm:$0xff] %v1420_v44 }
 0x3ae   :  { %1984 = vst [vmem:[#allocation1 + $0x3] ss:$9 sm:$0xff] %v1421_v5  ;;  %v2440_v44 = vsel %vm2402_vm13, %v2439_v33, %v2438_v4  ;;  %v1435_v5 = vperm.slane %v3643_v43, 1 }
 0x3af   :  { %1985 = vst [vmem:[#allocation1 + $0x4] ss:$9 sm:$0xff] %v1422_v53  ;;  %v1436_v53 = vperm.slane %v3643_v43, 2  ;;  %v1443_v43 = vperm.slane %v3657_v11, 1 }
 0x3b0   :  { %1986 = vst [vmem:[#allocation1 + $0x5] ss:$9 sm:$0xff] %v1423_v28  ;;  %v3890_v28 = vadd.s32 4294967176, %v3717_v23 }
 0x3b1   :  { %1987 = vst [vmem:[#allocation1 + $0x6] ss:$9 sm:$0xff] %v1424_v21  ;;  %v2253_v21 = vpop.permute.xlu2 %2252 }
 0x3b2   :  { %1988 = vst [vmem:[#allocation1 + $0x7] ss:$9 sm:$0xff] %v1425_v31  ;;  %v2250_v31 = vpop.permute.xlu0 %2249  ;;  %v2443_v2 = vperm.slane %v2253_v21, %v3810_v38  ;;  %v2413_v24 = vperm.slane %v3803_v57, %v3890_v28  ;;  %v1445_v57 = vperm.slane %v3657_v11, 3 }
 0x3b3   :  { %v2441_v54 = vperm.slane %v2250_v31, %v3814_v10  ;;  %v1454_v31 = vperm.slane %v3671_v9, 4 }
 0x3b9   :  { %v1989_v0 = vld [vmem:[#allocation1] sm:$0xff] }
 0x3ba   :  { %1990 = vst [vmem:[#allocation1] ss:$9 sm:$0xff] %v1426_v32  ;;  %2294 = vperm.xlu0 %2610, %v1989_v0   ;;  %v2442_v32 = vsel %vm2406_vm14, %v2441_v54, %v2440_v44  ;;  %v3903_v0 = vsel %vm2414_vm0, %v2413_v24, %v3825_v47  ;;  %v1448_v47 = vperm.slane %v3657_v11, 6  ;;  %v2259_v44 = vpop.permute.xlu0 %2258  ;;  %v1456_v54 = vperm.slane %v3671_v9, 6 }
 0x3bb   :  { %1991 = vst [vmem:[#allocation1 + $0x1] ss:$9 sm:$0xff] %v1427_v6  ;;  %v2444_v4 = vsel %vm2410_vm15, %v2443_v2, %v2442_v32  ;;  %v1442_v6 = vperm.slane %v3657_v11, 0  ;;  %v1458_v2 = vperm.slane %v3649_v14, 0  ;;  %v1459_v24 = vperm.slane %v3649_v14, 1 }
 0x3bc   :  { %1992 = vst [vmem:[#allocation1 + $0x2] ss:$9 sm:$0xff] %v1428_v36 }
 0x3bd   :  { %1993 = vst [vmem:[#allocation1 + $0x3] ss:$9 sm:$0xff] %v1429_v56  ;;  %v1444_v56 = vperm.slane %v3657_v11, 2 }
 0x3be   :  { %1994 = vst [vmem:[#allocation1 + $0x4] ss:$9 sm:$0xff] %v1430_v58  ;;  %v1446_v58 = vperm.slane %v3657_v11, 4 }
 0x3bf   :  { %1995 = vst [vmem:[#allocation1 + $0x5] ss:$9 sm:$0xff] %v1431_v17  ;;  %v1447_v17 = vperm.slane %v3657_v11, 5 }
 0x3c0   :  { %1996 = vst [vmem:[#allocation1 + $0x6] ss:$9 sm:$0xff] %v1432_v15  ;;  %v2256_v15 = vpop.permute.xlu1 %2255 }
 0x3c1   :  { %1997 = vst [vmem:[#allocation1 + $0x7] ss:$9 sm:$0xff] %v1433_v16  ;;  %v1449_v16 = vperm.slane %v3657_v11, 7  ;;  %v2445_v39 = vperm.slane %v2256_v15, %v3890_v28  ;;  %v1452_v11 = vperm.slane %v3671_v9, 2  ;;  %v1469_v15 = vperm.slane %v3666_v59, 3 }
 0x3c3   :  { %v3915_v33 = vsel %vm2414_vm0, %v2445_v39, %v2444_v4  ;;  %v1460_v4 = vperm.slane %v3649_v14, 2  ;;  %v1472_v39 = vperm.slane %v3666_v59, 6 }
 0x3c8   :  { %v1998_v61 = vld [vmem:[#allocation1] sm:$0xff] }
 0x3c9   :  { %1999 = vst [vmem:[#allocation1] ss:$9 sm:$0xff] %v1434_v35  ;;  %2297 = vperm.xlu2 %2609, %v1998_v61   ;;  %v2262_v35 = vpop.permute.xlu2 %2261 }
 0x3ca   :  { %2000 = vst [vmem:[#allocation1 + $0x1] ss:$9 sm:$0xff] %v1435_v5  ;;  %v1450_v5 = vperm.slane %v3671_v9, 0  ;;  %v2448_v61 = vperm.slane %v2262_v35, %v3722_v52  ;;  %v1473_v35 = vperm.slane %v3666_v59, 7 }
 0x3cb   :  { %2001 = vst [vmem:[#allocation1 + $0x2] ss:$9 sm:$0xff] %v1436_v53  ;;  %v2447_v53 = vperm.slane %v2259_v44, %v3717_v23  ;;  %v1474_v44 = vperm.slane %v3681_v34, 0 }
 0x3cc   :  { %2002 = vst [vmem:[#allocation1 + $0x3] ss:$9 sm:$0xff] %v1437_v45 }
 0x3cd   :  { %2003 = vst [vmem:[#allocation1 + $0x4] ss:$9 sm:$0xff] %v1438_v63  ;;  %v1451_v63 = vperm.slane %v3671_v9, 1  ;;  %v3923_v21 = vsel %vm2358_vm2, %v2448_v61, %v2447_v53  ;;  %v1475_v61 = vperm.slane %v3681_v34, 1  ;;  %v1476_v53 = vperm.slane %v3681_v34, 2 }
 0x3ce   :  { %2004 = vst [vmem:[#allocation1 + $0x5] ss:$9 sm:$0xff] %v1439_v50  ;;  %v1453_v50 = vperm.slane %v3671_v9, 3 }
 0x3cf   :  { %2005 = vst [vmem:[#allocation1 + $0x6] ss:$9 sm:$0xff] %v1440_v27  ;;  %v1455_v27 = vperm.slane %v3671_v9, 5 }
 0x3d0   :  { %2006 = vst [vmem:[#allocation1 + $0x7] ss:$9 sm:$0xff] %v1441_v29  ;;  %v1457_v29 = vperm.slane %v3671_v9, 7  ;;  %v1463_v9 = vperm.slane %v3649_v14, 5 }
 0x3d7   :  { %v2007_v36 = vld [vmem:[#allocation1] sm:$0xff] }
 0x3d8   :  { %2008 = vst [vmem:[#allocation1] ss:$9 sm:$0xff] %v1442_v6  ;;  %2300 = vperm.xlu1 %2611, %v2007_v36   ;;  %v1461_v6 = vperm.slane %v3649_v14, 3  ;;  %v1464_v36 = vperm.slane %v3649_v14, 6 }
 0x3d9   :  { %2009 = vst [vmem:[#allocation1 + $0x1] ss:$9 sm:$0xff] %v1443_v43  ;;  %v1462_v43 = vperm.slane %v3649_v14, 4 }
 0x3da   :  { %2010 = vst [vmem:[#allocation1 + $0x2] ss:$9 sm:$0xff] %v1444_v56  ;;  %v1465_v56 = vperm.slane %v3649_v14, 7  ;;  %v1471_v14 = vperm.slane %v3666_v59, 5 }
 0x3db   :  { %2011 = vst [vmem:[#allocation1 + $0x3] ss:$9 sm:$0xff] %v1445_v57  ;;  %v1466_v57 = vperm.slane %v3666_v59, 0 }
 0x3dc   :  { %2012 = vst [vmem:[#allocation1 + $0x4] ss:$9 sm:$0xff] %v1446_v58  ;;  %v1467_v58 = vperm.slane %v3666_v59, 1 }
 0x3dd   :  { %2013 = vst [vmem:[#allocation1 + $0x5] ss:$9 sm:$0xff] %v1447_v17 }
 0x3de   :  { %2014 = vst [vmem:[#allocation1 + $0x6] ss:$9 sm:$0xff] %v1448_v47  ;;  %v1468_v47 = vperm.slane %v3666_v59, 2 }
 0x3df   :  { %2015 = vst [vmem:[#allocation1 + $0x7] ss:$9 sm:$0xff] %v1449_v16  ;;  %v1470_v16 = vperm.slane %v3666_v59, 4  ;;  %v1479_v59 = vperm.slane %v3681_v34, 5 }
 0x3e6   :  { %v2016_v45 = vld [vmem:[#allocation1] sm:$0xff] }
 0x3e7   :  { %2017 = vst [vmem:[#allocation1] ss:$9 sm:$0xff] %v1450_v5  ;;  %2303 = vperm.xlu0 %2610, %v2016_v45   ;;  %v1477_v45 = vperm.slane %v3681_v34, 3 }
 0x3e8   :  { %2018 = vst [vmem:[#allocation1 + $0x1] ss:$9 sm:$0xff] %v1451_v63  ;;  %v1478_v63 = vperm.slane %v3681_v34, 4 }
 0x3e9   :  { %2019 = vst [vmem:[#allocation1 + $0x2] ss:$9 sm:$0xff] %v1452_v11  ;;  %v1480_v11 = vperm.slane %v3681_v34, 6 }
 0x3ea   :  { %2020 = vst [vmem:[#allocation1 + $0x3] ss:$9 sm:$0xff] %v1453_v50  ;;  %v1481_v50 = vperm.slane %v3681_v34, 7  ;;  %v1487_v34 = vperm.slane %v3663_v30, 5 }
 0x3eb   :  { %2021 = vst [vmem:[#allocation1 + $0x4] ss:$9 sm:$0xff] %v1454_v31  ;;  %v1482_v31 = vperm.slane %v3663_v30, 0 }
 0x3ec   :  { %2022 = vst [vmem:[#allocation1 + $0x5] ss:$9 sm:$0xff] %v1455_v27  ;;  %v1483_v27 = vperm.slane %v3663_v30, 1 }
 0x3ed   :  { %2023 = vst [vmem:[#allocation1 + $0x6] ss:$9 sm:$0xff] %v1456_v54 }
 0x3ee   :  { %2024 = vst [vmem:[#allocation1 + $0x7] ss:$9 sm:$0xff] %v1457_v29  ;;  %v1484_v29 = vperm.slane %v3663_v30, 2 }
 0x3f5   :  { %v2025_v32 = vld [vmem:[#allocation1] sm:$0xff] }
 0x3f6   :  { %2026 = vst [vmem:[#allocation1] ss:$9 sm:$0xff] %v1458_v2  ;;  %2306 = vperm.xlu2 %2609, %v2025_v32   ;;  %v1485_v2 = vperm.slane %v3663_v30, 3  ;;  %v1488_v32 = vperm.slane %v3663_v30, 6 }
 0x3f7   :  { %2027 = vst [vmem:[#allocation1 + $0x1] ss:$9 sm:$0xff] %v1459_v24  ;;  %v1486_v24 = vperm.slane %v3663_v30, 4 }
 0x3f8   :  { %2028 = vst [vmem:[#allocation1 + $0x2] ss:$9 sm:$0xff] %v1460_v4  ;;  %v1489_v4 = vperm.slane %v3663_v30, 7  ;;  %v1493_v30 = vperm.slane %v3679_v25, 3 }
 0x3f9   :  { %2029 = vst [vmem:[#allocation1 + $0x3] ss:$9 sm:$0xff] %v1461_v6  ;;  %v2509_v6 = vrot.slane %v3915_v33, 7  ;;  %v1495_v33 = vperm.slane %v3679_v25, 5 }
 0x3fa   :  { %2030 = vst [vmem:[#allocation1 + $0x4] ss:$9 sm:$0xff] %v1462_v43 }
 0x3fb   :  { %2031 = vst [vmem:[#allocation1 + $0x5] ss:$9 sm:$0xff] %v1463_v9  ;;  %v3964_v43 = vsel %vm2512_vm1, %v3903_v0, %v2509_v6  ;;  %v1490_v9 = vperm.slane %v3679_v25, 0  ;;  %v1496_v0 = vperm.slane %v3679_v25, 6  ;;  %v1522_v6 = vperm.slane %v3705_v41, 0 }
 0x3fc   :  { %2032 = vst [vmem:[#allocation1 + $0x6] ss:$9 sm:$0xff] %v1464_v36  ;;  %v1491_v36 = vperm.slane %v3679_v25, 1 }
 0x3fd   :  { %2033 = vst [vmem:[#allocation1 + $0x7] ss:$9 sm:$0xff] %v1465_v56 }
 0x404   :  { %v2034_v17 = vld [vmem:[#allocation1] sm:$0xff] }
 0x405   :  { %2035 = vst [vmem:[#allocation1] ss:$9 sm:$0xff] %v1466_v57  ;;  %2309 = vperm.xlu1 %2611, %v2034_v17   ;;  %v1492_v57 = vperm.slane %v3679_v25, 2  ;;  %v1497_v17 = vperm.slane %v3679_v25, 7 }
 0x406   :  { %2036 = vst [vmem:[#allocation1 + $0x1] ss:$9 sm:$0xff] %v1467_v58  ;;  %v1494_v58 = vperm.slane %v3679_v25, 4  ;;  %v1503_v25 = vperm.slane %v3697_v40, 5 }
 0x407   :  { %2037 = vst [vmem:[#allocation1 + $0x2] ss:$9 sm:$0xff] %v1468_v47  ;;  %v1498_v47 = vperm.slane %v3697_v40, 0 }
 0x408   :  { %2038 = vst [vmem:[#allocation1 + $0x3] ss:$9 sm:$0xff] %v1469_v15  ;;  %v1499_v15 = vperm.slane %v3697_v40, 1 }
 0x409   :  { %2039 = vst [vmem:[#allocation1 + $0x4] ss:$9 sm:$0xff] %v1470_v16 }
 0x40a   :  { %2040 = vst [vmem:[#allocation1 + $0x5] ss:$9 sm:$0xff] %v1471_v14  ;;  %v1500_v14 = vperm.slane %v3697_v40, 2 }
 0x40b   :  { %2041 = vst [vmem:[#allocation1 + $0x6] ss:$9 sm:$0xff] %v1472_v39  ;;  %v1501_v39 = vperm.slane %v3697_v40, 3 }
 0x40c   :  { %2042 = vst [vmem:[#allocation1 + $0x7] ss:$9 sm:$0xff] %v1473_v35  ;;  %v1502_v35 = vperm.slane %v3697_v40, 4 }
 0x413   :  { %v2043_v5 = vld [vmem:[#allocation1] sm:$0xff] }
 0x414   :  { %2044 = vst [vmem:[#allocation1] ss:$9 sm:$0xff] %v1474_v44  ;;  %2312 = vperm.xlu0 %2610, %v2043_v5   ;;  %v1504_v44 = vperm.slane %v3697_v40, 6  ;;  %v1505_v5 = vperm.slane %v3697_v40, 7  ;;  %v1511_v40 = vperm.slane %v3673_v3, 5 }
 0x415   :  { %2045 = vst [vmem:[#allocation1 + $0x1] ss:$9 sm:$0xff] %v1475_v61  ;;  %v1506_v61 = vperm.slane %v3673_v3, 0 }
 0x416   :  { %2046 = vst [vmem:[#allocation1 + $0x2] ss:$9 sm:$0xff] %v1476_v53  ;;  %v1507_v53 = vperm.slane %v3673_v3, 1 }
 0x417   :  { %2047 = vst [vmem:[#allocation1 + $0x3] ss:$9 sm:$0xff] %v1477_v45 }
 0x418   :  { %2048 = vst [vmem:[#allocation1 + $0x4] ss:$9 sm:$0xff] %v1478_v63  ;;  %v1508_v63 = vperm.slane %v3673_v3, 2 }
 0x419   :  { %2049 = vst [vmem:[#allocation1 + $0x5] ss:$9 sm:$0xff] %v1479_v59  ;;  %v1509_v59 = vperm.slane %v3673_v3, 3 }
 0x41a   :  { %2050 = vst [vmem:[#allocation1 + $0x6] ss:$9 sm:$0xff] %v1480_v11  ;;  %v1510_v11 = vperm.slane %v3673_v3, 4 }
 0x41b   :  { %2051 = vst [vmem:[#allocation1 + $0x7] ss:$9 sm:$0xff] %v1481_v50  ;;  %v1512_v50 = vperm.slane %v3673_v3, 6 }
 0x422   :  { %v2052_v54 = vld [vmem:[#allocation1] sm:$0xff] }
 0x423   :  { %2053 = vst [vmem:[#allocation1] ss:$9 sm:$0xff] %v1482_v31  ;;  %2315 = vperm.xlu2 %2609, %v2052_v54   ;;  %v1513_v31 = vperm.slane %v3673_v3, 7  ;;  %v1515_v54 = vperm.slane %v3691_v22, 1  ;;  %v1519_v3 = vperm.slane %v3691_v22, 5 }
 0x424   :  { %2054 = vst [vmem:[#allocation1 + $0x1] ss:$9 sm:$0xff] %v1483_v27  ;;  %v1514_v27 = vperm.slane %v3691_v22, 0 }
 0x425   :  { %2055 = vst [vmem:[#allocation1 + $0x2] ss:$9 sm:$0xff] %v1484_v29 }
 0x426   :  { %2056 = vst [vmem:[#allocation1 + $0x3] ss:$9 sm:$0xff] %v1485_v2  ;;  %v1516_v2 = vperm.slane %v3691_v22, 2 }
 0x427   :  { %2057 = vst [vmem:[#allocation1 + $0x4] ss:$9 sm:$0xff] %v1486_v24  ;;  %v1517_v24 = vperm.slane %v3691_v22, 3 }
 0x428   :  { %2058 = vst [vmem:[#allocation1 + $0x5] ss:$9 sm:$0xff] %v1487_v34  ;;  %v1518_v34 = vperm.slane %v3691_v22, 4 }
 0x429   :  { %2059 = vst [vmem:[#allocation1 + $0x6] ss:$9 sm:$0xff] %v1488_v32  ;;  %v1520_v32 = vperm.slane %v3691_v22, 6 }
 0x42a   :  { %2060 = vst [vmem:[#allocation1 + $0x7] ss:$9 sm:$0xff] %v1489_v4  ;;  %v1521_v4 = vperm.slane %v3691_v22, 7  ;;  %v1527_v22 = vperm.slane %v3705_v41, 5 }
 0x431   :  { %v2061_v56 = vld [vmem:[#allocation1] sm:$0xff] }
 0x432   :  { %2318 = vperm.xlu1 %2611, %v2061_v56   ;;  %2062 = vst [vmem:[#allocation1] ss:$9 sm:$0xff] %v1490_v9  ;;  %v1523_v9 = vperm.slane %v3705_v41, 1  ;;  %v1524_v56 = vperm.slane %v3705_v41, 2 }
 0x433   :  { %2063 = vst [vmem:[#allocation1 + $0x1] ss:$9 sm:$0xff] %v1491_v36 }
 0x434   :  { %2064 = vst [vmem:[#allocation1 + $0x2] ss:$9 sm:$0xff] %v1492_v57  ;;  %v1525_v57 = vperm.slane %v3705_v41, 3 }
 0x435   :  { %2065 = vst [vmem:[#allocation1 + $0x3] ss:$9 sm:$0xff] %v1493_v30  ;;  %v1526_v30 = vperm.slane %v3705_v41, 4 }
 0x436   :  { %2066 = vst [vmem:[#allocation1 + $0x4] ss:$9 sm:$0xff] %v1494_v58  ;;  %v1528_v58 = vperm.slane %v3705_v41, 6 }
 0x437   :  { %2067 = vst [vmem:[#allocation1 + $0x5] ss:$9 sm:$0xff] %v1495_v33  ;;  %v1529_v33 = vperm.slane %v3705_v41, 7  ;;  %v1535_v41 = vperm.slane %v3683_v49, 5 }
 0x438   :  { %2068 = vst [vmem:[#allocation1 + $0x6] ss:$9 sm:$0xff] %v1496_v0  ;;  %v1530_v0 = vperm.slane %v3683_v49, 0 }
 0x439   :  { %2069 = vst [vmem:[#allocation1 + $0x7] ss:$9 sm:$0xff] %v1497_v17  ;;  %v1531_v17 = vperm.slane %v3683_v49, 1 }
 0x440   :  { %v2070_v16 = vld [vmem:[#allocation1] sm:$0xff] }
 0x441   :  { %2321 = vperm.xlu0 %2610, %v2070_v16   ;;  %2071 = vst [vmem:[#allocation1] ss:$9 sm:$0xff] %v1498_v47  ;;  %v1533_v16 = vperm.slane %v3683_v49, 3 }
 0x442   :  { %2072 = vst [vmem:[#allocation1 + $0x1] ss:$9 sm:$0xff] %v1499_v15  ;;  %v1532_v15 = vperm.slane %v3683_v49, 2 }
 0x443   :  { %2073 = vst [vmem:[#allocation1 + $0x2] ss:$9 sm:$0xff] %v1500_v14  ;;  %v1534_v14 = vperm.slane %v3683_v49, 4 }
 0x444   :  { %2074 = vst [vmem:[#allocation1 + $0x3] ss:$9 sm:$0xff] %v1501_v39  ;;  %v1536_v39 = vperm.slane %v3683_v49, 6 }
 0x445   :  { %2075 = vst [vmem:[#allocation1 + $0x4] ss:$9 sm:$0xff] %v1502_v35  ;;  %v1537_v35 = vperm.slane %v3683_v49, 7  ;;  %v1543_v49 = vperm.slane %v3700_v19, 5 }
 0x446   :  { %2076 = vst [vmem:[#allocation1 + $0x5] ss:$9 sm:$0xff] %v1503_v25  ;;  %v1538_v25 = vperm.slane %v3700_v19, 0 }
 0x447   :  { %2077 = vst [vmem:[#allocation1 + $0x6] ss:$9 sm:$0xff] %v1504_v44  ;;  %v1539_v44 = vperm.slane %v3700_v19, 1 }
 0x448   :  { %2078 = vst [vmem:[#allocation1 + $0x7] ss:$9 sm:$0xff] %v1505_v5 }
 0x44f   :  { %v2079_v45 = vld [vmem:[#allocation1] sm:$0xff] }
 0x450   :  { %2324 = vperm.xlu2 %2609, %v2079_v45   ;;  %2080 = vst [vmem:[#allocation1] ss:$9 sm:$0xff] %v1506_v61  ;;  %v1540_v61 = vperm.slane %v3700_v19, 2  ;;  %v1542_v45 = vperm.slane %v3700_v19, 4 }
 0x451   :  { %2081 = vst [vmem:[#allocation1 + $0x1] ss:$9 sm:$0xff] %v1507_v53  ;;  %v1541_v53 = vperm.slane %v3700_v19, 3 }
 0x452   :  { %2082 = vst [vmem:[#allocation1 + $0x2] ss:$9 sm:$0xff] %v1508_v63  ;;  %v1544_v63 = vperm.slane %v3700_v19, 6 }
 0x453   :  { %2083 = vst [vmem:[#allocation1 + $0x3] ss:$9 sm:$0xff] %v1509_v59  ;;  %v1545_v59 = vperm.slane %v3700_v19, 7  ;;  %v1551_v19 = vperm.slane %v3713_v42, 5 }
 0x454   :  { %2084 = vst [vmem:[#allocation1 + $0x4] ss:$9 sm:$0xff] %v1510_v11  ;;  %v1546_v11 = vperm.slane %v3713_v42, 0 }
 0x455   :  { %2085 = vst [vmem:[#allocation1 + $0x5] ss:$9 sm:$0xff] %v1511_v40  ;;  %v1547_v40 = vperm.slane %v3713_v42, 1 }
 0x456   :  { %2086 = vst [vmem:[#allocation1 + $0x6] ss:$9 sm:$0xff] %v1512_v50 }
 0x457   :  { %2087 = vst [vmem:[#allocation1 + $0x7] ss:$9 sm:$0xff] %v1513_v31  ;;  %v1548_v31 = vperm.slane %v3713_v42, 2 }
 0x45e   :  { %v2088_v29 = vld [vmem:[#allocation1] sm:$0xff] }
 0x45f   :  { %2327 = vperm.xlu1 %2611, %v2088_v29   ;;  %2089 = vst [vmem:[#allocation1] ss:$9 sm:$0xff] %v1514_v27  ;;  %v1549_v27 = vperm.slane %v3713_v42, 3  ;;  %v1552_v29 = vperm.slane %v3713_v42, 6 }
 0x460   :  { %2090 = vst [vmem:[#allocation1 + $0x1] ss:$9 sm:$0xff] %v1515_v54  ;;  %v1550_v54 = vperm.slane %v3713_v42, 4 }
 0x461   :  { %2091 = vst [vmem:[#allocation1 + $0x2] ss:$9 sm:$0xff] %v1516_v2  ;;  %v1553_v2 = vperm.slane %v3713_v42, 7  ;;  %v1559_v42 = vperm.slane %v3694_v20, 5 }
 0x462   :  { %2092 = vst [vmem:[#allocation1 + $0x3] ss:$9 sm:$0xff] %v1517_v24  ;;  %v1554_v24 = vperm.slane %v3694_v20, 0 }
 0x463   :  { %2093 = vst [vmem:[#allocation1 + $0x4] ss:$9 sm:$0xff] %v1518_v34  ;;  %v1555_v34 = vperm.slane %v3694_v20, 1 }
 0x464   :  { %2094 = vst [vmem:[#allocation1 + $0x5] ss:$9 sm:$0xff] %v1519_v3 }
 0x465   :  { %2095 = vst [vmem:[#allocation1 + $0x6] ss:$9 sm:$0xff] %v1520_v32  ;;  %v1556_v32 = vperm.slane %v3694_v20, 2 }
 0x466   :  { %2096 = vst [vmem:[#allocation1 + $0x7] ss:$9 sm:$0xff] %v1521_v4  ;;  %v1557_v4 = vperm.slane %v3694_v20, 3 }
 0x46d   :  { %v2097_v36 = vld [vmem:[#allocation1] sm:$0xff] }
 0x46e   :  { %2330 = vperm.xlu0 %2610, %v2097_v36   ;;  %2098 = vst [vmem:[#allocation1] ss:$9 sm:$0xff] %v1522_v6  ;;  %v1558_v6 = vperm.slane %v3694_v20, 4  ;;  %v1561_v36 = vperm.slane %v3694_v20, 7 }
 0x46f   :  { %2099 = vst [vmem:[#allocation1 + $0x1] ss:$9 sm:$0xff] %v1523_v9  ;;  %v1560_v9 = vperm.slane %v3694_v20, 6  ;;  %v1567_v20 = vperm.slane %v3711_v48, 5 }
 0x470   :  { %2100 = vst [vmem:[#allocation1 + $0x2] ss:$9 sm:$0xff] %v1524_v56  ;;  %v1562_v56 = vperm.slane %v3711_v48, 0 }
 0x471   :  { %2101 = vst [vmem:[#allocation1 + $0x3] ss:$9 sm:$0xff] %v1525_v57  ;;  %v1563_v57 = vperm.slane %v3711_v48, 1 }
 0x472   :  { %2102 = vst [vmem:[#allocation1 + $0x4] ss:$9 sm:$0xff] %v1526_v30 }
 0x473   :  { %2103 = vst [vmem:[#allocation1 + $0x5] ss:$9 sm:$0xff] %v1527_v22  ;;  %v1564_v22 = vperm.slane %v3711_v48, 2 }
 0x474   :  { %2104 = vst [vmem:[#allocation1 + $0x6] ss:$9 sm:$0xff] %v1528_v58  ;;  %v1565_v58 = vperm.slane %v3711_v48, 3 }
 0x475   :  { %2105 = vst [vmem:[#allocation1 + $0x7] ss:$9 sm:$0xff] %v1529_v33  ;;  %v1566_v33 = vperm.slane %v3711_v48, 4 }
 0x47c   :  { %v2106_v47 = vld [vmem:[#allocation1] sm:$0xff] }
 0x47d   :  { %2333 = vperm.xlu2 %2609, %v2106_v47   ;;  %2107 = vst [vmem:[#allocation1] ss:$9 sm:$0xff] %v1530_v0  ;;  %v1568_v0 = vperm.slane %v3711_v48, 6  ;;  %v1570_v47 = vperm.slane %v3732_v12, 0 }
 0x47e   :  { %2108 = vst [vmem:[#allocation1 + $0x1] ss:$9 sm:$0xff] %v1531_v17  ;;  %v1569_v17 = vperm.slane %v3711_v48, 7  ;;  %v1575_v48 = vperm.slane %v3732_v12, 5 }
 0x47f   :  { %2109 = vst [vmem:[#allocation1 + $0x2] ss:$9 sm:$0xff] %v1532_v15  ;;  %v1571_v15 = vperm.slane %v3732_v12, 1 }
 0x480   :  { %2110 = vst [vmem:[#allocation1 + $0x3] ss:$9 sm:$0xff] %v1533_v16 }
 0x481   :  { %2111 = vst [vmem:[#allocation1 + $0x4] ss:$9 sm:$0xff] %v1534_v14  ;;  %v1572_v14 = vperm.slane %v3732_v12, 2 }
 0x482   :  { %2112 = vst [vmem:[#allocation1 + $0x5] ss:$9 sm:$0xff] %v1535_v41  ;;  %v1573_v41 = vperm.slane %v3732_v12, 3 }
 0x483   :  { %2113 = vst [vmem:[#allocation1 + $0x6] ss:$9 sm:$0xff] %v1536_v39  ;;  %v1574_v39 = vperm.slane %v3732_v12, 4 }
 0x484   :  { %2114 = vst [vmem:[#allocation1 + $0x7] ss:$9 sm:$0xff] %v1537_v35  ;;  %v1576_v35 = vperm.slane %v3732_v12, 6 }
 0x48b   :  { %v2115_v5 = vld [vmem:[#allocation1] sm:$0xff] }
 0x48c   :  { %2336 = vperm.xlu1 %2611, %v2115_v5   ;;  %2116 = vst [vmem:[#allocation1] ss:$9 sm:$0xff] %v1538_v25  ;;  %v1577_v25 = vperm.slane %v3732_v12, 7  ;;  %v2265_v5 = vpop.permute.xlu1 %2264 }
 0x48d   :  { %2117 = vst [vmem:[#allocation1 + $0x1] ss:$9 sm:$0xff] %v1539_v44 }
 0x48e   :  { %2118 = vst [vmem:[#allocation1 + $0x2] ss:$9 sm:$0xff] %v1540_v61  ;;  %v2271_v61 = vpop.permute.xlu2 %2270 }
 0x48f   :  { %2119 = vst [vmem:[#allocation1 + $0x3] ss:$9 sm:$0xff] %v1541_v53  ;;  %v2268_v53 = vpop.permute.xlu0 %2267 }
 0x490   :  { %2120 = vst [vmem:[#allocation1 + $0x4] ss:$9 sm:$0xff] %v1542_v45 }
 0x491   :  { %2121 = vst [vmem:[#allocation1 + $0x5] ss:$9 sm:$0xff] %v1543_v49 }
 0x492   :  { %2122 = vst [vmem:[#allocation1 + $0x6] ss:$9 sm:$0xff] %v1544_v63 }
 0x493   :  { %2123 = vst [vmem:[#allocation1 + $0x7] ss:$9 sm:$0xff] %v1545_v59 }
 0x494   :  { %v2274_v45 = vpop.permute.xlu1 %2273 }
 0x496   :  { %v2280_v49 = vpop.permute.xlu2 %2279 }
 0x497   :  { %v2277_v63 = vpop.permute.xlu0 %2276 }
 0x49a   :  { %v2124_v50 = vld [vmem:[#allocation1] sm:$0xff] }
 0x49b   :  { %2339 = vperm.xlu0 %2610, %v2124_v50   ;;  %2125 = vst [vmem:[#allocation1] ss:$9 sm:$0xff] %v1546_v11 }
 0x49c   :  { %2126 = vst [vmem:[#allocation1 + $0x1] ss:$9 sm:$0xff] %v1547_v40  ;;  %v2283_v59 = vpop.permute.xlu1 %2282 }
 0x49d   :  { %2127 = vst [vmem:[#allocation1 + $0x2] ss:$9 sm:$0xff] %v1548_v31 }
 0x49e   :  { %2128 = vst [vmem:[#allocation1 + $0x3] ss:$9 sm:$0xff] %v1549_v27  ;;  %v2289_v11 = vpop.permute.xlu2 %2288 }
 0x49f   :  { %2129 = vst [vmem:[#allocation1 + $0x4] ss:$9 sm:$0xff] %v1550_v54  ;;  %v2286_v40 = vpop.permute.xlu0 %2285 }
 0x4a0   :  { %2130 = vst [vmem:[#allocation1 + $0x5] ss:$9 sm:$0xff] %v1551_v19 }
 0x4a1   :  { %2131 = vst [vmem:[#allocation1 + $0x6] ss:$9 sm:$0xff] %v1552_v29 }
 0x4a2   :  { %2132 = vst [vmem:[#allocation1 + $0x7] ss:$9 sm:$0xff] %v1553_v2 }
 0x4a4   :  { %v2292_v50 = vpop.permute.xlu1 %2291 }
 0x4a6   :  { %v4054_v31 = vpop.permute.xlu2 %2297 }
 0x4a7   :  { %v2295_v27 = vpop.permute.xlu0 %2294 }
 0x4a9   :  { %v2133_v3 = vld [vmem:[#allocation1] sm:$0xff] }
 0x4aa   :  { %2342 = vperm.xlu2 %2609, %v2133_v3   ;;  %2134 = vst [vmem:[#allocation1] ss:$9 sm:$0xff] %v1554_v24 }
 0x4ab   :  { %2135 = vst [vmem:[#allocation1 + $0x1] ss:$9 sm:$0xff] %v1555_v34 }
 0x4ac   :  { %2136 = vst [vmem:[#allocation1 + $0x2] ss:$9 sm:$0xff] %v1556_v32  ;;  %v4056_v54 = vpop.permute.xlu1 %2300 }
 0x4ad   :  { %2137 = vst [vmem:[#allocation1 + $0x3] ss:$9 sm:$0xff] %v1557_v4  ;;  %v2450_v4 = vperm.slane %v2265_v5, %v3742_v1 }
 0x4ae   :  { %2138 = vst [vmem:[#allocation1 + $0x4] ss:$9 sm:$0xff] %v1558_v6  ;;  %v2307_v12 = vpop.permute.xlu2 %2306  ;;  %v2452_v6 = vperm.slane %v2268_v53, %v3735_v37 }
 0x4af   :  { %2139 = vst [vmem:[#allocation1 + $0x5] ss:$9 sm:$0xff] %v1559_v42  ;;  %v4058_v19 = vpop.permute.xlu0 %2303 }
 0x4b0   :  { %2140 = vst [vmem:[#allocation1 + $0x6] ss:$9 sm:$0xff] %v1560_v9 }
 0x4b1   :  { %2141 = vst [vmem:[#allocation1 + $0x7] ss:$9 sm:$0xff] %v1561_v36 }
 0x4b4   :  { %v2310_v29 = vpop.permute.xlu1 %2309 }
 0x4b5   :  { %v2479_v42 = vperm.slane %v2310_v29, %v3722_v52 }
 0x4b6   :  { %v2316_v2 = vpop.permute.xlu2 %2315 }
 0x4b7   :  { %v2313_v24 = vpop.permute.xlu0 %2312 }
 0x4b8   :  { %v2142_v30 = vld [vmem:[#allocation1] sm:$0xff]  ;;  %v2481_v9 = vperm.slane %v2313_v24, %v3742_v1 }
 0x4b9   :  { %2345 = vperm.xlu1 %2611, %v2142_v30   ;;  %2143 = vst [vmem:[#allocation1] ss:$9 sm:$0xff] %v1562_v56  ;;  %v2478_v56 = vperm.slane %v2307_v12, %v3717_v23  ;;  %v2483_v23 = vperm.slane %v2316_v2, %v3735_v37 }
 0x4ba   :  { %2144 = vst [vmem:[#allocation1 + $0x1] ss:$9 sm:$0xff] %v1563_v57  ;;  %v2451_v57 = vsel %vm2362_vm3, %v2450_v4, %v3923_v21 }
 0x4bb   :  { %2145 = vst [vmem:[#allocation1 + $0x2] ss:$9 sm:$0xff] %v1564_v22  ;;  %v2453_v30 = vsel %vm2366_vm4, %v2452_v6, %v2451_v57  ;;  %v2456_v22 = vperm.slane %v2274_v45, %v3761_v62 }
 0x4bc   :  { %2146 = vst [vmem:[#allocation1 + $0x3] ss:$9 sm:$0xff] %v1565_v58  ;;  %v2319_v34 = vpop.permute.xlu1 %2318  ;;  %v2480_v58 = vsel %vm2358_vm2, %v2479_v42, %v2478_v56  ;;  %vm2514_vm2 = vcmask 1042434  }
 0x4bd   :  { %2147 = vst [vmem:[#allocation1 + $0x4] ss:$9 sm:$0xff] %v1566_v33  ;;  %v2454_v33 = vperm.slane %v2271_v61, %v3739_v7  ;;  %v2482_v52 = vsel %vm2362_vm3, %v2481_v9, %v2480_v58  ;;  %v2485_v1 = vperm.slane %v2319_v34, %v3739_v7  ;;  %v2460_v7 = vperm.slane %v2280_v49, %v3776_v60 }
 0x4be   :  { %2148 = vst [vmem:[#allocation1 + $0x5] ss:$9 sm:$0xff] %v1567_v20  ;;  %v2325_v3 = vpop.permute.xlu2 %2324  ;;  %v2458_v20 = vperm.slane %v2277_v63, %v3758_v18  ;;  %vm2516_vm3 = vcmask 1041408  }
 0x4bf   :  { %2149 = vst [vmem:[#allocation1 + $0x6] ss:$9 sm:$0xff] %v1568_v0  ;;  %v2322_v32 = vpop.permute.xlu0 %2321 }
 0x4c0   :  { %2150 = vst [vmem:[#allocation1 + $0x7] ss:$9 sm:$0xff] %v1569_v17  ;;  %v2487_v21 = vperm.slane %v2322_v32, %v3761_v62 }
 0x4c7   :  { %v2151_v16 = vld [vmem:[#allocation1] sm:$0xff] }
 0x4c8   :  { %2348 = vperm.xlu0 %2610, %v2151_v16   ;;  %2152 = vst [vmem:[#allocation1] ss:$9 sm:$0xff] %v1570_v47  ;;  %v2455_v47 = vsel %vm2370_vm5, %v2454_v33, %v2453_v30  ;;  %v2484_v16 = vsel %vm2366_vm4, %v2483_v23, %v2482_v52  ;;  %vm2520_vm4 = vcmp.lt.s32.totalorder %v2353_v13, 512 }
 0x4c9   :  { %2153 = vst [vmem:[#allocation1 + $0x1] ss:$9 sm:$0xff] %v1571_v15  ;;  %v2457_v15 = vsel %vm2374_vm6, %v2456_v22, %v2455_v47 }
 0x4ca   :  { %2154 = vst [vmem:[#allocation1 + $0x2] ss:$9 sm:$0xff] %v1572_v14  ;;  %v2459_v14 = vsel %vm2378_vm7, %v2458_v20, %v2457_v15 }
 0x4cb   :  { %2155 = vst [vmem:[#allocation1 + $0x3] ss:$9 sm:$0xff] %v1573_v41  ;;  %v2462_v41 = vperm.slane %v2283_v59, %v3769_v8  ;;  %v2461_v5 = vsel %vm2382_vm8, %v2460_v7, %v2459_v14  ;;  %v2468_v59 = vperm.slane %v2292_v50, %v3791_v55 }
 0x4cc   :  { %2156 = vst [vmem:[#allocation1 + $0x4] ss:$9 sm:$0xff] %v1574_v39  ;;  %v2486_v39 = vsel %vm2370_vm5, %v2485_v1, %v2484_v16 }
 0x4cd   :  { %2157 = vst [vmem:[#allocation1 + $0x5] ss:$9 sm:$0xff] %v1575_v48  ;;  %v2488_v37 = vsel %vm2374_vm6, %v2487_v21, %v2486_v39  ;;  %v2463_v61 = vsel %vm2386_vm9, %v2462_v41, %v2461_v5 }
 0x4ce   :  { %2158 = vst [vmem:[#allocation1 + $0x6] ss:$9 sm:$0xff] %v1576_v35  ;;  %v2464_v35 = vperm.slane %v2286_v40, %v3773_v51 }
 0x4cf   :  { %2159 = vst [vmem:[#allocation1 + $0x7] ss:$9 sm:$0xff] %v1577_v25  ;;  %v2489_v25 = vperm.slane %v2325_v3, %v3758_v18  ;;  %v2470_v18 = vperm.slane %v2295_v27, %v3794_v26 }
 0x4d0   :  { %v2465_v49 = vsel %vm2390_vm10, %v2464_v35, %v2463_v61 }
 0x4d1   :  { %v2328_v36 = vpop.permute.xlu1 %2327  ;;  %v2490_v53 = vsel %vm2378_vm7, %v2489_v25, %v2488_v37 }
 0x4d2   :  { %v2491_v62 = vperm.slane %v2328_v36, %v3776_v60  ;;  %v2466_v60 = vperm.slane %v2289_v11, %v3797_v46  ;;  %v2474_v11 = vperm.slane %v4056_v54, %v3810_v38 }
 0x4d4   :  { %v2492_v40 = vsel %vm2382_vm8, %v2491_v62, %v2490_v53  ;;  %v2467_v24 = vsel %vm2394_vm11, %v2466_v60, %v2465_v49 }
 0x4d5   :  { %v2469_v3 = vsel %vm2398_vm12, %v2468_v59, %v2467_v24 }
 0x4d6   :  { %v2160_v44 = vld [vmem:[#allocation1] sm:$0xff]  ;;  %v2471_v32 = vsel %vm2402_vm13, %v2470_v18, %v2469_v3 }
 0x4d7   :  { %2351 = vperm.xlu2 %2609, %v2160_v44   ;;  %v2334_v0 = vpop.permute.xlu2 %2333 }
 0x4d8   :  { %v2495_v29 = vperm.slane %v2334_v0, %v3773_v51  ;;  %v2476_v51 = vperm.slane %v4058_v19, %v3890_v28 }
 0x4e0   :  { %v2331_v17 = vpop.permute.xlu0 %2330 }
 0x4e1   :  { %v2493_v44 = vperm.slane %v2331_v17, %v3769_v8 }
 0x4e3   :  { %v2494_v8 = vsel %vm2386_vm9, %v2493_v44, %v2492_v40 }
 0x4e4   :  { %v2496_v50 = vsel %vm2390_vm10, %v2495_v29, %v2494_v8 }
 0x4fe   :  { %v2337_v48 = vpop.permute.xlu1 %2336 }
 0x4ff   :  { %v2497_v12 = vperm.slane %v2337_v48, %v3797_v46  ;;  %v2472_v46 = vperm.slane %v4054_v31, %v3814_v10 }
 0x501   :  { %v2498_v27 = vsel %vm2394_vm11, %v2497_v12, %v2496_v50  ;;  %v2473_v9 = vsel %vm2406_vm14, %v2472_v46, %v2471_v32 }
 0x502   :  { %v2475_v54 = vsel %vm2410_vm15, %v2474_v11, %v2473_v9 }
 0x503   :  { %v2477_v31 = vsel %vm2414_vm0, %v2476_v51, %v2475_v54 }
 0x504   :  { %v2343_v45 = vpop.permute.xlu2 %2342  ;;  %v2510_v22 = vrot.slane %v2477_v31, 6 }
 0x505   :  { %v2501_v6 = vperm.slane %v2343_v45, %v3794_v26 }
 0x50d   :  { %v2340_v63 = vpop.permute.xlu0 %2339 }
 0x50e   :  { %v2499_v2 = vperm.slane %v2340_v63, %v3791_v55 }
 0x510   :  { %v2500_v55 = vsel %vm2398_vm12, %v2499_v2, %v2498_v27 }
 0x511   :  { %v2502_v56 = vsel %vm2402_vm13, %v2501_v6, %v2500_v55 }
 0x52b   :  { %v2346_v34 = vpop.permute.xlu1 %2345 }
 0x52c   :  { %v2503_v4 = vperm.slane %v2346_v34, %v3814_v10 }
 0x52e   :  { %v2504_v30 = vsel %vm2406_vm14, %v2503_v4, %v2502_v56 }
 0x531   :  { %v2352_v42 = vpop.permute.xlu2 %2351 }
 0x532   :  { %v2507_v19 = vperm.slane %v2352_v42, %v3890_v28 }
 0x53a   :  { %v2349_v36 = vpop.permute.xlu0 %2348 }
 0x53b   :  { %v2505_v57 = vperm.slane %v2349_v36, %v3810_v38 }
 0x53d   :  { %v2506_v10 = vsel %vm2410_vm15, %v2505_v57, %v2504_v30 }
 0x53e   :  { %v2508_v26 = vsel %vm2414_vm0, %v2507_v19, %v2506_v10 }
 0x53f   :  { %v2511_v58 = vrot.slane %v2508_v26, 5 }
 0x541   :  { %v2515_v38 = vsel %vm2514_vm2, %v2510_v22, %v2511_v58 }
 0x542   :  { %v2517_v28 = vsel %vm2516_vm3, %v3964_v43, %v2515_v38 }
 0x543   :  { %2522 = vst.msk [vmem:[#allocation2] sm:$0xf] %vm2520_vm4, %v2517_v28 }
 0x544   :  { %2533 = dma.vmem_to_hbm [thread:$0]  %s2529_s5, 64, %s2531_s8, [#allocation3]  }
 0x545   :  { %2638 = dma.done.wait [#allocation3], 64  }
 0x546   :  { %2639 = vsyncadd [#allocation3], 4294967232 }
 0x547   :  { %2538 = vsyncpa [#allocation3], 1 }

</bundles_post_ra>
